<compile_context>
chip_gen: v7x
topology: tpu7x:2x2x1
jax: 0.10.0
libtpu: 0.0.40
codegen_flags: <defaults>
</compile_context>

<pallas_src>
import jax
import jax.numpy as jnp
from jax.experimental import pallas as pl
from jax.experimental.pallas import tpu as pltpu

CAPACITY1 = 128 * 2 ** 4   # 2048
CAPACITY2 = 64 * 2 ** 4    # 1024
LAT_DIM = 2
OBS_DIM = 128
HEAD_PAD = 128             # lane-dense fused-head width: [mu | logvar | zero pad]


def encoder_kernel(x_ref, w1_ref, b1_ref, w2_ref, b2_ref, wh_ref, bh_ref,
                   out_ref):
    # hidden1 + ReLU  (bf16 x bf16 -> f32 on the MXU; VPU work stays f32)
    x = x_ref[...].astype(jnp.bfloat16)                                # (TM, 128)
    h1 = jnp.dot(x, w1_ref[...], preferred_element_type=jnp.float32) + b1_ref[...]
    h1 = jnp.maximum(h1, 0.0)                                          # (TM, 2048) f32
    # hidden2 + ReLU
    h2 = jnp.dot(h1.astype(jnp.bfloat16), w2_ref[...],
                 preferred_element_type=jnp.float32) + b2_ref[...]
    h2 = jnp.maximum(h2, 0.0)                                          # (TM, 1024) f32
    # fused heads: cols [0:2]=mu, [2:4]=logvar, rest zero padding (lane dense)
    out_ref[...] = jnp.dot(h2.astype(jnp.bfloat16), wh_ref[...],
                           preferred_element_type=jnp.float32) + bh_ref[...]


def _round_up(n, m):
    return ((n + m - 1) // m) * m


def encoder_forward(x, prepared_params, *, block_tm=256):
    """x: (B, OBS_DIM) f32. Returns (mu, logvar), each (B, LAT_DIM) f32."""
    w1, b1, w2, b2, wh, bh = prepared_params
    B = x.shape[0]

    # Pad batch to a multiple of the batch tile (min granularity: 8 sublanes).
    bp = _round_up(B, 8)
    tm = min(block_tm, bp)
    bp = _round_up(bp, tm)
    if bp != B:
        x = jnp.pad(x, ((0, bp - B), (0, 0)))

    const2d = lambda a: pl.BlockSpec(a.shape, lambda i: (0, 0))  # VMEM-resident

    out = pl.pallas_call(
        encoder_kernel,
        out_shape=jax.ShapeDtypeStruct((bp, HEAD_PAD), jnp.float32),
        grid=(pl.cdiv(bp, tm),),
        in_specs=[
            pl.BlockSpec((tm, OBS_DIM), lambda i: (i, 0)),   # x: tiled over batch
            const2d(w1), const2d(b1),
            const2d(w2), const2d(b2),
            const2d(wh), const2d(bh),
        ],
        out_specs=pl.BlockSpec((tm, HEAD_PAD), lambda i: (i, 0)),
        compiler_params=pltpu.CompilerParams(
            dimension_semantics=("parallel",)),
    )(x, w1, b1, w2, b2, wh, bh)

    mu = out[:B, :LAT_DIM]
    logvar = out[:B, LAT_DIM:2 * LAT_DIM]
    return mu, logvar


def init_params(key):
    """Deterministic parameter init (Kaiming-uniform-ish, like nn.Linear)."""
    def linear(key, fan_in, fan_out):
        kw, kb = jax.random.split(key)
        bound = 1.0 / jnp.sqrt(fan_in)
        # stored pre-transposed: (in_features, out_features)
        w = jax.random.uniform(kw, (fan_in, fan_out), jnp.float32, -bound, bound)
        b = jax.random.uniform(kb, (1, fan_out), jnp.float32, -bound, bound)
        return w, b

    k1, k2, k3, k4 = jax.random.split(key, 4)
    w1, b1 = linear(k1, OBS_DIM, CAPACITY1)
    w2, b2 = linear(k2, CAPACITY1, CAPACITY2)
    wmu, bmu = linear(k3, CAPACITY2, LAT_DIM)
    wlv, blv = linear(k4, CAPACITY2, LAT_DIM)
    return (w1, b1, w2, b2, wmu, bmu, wlv, blv)


def prepare_params(params_f32):
    """Cast matmul weights to bf16 and fuse the two heads into one lane-dense
    (CAPACITY2, HEAD_PAD) matrix. Biases stay f32 (bias add runs on the VPU)."""
    w1, b1, w2, b2, wmu, bmu, wlv, blv = params_f32
    wh = jnp.zeros((CAPACITY2, HEAD_PAD), jnp.float32)
    wh = wh.at[:, :LAT_DIM].set(wmu).at[:, LAT_DIM:2 * LAT_DIM].set(wlv)
    bh = jnp.zeros((1, HEAD_PAD), jnp.float32)
    bh = bh.at[:, :LAT_DIM].set(bmu).at[:, LAT_DIM:2 * LAT_DIM].set(blv)
    return (w1.astype(jnp.bfloat16), b1,
            w2.astype(jnp.bfloat16), b2,
            wh.astype(jnp.bfloat16), bh)


def encoder_reference_bf16(x, prepared_params):
    """Pure-JAX reference with the same bf16-weight / f32-accumulate recipe."""
    w1, b1, w2, b2, wh, bh = prepared_params
    bf, f32 = jnp.bfloat16, jnp.float32
    h1 = jnp.maximum(jnp.dot(x.astype(bf), w1, preferred_element_type=f32) + b1, 0.0)
    h2 = jnp.maximum(jnp.dot(h1.astype(bf), w2, preferred_element_type=f32) + b2, 0.0)
    out = jnp.dot(h2.astype(bf), wh, preferred_element_type=f32) + bh
    return out[:, :LAT_DIM], out[:, LAT_DIM:2 * LAT_DIM]


def encoder_reference_f32(x, params_f32):
    """Full-precision reference of the original torch module."""
    w1, b1, w2, b2, wmu, bmu, wlv, blv = params_f32
    h1 = jnp.maximum(x @ w1 + b1, 0.0)
    h2 = jnp.maximum(h1 @ w2 + b2, 0.0)
    return h2 @ wmu + bmu, h2 @ wlv + blv


if __name__ == "__main__":
    key = jax.random.PRNGKey(0)
    kp, kx = jax.random.split(key)
    params = init_params(kp)
    prepared = prepare_params(params)

    # B=8: single-tile path; B=300: padded multi-tile grid path.
    for B in (8, 300):
        x = jax.random.normal(jax.random.fold_in(kx, B), (B, OBS_DIM),
                              dtype=jnp.float32)
        mu, logvar = encoder_forward(x, prepared)
        jax.block_until_ready((mu, logvar))
        assert mu.shape == (B, LAT_DIM) and logvar.shape == (B, LAT_DIM)

        # Exact-recipe check (bf16 weights, f32 accumulation).
        mu_b, lv_b = encoder_reference_bf16(x, prepared)
        assert jnp.allclose(mu, mu_b, atol=1e-3, rtol=1e-3)
        assert jnp.allclose(logvar, lv_b, atol=1e-3, rtol=1e-3)

        # Sanity vs. full-f32 torch-equivalent math (bf16 quantization slack).
        mu_f, lv_f = encoder_reference_f32(x, params)
        assert jnp.allclose(mu, mu_f, atol=5e-2, rtol=5e-2)
        assert jnp.allclose(logvar, lv_f, atol=5e-2, rtol=5e-2)

    print("KERNEL_OK")
</pallas_src>

<mosaic_0001>
module attributes {stable_mosaic.version = 11 : i64} {
  func.func @encoder_kernel(%arg0: i32, %arg1: memref<8x128xf32, #tpu.memory_space<vmem>>, %arg2: memref<128x2048xbf16, #tpu.memory_space<vmem>>, %arg3: memref<1x2048xf32, #tpu.memory_space<vmem>>, %arg4: memref<2048x1024xbf16, #tpu.memory_space<vmem>>, %arg5: memref<1x1024xf32, #tpu.memory_space<vmem>>, %arg6: memref<1024x128xbf16, #tpu.memory_space<vmem>>, %arg7: memref<1x128xf32, #tpu.memory_space<vmem>>, %arg8: memref<8x128xf32, #tpu.memory_space<vmem>>) attributes {dimension_semantics = [#tpu.dimension_semantics<parallel>], iteration_bounds = array<i64: 1>, scalar_prefetch = 0 : i64, scratch_operands = 0 : i64, tpu.core_type = #tpu.core_type<tc>, window_params = [{transform_indices = @transform_0, window_bounds = array<i64: 8, 128>}, {pipeline_mode = #tpu.pipeline_mode<synchronous>, transform_indices = @transform_1, window_bounds = array<i64: 128, 2048>}, {pipeline_mode = #tpu.pipeline_mode<synchronous>, transform_indices = @transform_2, window_bounds = array<i64: 1, 2048>}, {pipeline_mode = #tpu.pipeline_mode<synchronous>, transform_indices = @transform_3, window_bounds = array<i64: 2048, 1024>}, {pipeline_mode = #tpu.pipeline_mode<synchronous>, transform_indices = @transform_4, window_bounds = array<i64: 1, 1024>}, {pipeline_mode = #tpu.pipeline_mode<synchronous>, transform_indices = @transform_5, window_bounds = array<i64: 1024, 128>}, {pipeline_mode = #tpu.pipeline_mode<synchronous>, transform_indices = @transform_6, window_bounds = array<i64: 1, 128>}, {transform_indices = @transform_7, window_bounds = array<i64: 8, 128>}]} {
    %c0 = arith.constant 0 : index
    %c0_0 = arith.constant 0 : index
    %0 = vector.load %arg1[%c0, %c0_0] : memref<8x128xf32, #tpu.memory_space<vmem>>, vector<8x128xf32>
    %1 = arith.truncf %0 : vector<8x128xf32> to vector<8x128xbf16>
    %c0_1 = arith.constant 0 : index
    %c0_2 = arith.constant 0 : index
    %2 = vector.load %arg2[%c0_1, %c0_2] : memref<128x2048xbf16, #tpu.memory_space<vmem>>, vector<128x2048xbf16>
    %cst = arith.constant dense<0.000000e+00> : vector<8x2048xf32>
    %3 = tpu.matmul %1, %2, %cst {dimension_numbers = #tpu.dot_dimension_numbers<[1], [0], [0], [1], [0, 0, 1, 1], [], []>} : vector<8x128xbf16>, vector<128x2048xbf16>, vector<8x2048xf32> -> vector<8x2048xf32>
    %c0_3 = arith.constant 0 : index
    %c0_4 = arith.constant 0 : index
    %4 = vector.load %arg3[%c0_3, %c0_4] : memref<1x2048xf32, #tpu.memory_space<vmem>>, vector<1x2048xf32>
    %5 = vector.broadcast %4 : vector<1x2048xf32> to vector<8x2048xf32>
    %6 = arith.addf %3, %5 : vector<8x2048xf32>
    %cst_5 = arith.constant 0.000000e+00 : f32
    %7 = vector.broadcast %cst_5 : f32 to vector<8x2048xf32>
    %8 = arith.maximumf %6, %7 : vector<8x2048xf32>
    %9 = arith.truncf %8 : vector<8x2048xf32> to vector<8x2048xbf16>
    %c0_6 = arith.constant 0 : index
    %c0_7 = arith.constant 0 : index
    %10 = vector.load %arg4[%c0_6, %c0_7] : memref<2048x1024xbf16, #tpu.memory_space<vmem>>, vector<2048x1024xbf16>
    %cst_8 = arith.constant dense<0.000000e+00> : vector<8x1024xf32>
    %11 = tpu.matmul %9, %10, %cst_8 {dimension_numbers = #tpu.dot_dimension_numbers<[1], [0], [0], [1], [0, 0, 1, 1], [], []>} : vector<8x2048xbf16>, vector<2048x1024xbf16>, vector<8x1024xf32> -> vector<8x1024xf32>
    %c0_9 = arith.constant 0 : index
    %c0_10 = arith.constant 0 : index
    %12 = vector.load %arg5[%c0_9, %c0_10] : memref<1x1024xf32, #tpu.memory_space<vmem>>, vector<1x1024xf32>
    %13 = vector.broadcast %12 : vector<1x1024xf32> to vector<8x1024xf32>
    %14 = arith.addf %11, %13 : vector<8x1024xf32>
    %cst_11 = arith.constant 0.000000e+00 : f32
    %15 = vector.broadcast %cst_11 : f32 to vector<8x1024xf32>
    %16 = arith.maximumf %14, %15 : vector<8x1024xf32>
    %17 = arith.truncf %16 : vector<8x1024xf32> to vector<8x1024xbf16>
    %c0_12 = arith.constant 0 : index
    %c0_13 = arith.constant 0 : index
    %18 = vector.load %arg6[%c0_12, %c0_13] : memref<1024x128xbf16, #tpu.memory_space<vmem>>, vector<1024x128xbf16>
    %cst_14 = arith.constant dense<0.000000e+00> : vector<8x128xf32>
    %19 = tpu.matmul %17, %18, %cst_14 {dimension_numbers = #tpu.dot_dimension_numbers<[1], [0], [0], [1], [0, 0, 1, 1], [], []>} : vector<8x1024xbf16>, vector<1024x128xbf16>, vector<8x128xf32> -> vector<8x128xf32>
    %c0_15 = arith.constant 0 : index
    %c0_16 = arith.constant 0 : index
    %20 = vector.load %arg7[%c0_15, %c0_16] : memref<1x128xf32, #tpu.memory_space<vmem>>, vector<1x128xf32>
    %21 = vector.broadcast %20 : vector<1x128xf32> to vector<8x128xf32>
    %22 = arith.addf %19, %21 : vector<8x128xf32>
    %c0_17 = arith.constant 0 : index
    %c0_18 = arith.constant 0 : index
    %23 = vector.load %arg8[%c0_17, %c0_18] : memref<8x128xf32, #tpu.memory_space<vmem>>, vector<8x128xf32>
    tpu.vector_store %arg8[%c0_17, %c0_18], %22 {strides = array<i32>} : memref<8x128xf32, #tpu.memory_space<vmem>>, vector<8x128xf32>,
    return
  }
  func.func @transform_0(%arg0: i32) -> (i32, i32) {
    %c0_i32 = arith.constant 0 : i32
    %c0_i32_0 = arith.constant 0 : i32
    return %arg0, %c0_i32 : i32, i32
  }
  func.func @transform_1(%arg0: i32) -> (i32, i32) {
    %c0_i32 = arith.constant 0 : i32
    %c0_i32_0 = arith.constant 0 : i32
    %c0_i32_1 = arith.constant 0 : i32
    return %c0_i32, %c0_i32_0 : i32, i32
  }
  func.func @transform_2(%arg0: i32) -> (i32, i32) {
    %c0_i32 = arith.constant 0 : i32
    %c0_i32_0 = arith.constant 0 : i32
    %c0_i32_1 = arith.constant 0 : i32
    return %c0_i32, %c0_i32_0 : i32, i32
  }
  func.func @transform_3(%arg0: i32) -> (i32, i32) {
    %c0_i32 = arith.constant 0 : i32
    %c0_i32_0 = arith.constant 0 : i32
    %c0_i32_1 = arith.constant 0 : i32
    return %c0_i32, %c0_i32_0 : i32, i32
  }
  func.func @transform_4(%arg0: i32) -> (i32, i32) {
    %c0_i32 = arith.constant 0 : i32
    %c0_i32_0 = arith.constant 0 : i32
    %c0_i32_1 = arith.constant 0 : i32
    return %c0_i32, %c0_i32_0 : i32, i32
  }
  func.func @transform_5(%arg0: i32) -> (i32, i32) {
    %c0_i32 = arith.constant 0 : i32
    %c0_i32_0 = arith.constant 0 : i32
    %c0_i32_1 = arith.constant 0 : i32
    return %c0_i32, %c0_i32_0 : i32, i32
  }
  func.func @transform_6(%arg0: i32) -> (i32, i32) {
    %c0_i32 = arith.constant 0 : i32
    %c0_i32_0 = arith.constant 0 : i32
    %c0_i32_1 = arith.constant 0 : i32
    return %c0_i32, %c0_i32_0 : i32, i32
  }
  func.func @transform_7(%arg0: i32) -> (i32, i32) {
    %c0_i32 = arith.constant 0 : i32
    %c0_i32_0 = arith.constant 0 : i32
    return %arg0, %c0_i32 : i32, i32
  }
}

</mosaic_0001>

<bundles_post_ra>
// kernel: tpu_custom_call.1
= control target key start
LH: loop header
LB: loop body
LE: loop exit
PB: predicated region body
PF: predicated region fallthrough
CT: control target
= control target key end

     0   :  { %12 = vsyncpa [#allocation3], 0  ;;  %s11636_s0 = inlined_call_operand.hbm [shape: f32[8,128], index: 0, kind: input, shape index: {}]   ;;  %s11637_s1 = inlined_call_operand.hbm [shape: bf16[128,2048], index: 1, kind: input, shape index: {}]   ;;  %s11638_s2 = inlined_call_operand.hbm [shape: f32[1,2048], index: 2, kind: input, shape index: {}]   ;;  %s11639_s3 = inlined_call_operand.hbm [shape: bf16[2048,1024], index: 3, kind: input, shape index: {}]   ;;  %s11640_s4 = inlined_call_operand.hbm [shape: f32[1,1024], index: 4, kind: input, shape index: {}]   ;;  %s11641_s5 = inlined_call_operand.hbm [shape: bf16[1024,128], index: 5, kind: input, shape index: {}]   ;;  %s11642_s6 = inlined_call_operand.hbm [shape: f32[1,128], index: 6, kind: input, shape index: {}]   ;;  %s11643_s7 = inlined_call_operand.hbm [shape: f32[8,128], index: 7, kind: output, shape index: {}]  }
   0x1   :  { %13 = vsyncpa [#allocation6], 0 }
   0x2   :  { %14 = vsyncpa [#allocation9], 0 }
   0x3   :  { %15 = vsyncpa [#allocation12], 0 }
   0x4   :  { %16 = vsyncpa [#allocation4], 0  ;;  %s11232_s24 = smov [#allocation5]   ;;  %s11046_s28 = scalar_lea.hbm %s11637_s1, 16384 }
   0x5   :  { %s32_s25 = sshll.u32 %s11232_s24, 4  ;;  %p11047_p0 = scmp.ne.s32.totalorder %s11637_s1, %s11046_s28  ;;  %s33_s25 = int_to_ptr.vmem [resolvable:$true] %s32_s25 }
   0x6   :  { %p11050_p1 = scmp.lt.u32.totalorder %s11046_s28, %s11637_s1 }
   0x8   :  { %p11052_p2 = pnand %p11050_p1, %p11047_p0 }
   0xa   :  { %11055 = shalt.err (!%p11052_p2)
}
   0xb   :  { %s11056_s10 = scalar_lea.vmem %s33_s25, 16384  ;;  %p11061_p4 = scmp.lt.s32.totalorder %s33_s25, %s33_s25 }
   0xc   :  { %p11057_p3 = scmp.ne.s32.totalorder %s33_s25, %s11056_s10  ;;  %p11062_p5 = scmp.lt.s32.totalorder %s11056_s10, %s11056_s10 }
   0xe   :  { %p11063_p6 = por %p11062_p5, %p11061_p4 }
  0x10   :  { %p11064_p7 = pnand %p11063_p6, %p11057_p3 }
  0x12   :  { %11067 = shalt.err (!%p11064_p7)
}
  0x13   :  { %s11233_s11 = smov 1024   ;;  %s11234_s12 = smov 64  }
  0x14   :  { %38 = dma.hbm_to_vmem [thread:$0]  %s11637_s1, 16384, %s33_s25, [#allocation6], %s11233_s11, %s11233_s11, %s11234_s12  }
  0x15   :  { %s11235_s15 = smov [#allocation8]   ;;  %s11068_s19 = scalar_lea.hbm %s11639_s3, 131072 }
  0x16   :  { %s54_s16 = sshll.u32 %s11235_s15, 4  ;;  %p11069_p8 = scmp.ne.s32.totalorder %s11639_s3, %s11068_s19  ;;  %s55_s16 = int_to_ptr.vmem [resolvable:$true] %s54_s16 }
  0x17   :  { %p11072_p9 = scmp.lt.u32.totalorder %s11068_s19, %s11639_s3 }
  0x19   :  { %p11074_p10 = pnand %p11072_p9, %p11069_p8 }
  0x1b   :  { %11077 = shalt.err (!%p11074_p10)
}
  0x1c   :  { %s11078_s24 = scalar_lea.vmem %s55_s16, 131072  ;;  %p11083_p12 = scmp.lt.s32.totalorder %s55_s16, %s55_s16 }
  0x1d   :  { %p11079_p11 = scmp.ne.s32.totalorder %s55_s16, %s11078_s24  ;;  %p11084_p13 = scmp.lt.s32.totalorder %s11078_s24, %s11078_s24 }
  0x1f   :  { %p11085_p0 = por %p11084_p13, %p11083_p12 }
  0x21   :  { %p11086_p1 = pnand %p11085_p0, %p11079_p11 }
  0x23   :  { %11089 = shalt.err (!%p11086_p1)
}
  0x24   :  { %s11236_s1 = smov 512   ;;  %s11237_s25 = smov 32  }
  0x25   :  { %60 = dma.hbm_to_vmem [thread:$0]  %s11639_s3, 131072, %s55_s16, [#allocation9], %s11236_s1, %s11236_s1, %s11237_s25  }
  0x26   :  { %s11238_s28 = smov [#allocation11]   ;;  %s11239_s30 = smov [#allocation2]  }
  0x27   :  { %s76_s29 = sshll.u32 %s11238_s28, 4  ;;  %s23_s8 = sshll.u32 %s11239_s30, 4  ;;  %s77_s29 = int_to_ptr.vmem [resolvable:$true] %s76_s29  ;;  %s24_s8 = int_to_ptr.vmem [resolvable:$true] %s23_s8 }
  0x28   :  { %s11090_s11 = scalar_lea.hbm %s11641_s5, 8192 }
  0x29   :  { %p11091_p2 = scmp.ne.s32.totalorder %s11641_s5, %s11090_s11  ;;  %p11094_p3 = scmp.lt.u32.totalorder %s11090_s11, %s11641_s5 }
  0x2b   :  { %p11096_p4 = pnand %p11094_p3, %p11091_p2 }
  0x2d   :  { %11099 = shalt.err (!%p11096_p4)
}
  0x2e   :  { %s11100_s3 = scalar_lea.vmem %s77_s29, 8192  ;;  %p11105_p6 = scmp.lt.s32.totalorder %s77_s29, %s77_s29 }
  0x2f   :  { %p11101_p5 = scmp.ne.s32.totalorder %s77_s29, %s11100_s3  ;;  %p11106_p7 = scmp.lt.s32.totalorder %s11100_s3, %s11100_s3 }
  0x31   :  { %p11107_p8 = por %p11106_p7, %p11105_p6 }
  0x33   :  { %p11108_p9 = pnand %p11107_p8, %p11101_p5 }
  0x35   :  { %11111 = shalt.err (!%p11108_p9)
}
  0x36   :  { %s11240_s16 = smov 4   ;;  %s11112_s22 = scalar_lea.hbm %s11636_s0, 128 }
  0x37   :  { %82 = dma.hbm_to_vmem [thread:$0]  %s11641_s5, 8192, %s77_s29, [#allocation12], %s11234_s12, %s11234_s12, %s11240_s16  }
  0x38   :  { %p11113_p10 = scmp.ne.s32.totalorder %s11636_s0, %s11112_s22  ;;  %p11116_p11 = scmp.lt.u32.totalorder %s11112_s22, %s11636_s0 }
  0x3a   :  { %p11118_p12 = pnand %p11116_p11, %p11113_p10 }
  0x3c   :  { %11121 = shalt.err (!%p11118_p12)
}
  0x3d   :  { %s11122_s26 = scalar_lea.vmem %s24_s8, 128  ;;  %p11127_p0 = scmp.lt.s32.totalorder %s24_s8, %s24_s8 }
  0x3e   :  { %p11123_p13 = scmp.ne.s32.totalorder %s24_s8, %s11122_s26  ;;  %p11128_p1 = scmp.lt.s32.totalorder %s11122_s26, %s11122_s26 }
  0x40   :  { %p11129_p2 = por %p11128_p1, %p11127_p0 }
  0x42   :  { %p11130_p3 = pnand %p11129_p2, %p11123_p13 }
  0x44   :  { %11133 = shalt.err (!%p11130_p3)
}
  0x45   :  { %26 = dma.hbm_to_vmem [thread:$0]  %s11636_s0, 128, %s24_s8, [#allocation3]  }
  0x46   :  { %s11241_s27 = smov [#allocation7]   ;;  %s11242_s29 = smov [#allocation10]  }
  0x47   :  { %s45_s28 = sshll.u32 %s11241_s27, 4  ;;  %s67_s30 = sshll.u32 %s11242_s29, 4  ;;  %s46_s28 = int_to_ptr.vmem [resolvable:$true] %s45_s28  ;;  %s68_s30 = int_to_ptr.vmem [resolvable:$true] %s67_s30 }
  0x48   :  { %s11134_s11 = scalar_lea.hbm %s11638_s2, 256 }
  0x49   :  { %p11135_p4 = scmp.ne.s32.totalorder %s11638_s2, %s11134_s11  ;;  %p11138_p5 = scmp.lt.u32.totalorder %s11134_s11, %s11638_s2 }
  0x4b   :  { %p11140_p6 = pnand %p11138_p5, %p11135_p4 }
  0x4d   :  { %11143 = shalt.err (!%p11140_p6)
}
  0x4e   :  { %s11144_s0 = scalar_lea.vmem %s46_s28, 256  ;;  %p11149_p8 = scmp.lt.s32.totalorder %s46_s28, %s46_s28 }
  0x4f   :  { %p11145_p7 = scmp.ne.s32.totalorder %s46_s28, %s11144_s0  ;;  %p11150_p9 = scmp.lt.s32.totalorder %s11144_s0, %s11144_s0 }
  0x51   :  { %p11151_p10 = por %p11150_p9, %p11149_p8 }
  0x53   :  { %p11152_p11 = pnand %p11151_p10, %p11145_p7 }
  0x55   :  { %11155 = shalt.err (!%p11152_p11)
}
  0x56   :  { %48 = dma.hbm_to_vmem [thread:$0]  %s11638_s2, 256, %s46_s28, [#allocation6]  }
  0x57   :  { %s11156_s19 = scalar_lea.hbm %s11640_s4, 128 }
  0x58   :  { %p11157_p12 = scmp.ne.s32.totalorder %s11640_s4, %s11156_s19  ;;  %p11160_p13 = scmp.lt.u32.totalorder %s11156_s19, %s11640_s4 }
  0x5a   :  { %p11162_p0 = pnand %p11160_p13, %p11157_p12 }
  0x5c   :  { %11165 = shalt.err (!%p11162_p0)
}
  0x5d   :  { %s11166_s24 = scalar_lea.vmem %s68_s30, 128  ;;  %p11171_p2 = scmp.lt.s32.totalorder %s68_s30, %s68_s30 }
  0x5e   :  { %p11167_p1 = scmp.ne.s32.totalorder %s68_s30, %s11166_s24  ;;  %p11172_p3 = scmp.lt.s32.totalorder %s11166_s24, %s11166_s24 }
  0x60   :  { %p11173_p4 = por %p11172_p3, %p11171_p2 }
  0x62   :  { %p11174_p5 = pnand %p11173_p4, %p11167_p1 }
  0x64   :  { %11177 = shalt.err (!%p11174_p5)
}
  0x65   :  { %70 = dma.hbm_to_vmem [thread:$0]  %s11640_s4, 128, %s68_s30, [#allocation9]  }
  0x66   :  { %s11243_s25 = smov [#allocation13]   ;;  %s11178_s27 = scalar_lea.hbm %s11642_s6, 16 }
  0x67   :  { %s89_s26 = sshll.u32 %s11243_s25, 4  ;;  %p11179_p6 = scmp.ne.s32.totalorder %s11642_s6, %s11178_s27  ;;  %s90_s26 = int_to_ptr.vmem [resolvable:$true] %s89_s26 }
  0x68   :  { %p11182_p7 = scmp.lt.u32.totalorder %s11178_s27, %s11642_s6 }
  0x6a   :  { %p11184_p8 = pnand %p11182_p7, %p11179_p6 }
  0x6c   :  { %11187 = shalt.err (!%p11184_p8)
}
  0x6d   :  { %s11188_s11 = scalar_lea.vmem %s90_s26, 16  ;;  %s11192_s4 = scalar_lea.vmem %s90_s26, 32 }
  0x6e   :  { %p11189_p9 = scmp.ne.s32.totalorder %s90_s26, %s11188_s11  ;;  %p11193_p10 = scmp.lt.s32.totalorder %s90_s26, %s90_s26 }
  0x6f   :  { %p11194_p11 = scmp.lt.s32.totalorder %s11192_s4, %s11188_s11 }
  0x71   :  { %p11195_p12 = por %p11194_p11, %p11193_p10 }
  0x73   :  { %p11196_p13 = pnand %p11195_p12, %p11189_p9 }
  0x75   :  { %11199 = shalt.err (!%p11196_p13)
}
  0x76   :  { %92 = dma.hbm_to_vmem [thread:$0]  %s11642_s6, 16, %s90_s26, [#allocation12]  }
  0x77   :  { %11222 = dma.done.wait [#allocation3], 128  }
  0x78   :  { %11223 = vsyncadd [#allocation3], 4294967168 }
  0x79   :  { %11224 = dma.done.wait [#allocation6], 16640  }
  0x7a   :  { %11225 = vsyncadd [#allocation6], 4294950656 }
  0x7b   :  { %11226 = dma.done.wait [#allocation9], 131200  }
  0x7c   :  { %11227 = vsyncadd [#allocation9], 4294836096 }
  0x7d   :  { %11228 = dma.done.wait [#allocation12], 8208  }
  0x7e   :  { %11229 = vsyncadd [#allocation12], 4294959088  ;;  %v11244_v0 = vmov 0   ;;  %v117_v1 = vld [vmem:[#allocation5] sm:$0xff]  ;;  %v118_v14 = vld [vmem:[#allocation5 + $0x8] sm:$0xff]  ;;  %s11245_s6 = smov [#allocation14]  }
  0x7f   :  { %1001 = vmatprep.mubr.bf16.mxu0 %v11244_v0  ;;  %1042 = vmatprep.mubr.bf16.mxu1 %v11244_v0  ;;  %v125_v2 = vld [vmem:[#allocation5 + $0x40] sm:$0xff]  ;;  %v126_v15 = vld [vmem:[#allocation5 + $0x48] sm:$0xff]  ;;  %v119_v58 = vld [vmem:[#allocation5 + $0x10] sm:$0xff]  ;;  %s9529_s14 = sshll.u32 %s11245_s6, 4  ;;  %s9530_s14 = int_to_ptr.vmem [resolvable:$true] %s9529_s14 }
  0x80   :  { %v133_v3 = vld [vmem:[#allocation5 + $0x80] sm:$0xff]  ;;  %v9542_v4 = vcombine.high %v117_v1, %v125_v2  ;;  %v9541_v5 = vcombine.low %v117_v1, %v125_v2  ;;  %v134_v16 = vld [vmem:[#allocation5 + $0x88] sm:$0xff]  ;;  %v9544_v18 = vcombine.high %v118_v14, %v126_v15  ;;  %v9543_v19 = vcombine.low %v118_v14, %v126_v15  ;;  %v127_v59 = vld [vmem:[#allocation5 + $0x50] sm:$0xff]  ;;  %s11200_s15 = scalar_lea.vmem %s9530_s14, 128  ;;  %p11205_p1 = scmp.lt.s32.totalorder %s9530_s14, %s9530_s14 }
  0x81   :  { %v141_v6 = vld [vmem:[#allocation5 + $0xc0] sm:$0xff]  ;;  %v142_v17 = vld [vmem:[#allocation5 + $0xc8] sm:$0xff]  ;;  %v115_v62 = vld [vmem:[#allocation2] sm:$0xff]  ;;  %v9546_v2 = vcombine.high %v119_v58, %v127_v59  ;;  %p11201_p0 = scmp.ne.s32.totalorder %s9530_s14, %s11200_s15  ;;  %p11206_p2 = scmp.lt.s32.totalorder %s11200_s15, %s11200_s15 }
  0x82   :  { %v9558_v7 = vcombine.high %v133_v3, %v141_v6  ;;  %v149_v8 = vld [vmem:[#allocation5 + $0x100] sm:$0xff]  ;;  %969 = vmatprep.subr.bf16.mxu0 %v9542_v4  ;;  %v9557_v10 = vcombine.low %v133_v3, %v141_v6  ;;  %v9560_v20 = vcombine.high %v134_v16, %v142_v17  ;;  %v150_v22 = vld [vmem:[#allocation5 + $0x108] sm:$0xff]  ;;  %1010 = vmatprep.subr.bf16.mxu1 %v9544_v18  ;;  %v135_v4 = vld [vmem:[#allocation5 + $0x90] sm:$0xff] }
  0x83   :  { %v157_v9 = vld [vmem:[#allocation5 + $0x140] sm:$0xff]  ;;  %970 = vmatpush1.bf16.msra.mxu0 %v9541_v5  ;;  %v158_v23 = vld [vmem:[#allocation5 + $0x148] sm:$0xff]  ;;  %1011 = vmatpush1.bf16.msra.mxu1 %v9543_v19  ;;  %v9559_v27 = vcombine.low %v134_v16, %v142_v17  ;;  %v143_v5 = vld [vmem:[#allocation5 + $0xd0] sm:$0xff]  ;;  %v11375_v6 = vpack.c.bf16 %v115_v62, %v115_v62  ;;  %p11207_p3 = por %p11206_p2, %p11205_p1 }
  0x84   :  { %971 = vmatprep.subr.bf16.mxu0 %v9558_v7  ;;  %v9574_v11 = vcombine.high %v149_v8, %v157_v9  ;;  %v165_v12 = vld [vmem:[#allocation5 + $0x180] sm:$0xff]  ;;  %v9573_v21 = vcombine.low %v149_v8, %v157_v9  ;;  %1012 = vmatprep.subr.bf16.mxu1 %v9560_v20  ;;  %v9576_v28 = vcombine.high %v150_v22, %v158_v23  ;;  %v166_v30 = vld [vmem:[#allocation5 + $0x188] sm:$0xff]  ;;  %v120_v9 = vld [vmem:[#allocation5 + $0x18] sm:$0xff] }
  0x85   :  { %v173_v13 = vld [vmem:[#allocation5 + $0x1c0] sm:$0xff]  ;;  %v174_v31 = vld [vmem:[#allocation5 + $0x1c8] sm:$0xff]  ;;  %v9575_v35 = vcombine.low %v150_v22, %v158_v23  ;;  %v9545_v8 = vcombine.low %v119_v58, %v127_v59  ;;  %v159_v14 = vld [vmem:[#allocation5 + $0x150] sm:$0xff]  ;;  %v9561_v16 = vcombine.low %v135_v4, %v143_v5  ;;  %p11208_p4 = pnand %p11207_p3, %p11201_p0 }
  0x86   :  { %v9590_v24 = vcombine.high %v165_v12, %v173_v13  ;;  %v181_v25 = vld [vmem:[#allocation5 + $0x200] sm:$0xff]  ;;  %v9589_v29 = vcombine.low %v165_v12, %v173_v13  ;;  %v9592_v36 = vcombine.high %v166_v30, %v174_v31  ;;  %v182_v38 = vld [vmem:[#allocation5 + $0x208] sm:$0xff]  ;;  %v9591_v43 = vcombine.low %v166_v30, %v174_v31  ;;  %v151_v13 = vld [vmem:[#allocation5 + $0x110] sm:$0xff] }
  0x87   :  { %972 = vmatpush1.bf16.msra.mxu0 %v9557_v10  ;;  %v189_v26 = vld [vmem:[#allocation5 + $0x240] sm:$0xff]  ;;  %1013 = vmatpush1.bf16.msra.mxu1 %v9559_v27  ;;  %v190_v39 = vld [vmem:[#allocation5 + $0x248] sm:$0xff]  ;;  %v128_v10 = vld [vmem:[#allocation5 + $0x58] sm:$0xff]  ;;  %v9578_v19 = vcombine.high %v151_v13, %v159_v14 }
  0x88   :  { %973 = vmatprep.subr.bf16.mxu0 %v9574_v11  ;;  %v9606_v32 = vcombine.high %v181_v25, %v189_v26  ;;  %v197_v33 = vld [vmem:[#allocation5 + $0x280] sm:$0xff]  ;;  %1014 = vmatprep.subr.bf16.mxu1 %v9576_v28  ;;  %v9605_v37 = vcombine.low %v181_v25, %v189_v26  ;;  %v9608_v44 = vcombine.high %v182_v38, %v190_v39  ;;  %v198_v46 = vld [vmem:[#allocation5 + $0x288] sm:$0xff]  ;;  %v136_v17 = vld [vmem:[#allocation5 + $0x98] sm:$0xff] }
  0x89   :  { %v205_v34 = vld [vmem:[#allocation5 + $0x2c0] sm:$0xff]  ;;  %v206_v47 = vld [vmem:[#allocation5 + $0x2c8] sm:$0xff]  ;;  %v9607_v51 = vcombine.low %v182_v38, %v190_v39  ;;  %v9562_v11 = vcombine.high %v135_v4, %v143_v5  ;;  %v9548_v15 = vcombine.high %v120_v9, %v128_v10  ;;  %v144_v18 = vld [vmem:[#allocation5 + $0xd8] sm:$0xff]  ;;  %v9547_v20 = vcombine.low %v120_v9, %v128_v10 }
  0x8a   :  { %v9622_v40 = vcombine.high %v197_v33, %v205_v34  ;;  %v213_v41 = vld [vmem:[#allocation5 + $0x300] sm:$0xff]  ;;  %v9621_v45 = vcombine.low %v197_v33, %v205_v34  ;;  %v9624_v52 = vcombine.high %v198_v46, %v206_v47  ;;  %v214_v54 = vld [vmem:[#allocation5 + $0x308] sm:$0xff]  ;;  %v9623_v57 = vcombine.low %v198_v46, %v206_v47  ;;  %v175_v22 = vld [vmem:[#allocation5 + $0x1d0] sm:$0xff] }
  0x8b   :  { %974 = vmatpush1.bf16.msra.mxu0 %v9573_v21  ;;  %v221_v42 = vld [vmem:[#allocation5 + $0x340] sm:$0xff]  ;;  %1015 = vmatpush1.bf16.msra.mxu1 %v9575_v35  ;;  %v222_v55 = vld [vmem:[#allocation5 + $0x348] sm:$0xff]  ;;  %v167_v21 = vld [vmem:[#allocation5 + $0x190] sm:$0xff]  ;;  %v9564_v23 = vcombine.high %v136_v17, %v144_v18  ;;  %v9563_v28 = vcombine.low %v136_v17, %v144_v18 }
  0x8c   :  { %975 = vmatprep.subr.bf16.mxu0 %v9590_v24  ;;  %1016 = vmatprep.subr.bf16.mxu1 %v9592_v36  ;;  %v9638_v48 = vcombine.high %v213_v41, %v221_v42  ;;  %v229_v49 = vld [vmem:[#allocation5 + $0x380] sm:$0xff]  ;;  %v9637_v53 = vcombine.low %v213_v41, %v221_v42  ;;  %v9640_v60 = vcombine.high %v214_v54, %v222_v55  ;;  %v230_v63 = vld [vmem:[#allocation5 + $0x388] sm:$0xff]  ;;  %v152_v25 = vld [vmem:[#allocation5 + $0x118] sm:$0xff] }
  0x8d   :  { %v237_v50 = vld [vmem:[#allocation5 + $0x3c0] sm:$0xff]  ;;  %v238_v1 = vld [vmem:[#allocation5 + $0x3c8] sm:$0xff]  ;;  %v9639_v3 = vcombine.low %v214_v54, %v222_v55  ;;  %v9577_v24 = vcombine.low %v151_v13, %v159_v14  ;;  %v160_v26 = vld [vmem:[#allocation5 + $0x158] sm:$0xff]  ;;  %v9594_v27 = vcombine.high %v167_v21, %v175_v22 }
  0x8e   :  { %v9654_v56 = vcombine.high %v229_v49, %v237_v50  ;;  %v9653_v61 = vcombine.low %v229_v49, %v237_v50  ;;  %v9656_v7 = vcombine.high %v230_v63, %v238_v1  ;;  %v9655_v12 = vcombine.low %v230_v63, %v238_v1  ;;  %v191_v30 = vld [vmem:[#allocation5 + $0x250] sm:$0xff]  ;;  %v168_v33 = vld [vmem:[#allocation5 + $0x198] sm:$0xff]  ;;  %v129_v62 = vld [vmem:[#allocation5 + $0x60] sm:$0xff] }
  0x8f   :  { %976 = vmatpush1.bf16.msra.mxu0 %v9589_v29  ;;  %1017 = vmatpush1.bf16.msra.mxu1 %v9591_v43  ;;  %v183_v29 = vld [vmem:[#allocation5 + $0x210] sm:$0xff]  ;;  %v9580_v31 = vcombine.high %v152_v25, %v160_v26  ;;  %v176_v34 = vld [vmem:[#allocation5 + $0x1d8] sm:$0xff]  ;;  %v9579_v36 = vcombine.low %v152_v25, %v160_v26  ;;  %v137_v5 = vld [vmem:[#allocation5 + $0xa0] sm:$0xff] }
  0x90   :  { %977 = vmatprep.subr.bf16.mxu0 %v9606_v32  ;;  %1018 = vmatprep.subr.bf16.mxu1 %v9608_v44  ;;  %v9593_v32 = vcombine.low %v167_v21, %v175_v22  ;;  %v9610_v35 = vcombine.high %v183_v29, %v191_v30  ;;  %v207_v38 = vld [vmem:[#allocation5 + $0x2d0] sm:$0xff]  ;;  %v9596_v39 = vcombine.high %v168_v33, %v176_v34  ;;  %v184_v41 = vld [vmem:[#allocation5 + $0x218] sm:$0xff]  ;;  %v130_v9 = vld [vmem:[#allocation5 + $0x68] sm:$0xff] }
  0x91   :  { %v192_v42 = vld [vmem:[#allocation5 + $0x258] sm:$0xff]  ;;  %v9595_v44 = vcombine.low %v168_v33, %v176_v34  ;;  %v223_v46 = vld [vmem:[#allocation5 + $0x350] sm:$0xff]  ;;  %v145_v10 = vld [vmem:[#allocation5 + $0xe0] sm:$0xff] }
  0x92   :  { %v9612_v47 = vcombine.high %v184_v41, %v192_v42  ;;  %v200_v49 = vld [vmem:[#allocation5 + $0x298] sm:$0xff]  ;;  %v239_v54 = vld [vmem:[#allocation5 + $0x3d0] sm:$0xff]  ;;  %v153_v13 = vld [vmem:[#allocation5 + $0x120] sm:$0xff]  ;;  %v9566_v14 = vcombine.high %v137_v5, %v145_v10 }
  0x93   :  { %978 = vmatpush1.bf16.msra.mxu0 %v9605_v37  ;;  %1019 = vmatpush1.bf16.msra.mxu1 %v9607_v51  ;;  %v199_v37 = vld [vmem:[#allocation5 + $0x290] sm:$0xff]  ;;  %v208_v50 = vld [vmem:[#allocation5 + $0x2d8] sm:$0xff]  ;;  %v146_v17 = vld [vmem:[#allocation5 + $0xe8] sm:$0xff] }
  0x94   :  { %979 = vmatprep.subr.bf16.mxu0 %v9622_v40  ;;  %1020 = vmatprep.subr.bf16.mxu1 %v9624_v52  ;;  %v9609_v40 = vcombine.low %v183_v29, %v191_v30  ;;  %v9626_v43 = vcombine.high %v199_v37, %v207_v38  ;;  %v9611_v52 = vcombine.low %v184_v41, %v192_v42  ;;  %v224_v58 = vld [vmem:[#allocation5 + $0x358] sm:$0xff]  ;;  %v161_v18 = vld [vmem:[#allocation5 + $0x160] sm:$0xff]  ;;  %v154_v25 = vld [vmem:[#allocation5 + $0x128] sm:$0xff] }
  0x95   :  { %v9628_v55 = vcombine.high %v200_v49, %v208_v50  ;;  %v169_v21 = vld [vmem:[#allocation5 + $0x1a0] sm:$0xff]  ;;  %v162_v26 = vld [vmem:[#allocation5 + $0x168] sm:$0xff] }
  0x96   :  { %v177_v22 = vld [vmem:[#allocation5 + $0x1e0] sm:$0xff]  ;;  %v170_v33 = vld [vmem:[#allocation5 + $0x1a8] sm:$0xff] }
  0x97   :  { %980 = vmatpush1.bf16.msra.mxu0 %v9621_v45  ;;  %1021 = vmatpush1.bf16.msra.mxu1 %v9623_v57  ;;  %v215_v45 = vld [vmem:[#allocation5 + $0x310] sm:$0xff]  ;;  %v216_v57 = vld [vmem:[#allocation5 + $0x318] sm:$0xff]  ;;  %v185_v29 = vld [vmem:[#allocation5 + $0x220] sm:$0xff] }
  0x98   :  { %981 = vmatprep.subr.bf16.mxu0 %v9638_v48  ;;  %1022 = vmatprep.subr.bf16.mxu1 %v9640_v60  ;;  %v9625_v48 = vcombine.low %v199_v37, %v207_v38  ;;  %v9642_v51 = vcombine.high %v215_v45, %v223_v46  ;;  %v9627_v60 = vcombine.low %v200_v49, %v208_v50  ;;  %v193_v30 = vld [vmem:[#allocation5 + $0x260] sm:$0xff]  ;;  %v178_v34 = vld [vmem:[#allocation5 + $0x1e8] sm:$0xff] }
  0x99   :  { %v9644_v63 = vcombine.high %v216_v57, %v224_v58  ;;  %v201_v37 = vld [vmem:[#allocation5 + $0x2a0] sm:$0xff]  ;;  %v186_v41 = vld [vmem:[#allocation5 + $0x228] sm:$0xff] }
  0x9a   :  { %v209_v38 = vld [vmem:[#allocation5 + $0x2e0] sm:$0xff]  ;;  %v194_v42 = vld [vmem:[#allocation5 + $0x268] sm:$0xff] }
  0x9b   :  { %982 = vmatpush1.bf16.msra.mxu0 %v9637_v53  ;;  %1023 = vmatpush1.bf16.msra.mxu1 %v9639_v3  ;;  %v231_v53 = vld [vmem:[#allocation5 + $0x390] sm:$0xff]  ;;  %v240_v3 = vld [vmem:[#allocation5 + $0x3d8] sm:$0xff]  ;;  %v202_v49 = vld [vmem:[#allocation5 + $0x2a8] sm:$0xff] }
  0x9c   :  { %983 = vmatprep.subr.bf16.mxu0 %v9654_v56  ;;  %1024 = vmatprep.subr.bf16.mxu1 %v9656_v7  ;;  %v9641_v56 = vcombine.low %v215_v45, %v223_v46  ;;  %v9658_v59 = vcombine.high %v231_v53, %v239_v54  ;;  %v9657_v1 = vcombine.low %v231_v53, %v239_v54  ;;  %v217_v45 = vld [vmem:[#allocation5 + $0x320] sm:$0xff]  ;;  %v210_v50 = vld [vmem:[#allocation5 + $0x2e8] sm:$0xff] }
  0x9d   :  { %v9643_v7 = vcombine.low %v216_v57, %v224_v58  ;;  %v225_v46 = vld [vmem:[#allocation5 + $0x360] sm:$0xff]  ;;  %v218_v57 = vld [vmem:[#allocation5 + $0x328] sm:$0xff] }
  0x9e   :  { %v233_v53 = vld [vmem:[#allocation5 + $0x3a0] sm:$0xff]  ;;  %v226_v58 = vld [vmem:[#allocation5 + $0x368] sm:$0xff] }
  0x9f   :  { %984 = vmatpush1.bf16.msra.mxu0 %v9653_v61  ;;  %1025 = vmatpush1.bf16.msra.mxu1 %v9655_v12  ;;  %v121_v61 = vld [vmem:[#allocation5 + $0x20] sm:$0xff] }
  0xa0   :  { %1051 = vmatprep.subr.bf16.mxu0 %v9546_v2  ;;  %1092 = vmatprep.subr.bf16.mxu1 %v9548_v15  ;;  %v232_v2 = vld [vmem:[#allocation5 + $0x398] sm:$0xff]  ;;  %v9550_v4 = vcombine.high %v121_v61, %v129_v62  ;;  %v9549_v12 = vcombine.low %v121_v61, %v129_v62  ;;  %v241_v54 = vld [vmem:[#allocation5 + $0x3e0] sm:$0xff]  ;;  %v123_v61 = vld [vmem:[#allocation5 + $0x30] sm:$0xff] }
  0xa1   :  { %v9659_v15 = vcombine.low %v232_v2, %v240_v3  ;;  %v131_v62 = vld [vmem:[#allocation5 + $0x70] sm:$0xff] }
  0xa2   :  { %1002 = vmatmul.mubr.bf16.vlgmr.msra.gmra.mrb[0].mxu0 %v11375_v6  ;;  %1043 = vmatmul.mubr.bf16.vlgmr.msra.gmra.mrb[0].mxu1 %v11375_v6 }
  0xa3   :  { %1052 = vmatpush1.bf16.msra.mxu0 %v9545_v8  ;;  %1083 = vmatprep.mubr.bf16.mxu0 %v11244_v0  ;;  %v122_v8 = vld [vmem:[#allocation5 + $0x28] sm:$0xff] }
  0xa4   :  { %1053 = vmatprep.subr.bf16.mxu0 %v9562_v11  ;;  %1093 = vmatpush1.bf16.msra.mxu1 %v9547_v20  ;;  %v9660_v11 = vcombine.high %v232_v2, %v240_v3  ;;  %v9565_v20 = vcombine.low %v137_v5, %v145_v10  ;;  %v234_v2 = vld [vmem:[#allocation5 + $0x3a8] sm:$0xff]  ;;  %v9661_v5 = vcombine.low %v233_v53, %v241_v54 }
  0xa5   :  { %1124 = vmatprep.mubr.bf16.mxu1 %v11244_v0  ;;  %1094 = vmatprep.subr.bf16.mxu1 %v9564_v23  ;;  %v9582_v23 = vcombine.high %v153_v13, %v161_v18  ;;  %v242_v3 = vld [vmem:[#allocation5 + $0x3e8] sm:$0xff]  ;;  %v9647_v10 = vcombine.low %v218_v57, %v226_v58 }
  0xa7   :  { %1054 = vmatpush1.bf16.msra.mxu0 %v9561_v16  ;;  %v138_v16 = vld [vmem:[#allocation5 + $0xa8] sm:$0xff] }
  0xa8   :  { %1055 = vmatprep.subr.bf16.mxu0 %v9578_v19  ;;  %1095 = vmatpush1.bf16.msra.mxu1 %v9563_v28  ;;  %v9552_v19 = vcombine.high %v122_v8, %v130_v9  ;;  %v9581_v28 = vcombine.low %v153_v13, %v161_v18  ;;  %v9664_v13 = vcombine.high %v234_v2, %v242_v3 }
  0xa9   :  { %1096 = vmatprep.subr.bf16.mxu1 %v9580_v31  ;;  %v9598_v31 = vcombine.high %v169_v21, %v177_v22  ;;  %v9663_v18 = vcombine.low %v234_v2, %v242_v3  ;;  %v1333_v2 = vld [vmem:[#allocation8 + $0x20] sm:$0xff] }
  0xab   :  { %1056 = vmatpush1.bf16.msra.mxu0 %v9577_v24  ;;  %v9551_v24 = vcombine.low %v122_v8, %v130_v9  ;;  %v147_v8 = vld [vmem:[#allocation5 + $0xf0] sm:$0xff]  ;;  %v9554_v9 = vcombine.high %v123_v61, %v131_v62 }
  0xac   :  { %1057 = vmatprep.subr.bf16.mxu0 %v9594_v27  ;;  %1097 = vmatpush1.bf16.msra.mxu1 %v9579_v36  ;;  %v9568_v27 = vcombine.high %v138_v16, %v146_v17  ;;  %v9597_v36 = vcombine.low %v169_v21, %v177_v22 }
  0xad   :  { %1098 = vmatprep.subr.bf16.mxu1 %v9596_v39  ;;  %v9614_v39 = vcombine.high %v185_v29, %v193_v30 }
  0xaf   :  { %1058 = vmatpush1.bf16.msra.mxu0 %v9593_v32  ;;  %v9567_v32 = vcombine.low %v138_v16, %v146_v17  ;;  %v163_v16 = vld [vmem:[#allocation5 + $0x170] sm:$0xff] }
  0xb0   :  { %1059 = vmatprep.subr.bf16.mxu0 %v9610_v35  ;;  %1099 = vmatpush1.bf16.msra.mxu1 %v9595_v44  ;;  %v9584_v35 = vcombine.high %v154_v25, %v162_v26  ;;  %v9613_v44 = vcombine.low %v185_v29, %v193_v30 }
  0xb1   :  { %1100 = vmatprep.subr.bf16.mxu1 %v9612_v47  ;;  %v9630_v47 = vcombine.high %v201_v37, %v209_v38 }
  0xb3   :  { %1060 = vmatpush1.bf16.msra.mxu0 %v9609_v40  ;;  %v9583_v40 = vcombine.low %v154_v25, %v162_v26 }
  0xb4   :  { %1061 = vmatprep.subr.bf16.mxu0 %v9626_v43  ;;  %1101 = vmatpush1.bf16.msra.mxu1 %v9611_v52  ;;  %v9600_v43 = vcombine.high %v170_v33, %v178_v34  ;;  %v9629_v52 = vcombine.low %v201_v37, %v209_v38  ;;  %v172_v37 = vld [vmem:[#allocation5 + $0x1b8] sm:$0xff] }
  0xb5   :  { %1102 = vmatprep.subr.bf16.mxu1 %v9628_v55  ;;  %v9646_v55 = vcombine.high %v217_v45, %v225_v46  ;;  %v180_v38 = vld [vmem:[#allocation5 + $0x1f8] sm:$0xff] }
  0xb7   :  { %1062 = vmatpush1.bf16.msra.mxu0 %v9625_v48  ;;  %v9599_v48 = vcombine.low %v170_v33, %v178_v34  ;;  %v187_v33 = vld [vmem:[#allocation5 + $0x230] sm:$0xff] }
  0xb8   :  { %1063 = vmatprep.subr.bf16.mxu0 %v9642_v51  ;;  %1103 = vmatpush1.bf16.msra.mxu1 %v9627_v60  ;;  %v9616_v51 = vcombine.high %v186_v41, %v194_v42  ;;  %v9645_v60 = vcombine.low %v217_v45, %v225_v46  ;;  %v195_v34 = vld [vmem:[#allocation5 + $0x270] sm:$0xff]  ;;  %v188_v45 = vld [vmem:[#allocation5 + $0x238] sm:$0xff] }
  0xb9   :  { %1104 = vmatprep.subr.bf16.mxu1 %v9644_v63  ;;  %v9662_v63 = vcombine.high %v233_v53, %v241_v54  ;;  %v196_v46 = vld [vmem:[#allocation5 + $0x278] sm:$0xff] }
  0xba   :  { %v212_v53 = vld [vmem:[#allocation5 + $0x2f8] sm:$0xff] }
  0xbb   :  { %1064 = vmatpush1.bf16.msra.mxu0 %v9641_v56  ;;  %v9615_v56 = vcombine.low %v186_v41, %v194_v42  ;;  %v203_v41 = vld [vmem:[#allocation5 + $0x2b0] sm:$0xff] }
  0xbc   :  { %1065 = vmatprep.subr.bf16.mxu0 %v9658_v59  ;;  %1105 = vmatpush1.bf16.msra.mxu1 %v9643_v7  ;;  %v9632_v59 = vcombine.high %v202_v49, %v210_v50  ;;  %v139_v7 = vld [vmem:[#allocation5 + $0xb0] sm:$0xff] }
  0xbd   :  { %1106 = vmatprep.subr.bf16.mxu1 %v9660_v11  ;;  %v124_v11 = vld [vmem:[#allocation5 + $0x38] sm:$0xff]  ;;  %v9570_v17 = vcombine.high %v139_v7, %v147_v8  ;;  %v9569_v22 = vcombine.low %v139_v7, %v147_v8  ;;  %v211_v42 = vld [vmem:[#allocation5 + $0x2f0] sm:$0xff] }
  0xbe   :  { %v244_v7 = vld [vmem:[#allocation5 + $0x3f8] sm:$0xff] }
  0xbf   :  { %1066 = vmatpush1.bf16.msra.mxu0 %v9657_v1  ;;  %v9631_v1 = vcombine.low %v202_v49, %v210_v50  ;;  %v227_v49 = vld [vmem:[#allocation5 + $0x370] sm:$0xff]  ;;  %v9620_v50 = vcombine.high %v188_v45, %v196_v46 }
  0xc0   :  { %1133 = vmatprep.subr.bf16.mxu0 %v9550_v4  ;;  %1107 = vmatpush1.bf16.msra.mxu1 %v9659_v15  ;;  %v9648_v4 = vcombine.high %v218_v57, %v226_v58  ;;  %v155_v15 = vld [vmem:[#allocation5 + $0x130] sm:$0xff] }
  0xc1   :  { %1174 = vmatprep.subr.bf16.mxu1 %v9552_v19  ;;  %v140_v19 = vld [vmem:[#allocation5 + $0xb8] sm:$0xff]  ;;  %v9586_v25 = vcombine.high %v155_v15, %v163_v16  ;;  %v9585_v30 = vcombine.low %v155_v15, %v163_v16  ;;  %v243_v57 = vld [vmem:[#allocation5 + $0x3f0] sm:$0xff] }
  0xc2   :  { %1084 = vmatmul.mubr.bf16.vlgmr.msra.gmra.mrb[4].mxu0 %v11375_v6  ;;  %v1334_v15 = vld [vmem:[#allocation8 + $0x28] sm:$0xff] }
  0xc3   :  { %1134 = vmatpush1.bf16.msra.mxu0 %v9549_v12  ;;  %1165 = vmatprep.mubr.bf16.mxu0 %v11244_v0  ;;  %v132_v12 = vld [vmem:[#allocation5 + $0x78] sm:$0xff] }
  0xc4   :  { %1135 = vmatprep.subr.bf16.mxu0 %v9566_v14  ;;  %1125 = vmatmul.mubr.bf16.vlgmr.msra.gmra.mrb[4].mxu1 %v11375_v6  ;;  %v9553_v14 = vcombine.low %v123_v61, %v131_v62  ;;  %v9556_v21 = vcombine.high %v124_v11, %v132_v12  ;;  %v9555_v26 = vcombine.low %v124_v11, %v132_v12  ;;  %v228_v61 = vld [vmem:[#allocation5 + $0x378] sm:$0xff]  ;;  %v1341_v11 = vld [vmem:[#allocation8 + $0x60] sm:$0xff] }
  0xc5   :  { %1175 = vmatpush1.bf16.msra.mxu1 %v9551_v24  ;;  %1206 = vmatprep.mubr.bf16.mxu1 %v11244_v0  ;;  %v179_v24 = vld [vmem:[#allocation5 + $0x1f0] sm:$0xff] }
  0xc6   :  { %1176 = vmatprep.subr.bf16.mxu1 %v9568_v27  ;;  %v156_v27 = vld [vmem:[#allocation5 + $0x138] sm:$0xff] }
  0xc7   :  { %1136 = vmatpush1.bf16.msra.mxu0 %v9565_v20  ;;  %v148_v20 = vld [vmem:[#allocation5 + $0xf8] sm:$0xff] }
  0xc8   :  { %1137 = vmatprep.subr.bf16.mxu0 %v9582_v23  ;;  %v171_v23 = vld [vmem:[#allocation5 + $0x1b0] sm:$0xff]  ;;  %v9572_v29 = vcombine.high %v140_v19, %v148_v20 }
  0xc9   :  { %1177 = vmatpush1.bf16.msra.mxu1 %v9567_v32  ;;  %v9571_v32 = vcombine.low %v140_v19, %v148_v20  ;;  %v1349_v19 = vld [vmem:[#allocation8 + $0xa0] sm:$0xff] }
  0xca   :  { %1178 = vmatprep.subr.bf16.mxu1 %v9584_v35 }
  0xcb   :  { %1138 = vmatpush1.bf16.msra.mxu0 %v9581_v28  ;;  %v164_v28 = vld [vmem:[#allocation5 + $0x178] sm:$0xff] }
  0xcc   :  { %1139 = vmatprep.subr.bf16.mxu0 %v9598_v31  ;;  %v9602_v31 = vcombine.high %v171_v23, %v179_v24  ;;  %v9588_v35 = vcombine.high %v156_v27, %v164_v28 }
  0xcd   :  { %1179 = vmatpush1.bf16.msra.mxu1 %v9583_v40  ;;  %v9587_v40 = vcombine.low %v156_v27, %v164_v28  ;;  %v1357_v27 = vld [vmem:[#allocation8 + $0xe0] sm:$0xff] }
  0xce   :  { %1180 = vmatprep.subr.bf16.mxu1 %v9600_v43  ;;  %v9604_v43 = vcombine.high %v172_v37, %v180_v38 }
  0xcf   :  { %1140 = vmatpush1.bf16.msra.mxu0 %v9597_v36  ;;  %v9601_v36 = vcombine.low %v171_v23, %v179_v24  ;;  %v1342_v23 = vld [vmem:[#allocation8 + $0x68] sm:$0xff] }
  0xd0   :  { %1141 = vmatprep.subr.bf16.mxu0 %v9614_v39  ;;  %v9618_v39 = vcombine.high %v187_v33, %v195_v34 }
  0xd1   :  { %1181 = vmatpush1.bf16.msra.mxu1 %v9599_v48  ;;  %v219_v48 = vld [vmem:[#allocation5 + $0x330] sm:$0xff] }
  0xd2   :  { %1182 = vmatprep.subr.bf16.mxu1 %v9616_v51  ;;  %v9633_v51 = vcombine.low %v203_v41, %v211_v42  ;;  %v9650_v54 = vcombine.high %v219_v48, %v227_v49 }
  0xd3   :  { %1142 = vmatpush1.bf16.msra.mxu0 %v9613_v44  ;;  %v9617_v44 = vcombine.low %v187_v33, %v195_v34  ;;  %v1361_v34 = vld [vmem:[#allocation8 + $0x100] sm:$0xff] }
  0xd4   :  { %1143 = vmatprep.subr.bf16.mxu0 %v9630_v47  ;;  %v9603_v47 = vcombine.low %v172_v37, %v180_v38  ;;  %v1354_v38 = vld [vmem:[#allocation8 + $0xc8] sm:$0xff] }
  0xd5   :  { %1183 = vmatpush1.bf16.msra.mxu1 %v9615_v56  ;;  %v235_v56 = vld [vmem:[#allocation5 + $0x3b0] sm:$0xff] }
  0xd6   :  { %1184 = vmatprep.subr.bf16.mxu1 %v9632_v59  ;;  %v9649_v59 = vcombine.low %v219_v48, %v227_v49  ;;  %v9666_v62 = vcombine.high %v235_v56, %v243_v57  ;;  %v1377_v48 = vld [vmem:[#allocation8 + $0x180] sm:$0xff] }
  0xd7   :  { %1144 = vmatpush1.bf16.msra.mxu0 %v9629_v52  ;;  %v204_v52 = vld [vmem:[#allocation5 + $0x2b8] sm:$0xff]  ;;  %v1381_v49 = vld [vmem:[#allocation8 + $0x1a0] sm:$0xff] }
  0xd8   :  { %1145 = vmatprep.subr.bf16.mxu0 %v9646_v55  ;;  %v9619_v55 = vcombine.low %v188_v45, %v196_v46  ;;  %v9636_v58 = vcombine.high %v204_v52, %v212_v53  ;;  %v1362_v45 = vld [vmem:[#allocation8 + $0x108] sm:$0xff] }
  0xd9   :  { %1185 = vmatpush1.bf16.msra.mxu1 %v9631_v1  ;;  %v1329_v1 = vld [vmem:[#allocation8] sm:$0xff]  ;;  %v1366_v46 = vld [vmem:[#allocation8 + $0x128] sm:$0xff] }
  0xda   :  { %1186 = vmatprep.subr.bf16.mxu1 %v9648_v4  ;;  %v9665_v4 = vcombine.low %v235_v56, %v243_v57  ;;  %v9670_v8 = vcombine.high %v1329_v1, %v1333_v2  ;;  %v1385_v56 = vld [vmem:[#allocation8 + $0x1c0] sm:$0xff] }
  0xdb   :  { %1146 = vmatpush1.bf16.msra.mxu0 %v9645_v60  ;;  %v220_v60 = vld [vmem:[#allocation5 + $0x338] sm:$0xff]  ;;  %v1389_v57 = vld [vmem:[#allocation8 + $0x1e0] sm:$0xff] }
  0xdc   :  { %1147 = vmatprep.subr.bf16.mxu0 %v9662_v63  ;;  %v9635_v63 = vcombine.low %v204_v52, %v212_v53  ;;  %v9652_v3 = vcombine.high %v220_v60, %v228_v61  ;;  %v1370_v52 = vld [vmem:[#allocation8 + $0x148] sm:$0xff] }
  0xdd   :  { %1187 = vmatpush1.bf16.msra.mxu1 %v9647_v10  ;;  %v1337_v10 = vld [vmem:[#allocation8 + $0x40] sm:$0xff]  ;;  %v1374_v53 = vld [vmem:[#allocation8 + $0x168] sm:$0xff] }
  0xde   :  { %1188 = vmatprep.subr.bf16.mxu1 %v9664_v13  ;;  %v9669_v13 = vcombine.low %v1329_v1, %v1333_v2  ;;  %v9678_v16 = vcombine.high %v1337_v10, %v1341_v11  ;;  %v1393_v1 = vld [vmem:[#allocation8 + $0x200] sm:$0xff] }
  0xdf   :  { %1148 = vmatpush1.bf16.msra.mxu0 %v9661_v5  ;;  %v236_v5 = vld [vmem:[#allocation5 + $0x3b8] sm:$0xff]  ;;  %v1397_v2 = vld [vmem:[#allocation8 + $0x220] sm:$0xff] }
  0xe0   :  { %1215 = vmatprep.subr.bf16.mxu0 %v9554_v9  ;;  %v9651_v9 = vcombine.low %v220_v60, %v228_v61  ;;  %v9668_v12 = vcombine.high %v236_v5, %v244_v7  ;;  %v1378_v60 = vld [vmem:[#allocation8 + $0x188] sm:$0xff] }
  0xe1   :  { %1189 = vmatpush1.bf16.msra.mxu1 %v9663_v18  ;;  %v1345_v18 = vld [vmem:[#allocation8 + $0x80] sm:$0xff]  ;;  %v1382_v61 = vld [vmem:[#allocation8 + $0x1a8] sm:$0xff] }
  0xe2   :  { %1166 = vmatmul.mubr.bf16.vlgmr.msra.gmra.mrb[8].mxu0 %v11375_v6  ;;  %1256 = vmatprep.subr.bf16.mxu1 %v9556_v21  ;;  %v9677_v21 = vcombine.low %v1337_v10, %v1341_v11  ;;  %v9686_v24 = vcombine.high %v1345_v18, %v1349_v19  ;;  %v1401_v10 = vld [vmem:[#allocation8 + $0x240] sm:$0xff] }
  0xe3   :  { %1216 = vmatpush1.bf16.msra.mxu0 %v9553_v14  ;;  %1247 = vmatprep.mubr.bf16.mxu0 %v11244_v0  ;;  %v1330_v14 = vld [vmem:[#allocation8 + $0x8] sm:$0xff]  ;;  %v1405_v11 = vld [vmem:[#allocation8 + $0x260] sm:$0xff] }
  0xe4   :  { %1217 = vmatprep.subr.bf16.mxu0 %v9570_v17  ;;  %1207 = vmatmul.mubr.bf16.vlgmr.msra.gmra.mrb[8].mxu1 %v11375_v6  ;;  %v9667_v17 = vcombine.low %v236_v5, %v244_v7  ;;  %v9672_v20 = vcombine.high %v1330_v14, %v1334_v15  ;;  %v1386_v5 = vld [vmem:[#allocation8 + $0x1c8] sm:$0xff] }
  0xe5   :  { %1257 = vmatpush1.bf16.msra.mxu1 %v9555_v26  ;;  %1288 = vmatprep.mubr.bf16.mxu1 %v11244_v0  ;;  %v9634_v0 = vcombine.high %v203_v41, %v211_v42  ;;  %v1353_v26 = vld [vmem:[#allocation8 + $0xc0] sm:$0xff]  ;;  %v1390_v7 = vld [vmem:[#allocation8 + $0x1e8] sm:$0xff] }
  0xe6   :  { %1258 = vmatprep.subr.bf16.mxu1 %v9572_v29  ;;  %v9685_v29 = vcombine.low %v1345_v18, %v1349_v19  ;;  %v9693_v37 = vcombine.low %v1353_v26, %v1357_v27  ;;  %v1369_v42 = vld [vmem:[#allocation8 + $0x140] sm:$0xff] }
  0xe7   :  { %1218 = vmatpush1.bf16.msra.mxu0 %v9569_v22  ;;  %v1338_v22 = vld [vmem:[#allocation8 + $0x48] sm:$0xff]  ;;  %v1409_v18 = vld [vmem:[#allocation8 + $0x280] sm:$0xff] }
  0xe8   :  { %1219 = vmatprep.subr.bf16.mxu0 %v9586_v25  ;;  %v9671_v25 = vcombine.low %v1330_v14, %v1334_v15  ;;  %v9680_v28 = vcombine.high %v1338_v22, %v1342_v23  ;;  %v9679_v33 = vcombine.low %v1338_v22, %v1342_v23  ;;  %v1394_v14 = vld [vmem:[#allocation8 + $0x208] sm:$0xff]  ;;  %v1413_v19 = vld [vmem:[#allocation8 + $0x2a0] sm:$0xff] }
  0xe9   :  { %1259 = vmatpush1.bf16.msra.mxu1 %v9571_v32  ;;  %v9694_v32 = vcombine.high %v1353_v26, %v1357_v27  ;;  %v1398_v15 = vld [vmem:[#allocation8 + $0x228] sm:$0xff]  ;;  %v1417_v26 = vld [vmem:[#allocation8 + $0x2c0] sm:$0xff] }
  0xea   :  { %1260 = vmatprep.subr.bf16.mxu1 %v9588_v35  ;;  %v1365_v35 = vld [vmem:[#allocation8 + $0x120] sm:$0xff]  ;;  %v1402_v22 = vld [vmem:[#allocation8 + $0x248] sm:$0xff] }
  0xeb   :  { %1220 = vmatpush1.bf16.msra.mxu0 %v9585_v30  ;;  %v1346_v30 = vld [vmem:[#allocation8 + $0x88] sm:$0xff]  ;;  %v1421_v27 = vld [vmem:[#allocation8 + $0x2e0] sm:$0xff] }
  0xec   :  { %1221 = vmatprep.subr.bf16.mxu0 %v9602_v31  ;;  %v1350_v31 = vld [vmem:[#allocation8 + $0xa8] sm:$0xff] }
  0xed   :  { %1261 = vmatpush1.bf16.msra.mxu1 %v9587_v40  ;;  %v9702_v40 = vcombine.high %v1361_v34, %v1365_v35  ;;  %v9687_v41 = vcombine.low %v1346_v30, %v1350_v31  ;;  %v1406_v23 = vld [vmem:[#allocation8 + $0x268] sm:$0xff] }
  0xee   :  { %1262 = vmatprep.subr.bf16.mxu1 %v9604_v43  ;;  %v1373_v43 = vld [vmem:[#allocation8 + $0x160] sm:$0xff] }
  0xef   :  { %1222 = vmatpush1.bf16.msra.mxu0 %v9601_v36  ;;  %v9688_v36 = vcombine.high %v1346_v30, %v1350_v31  ;;  %v1410_v30 = vld [vmem:[#allocation8 + $0x288] sm:$0xff] }
  0xf0   :  { %1223 = vmatprep.subr.bf16.mxu0 %v9618_v39  ;;  %v1358_v39 = vld [vmem:[#allocation8 + $0xe8] sm:$0xff] }
  0xf1   :  { %1263 = vmatpush1.bf16.msra.mxu1 %v9603_v47  ;;  %v9695_v47 = vcombine.low %v1354_v38, %v1358_v39  ;;  %v1414_v31 = vld [vmem:[#allocation8 + $0x2a8] sm:$0xff] }
  0xf2   :  { %1264 = vmatprep.subr.bf16.mxu1 %v9620_v50  ;;  %v9704_v50 = vcombine.high %v1362_v45, %v1366_v46 }
  0xf3   :  { %1224 = vmatpush1.bf16.msra.mxu0 %v9617_v44  ;;  %v9701_v44 = vcombine.low %v1361_v34, %v1365_v35  ;;  %v1425_v34 = vld [vmem:[#allocation8 + $0x300] sm:$0xff] }
  0xf4   :  { %1225 = vmatprep.subr.bf16.mxu0 %v9634_v0  ;;  %v9710_v0 = vcombine.high %v1369_v42, %v1373_v43  ;;  %v1429_v35 = vld [vmem:[#allocation8 + $0x320] sm:$0xff] }
  0xf5   :  { %1265 = vmatpush1.bf16.msra.mxu1 %v9619_v55  ;;  %v9703_v55 = vcombine.low %v1362_v45, %v1366_v46  ;;  %v1426_v45 = vld [vmem:[#allocation8 + $0x308] sm:$0xff] }
  0xf6   :  { %1266 = vmatprep.subr.bf16.mxu1 %v9636_v58  ;;  %v9712_v58 = vcombine.high %v1370_v52, %v1374_v53  ;;  %v1430_v46 = vld [vmem:[#allocation8 + $0x328] sm:$0xff] }
  0xf7   :  { %1226 = vmatpush1.bf16.msra.mxu0 %v9633_v51  ;;  %v9709_v51 = vcombine.low %v1369_v42, %v1373_v43  ;;  %v1433_v42 = vld [vmem:[#allocation8 + $0x340] sm:$0xff] }
  0xf8   :  { %1227 = vmatprep.subr.bf16.mxu0 %v9650_v54  ;;  %v9718_v54 = vcombine.high %v1377_v48, %v1381_v49  ;;  %v1437_v43 = vld [vmem:[#allocation8 + $0x360] sm:$0xff] }
  0xf9   :  { %1267 = vmatpush1.bf16.msra.mxu1 %v9635_v63  ;;  %v9711_v63 = vcombine.low %v1370_v52, %v1374_v53  ;;  %v1434_v52 = vld [vmem:[#allocation8 + $0x348] sm:$0xff] }
  0xfa   :  { %1268 = vmatprep.subr.bf16.mxu1 %v9652_v3  ;;  %v9720_v3 = vcombine.high %v1378_v60, %v1382_v61  ;;  %v1438_v53 = vld [vmem:[#allocation8 + $0x368] sm:$0xff] }
  0xfb   :  { %1228 = vmatpush1.bf16.msra.mxu0 %v9649_v59  ;;  %v9717_v59 = vcombine.low %v1377_v48, %v1381_v49  ;;  %v1441_v48 = vld [vmem:[#allocation8 + $0x380] sm:$0xff] }
  0xfc   :  { %1229 = vmatprep.subr.bf16.mxu0 %v9666_v62  ;;  %v9726_v62 = vcombine.high %v1385_v56, %v1389_v57  ;;  %v1445_v49 = vld [vmem:[#allocation8 + $0x3a0] sm:$0xff] }
  0xfd   :  { %1269 = vmatpush1.bf16.msra.mxu1 %v9651_v9  ;;  %v9719_v9 = vcombine.low %v1378_v60, %v1382_v61  ;;  %v1442_v60 = vld [vmem:[#allocation8 + $0x388] sm:$0xff] }
  0xfe   :  { %1270 = vmatprep.subr.bf16.mxu1 %v9668_v12  ;;  %v9728_v12 = vcombine.high %v1386_v5, %v1390_v7  ;;  %v1446_v61 = vld [vmem:[#allocation8 + $0x3a8] sm:$0xff] }
  0xff   :  { %1230 = vmatpush1.bf16.msra.mxu0 %v9665_v4  ;;  %v9725_v4 = vcombine.low %v1385_v56, %v1389_v57  ;;  %v1449_v56 = vld [vmem:[#allocation8 + $0x3c0] sm:$0xff] }
 0x100   :  { %7515 = vmatprep.subr.bf16.mxu0 %v9670_v8  ;;  %v9734_v8 = vcombine.high %v1393_v1, %v1397_v2  ;;  %v1453_v57 = vld [vmem:[#allocation8 + $0x3e0] sm:$0xff] }
 0x101   :  { %1271 = vmatpush1.bf16.msra.mxu1 %v9667_v17  ;;  %v9727_v17 = vcombine.low %v1386_v5, %v1390_v7  ;;  %v1450_v5 = vld [vmem:[#allocation8 + $0x3c8] sm:$0xff] }
 0x102   :  { %1248 = vmatmul.mubr.bf16.vlgmr.msra.gmra.mrb[12].mxu0 %v11375_v6  ;;  %7843 = vmatprep.subr.bf16.mxu1 %v9672_v20  ;;  %v9736_v20 = vcombine.high %v1394_v14, %v1398_v15  ;;  %v1454_v7 = vld [vmem:[#allocation8 + $0x3e8] sm:$0xff] }
 0x103   :  { %7516 = vmatpush1.bf16.msra.mxu0 %v9669_v13  ;;  %v9733_v13 = vcombine.low %v1393_v1, %v1397_v2  ;;  %v11391_v1 = vld [vmem:[#allocation8 + $0x400] sm:$0xff] }
 0x104   :  { %7517 = vmatprep.subr.bf16.mxu0 %v9678_v16  ;;  %1289 = vmatmul.mubr.bf16.vlgmr.msra.gmra.mrb[12].mxu1 %v11375_v6  ;;  %v9696_v6 = vcombine.high %v1354_v38, %v1358_v39  ;;  %v9742_v16 = vcombine.high %v1401_v10, %v1405_v11  ;;  %v1418_v38 = vld [vmem:[#allocation8 + $0x2c8] sm:$0xff]  ;;  %v11393_v2 = vld [vmem:[#allocation8 + $0x420] sm:$0xff] }
 0x105   :  { %7844 = vmatpush1.bf16.msra.mxu1 %v9671_v25  ;;  %v9735_v25 = vcombine.low %v1394_v14, %v1398_v15  ;;  %v1422_v39 = vld [vmem:[#allocation8 + $0x2e8] sm:$0xff]  ;;  %v249_v15 = vlaneseq }
 0x106   :  { %7845 = vmatprep.subr.bf16.mxu1 %v9680_v28  ;;  %v9744_v28 = vcombine.high %v1402_v22, %v1406_v23 }
 0x107   :  { %7518 = vmatpush1.bf16.msra.mxu0 %v9677_v21  ;;  %v9741_v21 = vcombine.low %v1401_v10, %v1405_v11  ;;  %v9792_v10 = vcombine.high %v1450_v5, %v1454_v7  ;;  %v1458_v11 = vld [vmem:[#allocation8 + $0x408] sm:$0xff] }
 0x108   :  { %7519 = vmatprep.subr.bf16.mxu0 %v9686_v24  ;;  %v9750_v24 = vcombine.high %v1409_v18, %v1413_v19 }
 0x109   :  { %7846 = vmatpush1.bf16.msra.mxu1 %v9679_v33  ;;  %v9743_v33 = vcombine.low %v1402_v22, %v1406_v23 }
 0x10a   :  { %7847 = vmatprep.subr.bf16.mxu1 %v9688_v36  ;;  %v9752_v36 = vcombine.high %v1410_v30, %v1414_v31 }
 0x10b   :  { %7520 = vmatpush1.bf16.msra.mxu0 %v9685_v29  ;;  %v9749_v29 = vcombine.low %v1409_v18, %v1413_v19  ;;  %v11402_v18 = vld [vmem:[#allocation7] sm:$0xff] }
 0x10c   :  { %7521 = vmatprep.subr.bf16.mxu0 %v9694_v32  ;;  %v9758_v32 = vcombine.high %v1417_v26, %v1421_v27 }
 0x10d   :  { %7848 = vmatpush1.bf16.msra.mxu1 %v9687_v41  ;;  %v9751_v41 = vcombine.low %v1410_v30, %v1414_v31  ;;  %v1465_v30 = vld [vmem:[#allocation8 + $0x440] sm:$0xff] }
 0x10e   :  { %7849 = vmatprep.subr.bf16.mxu1 %v9696_v6  ;;  %v9760_v6 = vcombine.high %v1418_v38, %v1422_v39 }
 0x10f   :  { %7522 = vmatpush1.bf16.msra.mxu0 %v9693_v37  ;;  %v9757_v37 = vcombine.low %v1417_v26, %v1421_v27 }
 0x110   :  { %7523 = vmatprep.subr.bf16.mxu0 %v9702_v40  ;;  %v9766_v40 = vcombine.high %v1425_v34, %v1429_v35 }
 0x111   :  { %7850 = vmatpush1.bf16.msra.mxu1 %v9695_v47  ;;  %v9759_v47 = vcombine.low %v1418_v38, %v1422_v39 }
 0x112   :  { %7851 = vmatprep.subr.bf16.mxu1 %v9704_v50  ;;  %v9768_v50 = vcombine.high %v1426_v45, %v1430_v46 }
 0x113   :  { %7524 = vmatpush1.bf16.msra.mxu0 %v9701_v44  ;;  %v9765_v44 = vcombine.low %v1425_v34, %v1429_v35  ;;  %v1470_v34 = vld [vmem:[#allocation8 + $0x468] sm:$0xff] }
 0x114   :  { %7525 = vmatprep.subr.bf16.mxu0 %v9710_v0  ;;  %v9774_v0 = vcombine.high %v1433_v42, %v1437_v43 }
 0x115   :  { %7852 = vmatpush1.bf16.msra.mxu1 %v9703_v55  ;;  %v9767_v55 = vcombine.low %v1426_v45, %v1430_v46  ;;  %v1474_v45 = vld [vmem:[#allocation8 + $0x488] sm:$0xff] }
 0x116   :  { %7853 = vmatprep.subr.bf16.mxu1 %v9712_v58  ;;  %v9776_v58 = vcombine.high %v1434_v52, %v1438_v53  ;;  %v1478_v46 = vld [vmem:[#allocation8 + $0x4a8] sm:$0xff] }
 0x117   :  { %7526 = vmatpush1.bf16.msra.mxu0 %v9709_v51  ;;  %v9773_v51 = vcombine.low %v1433_v42, %v1437_v43  ;;  %v1473_v43 = vld [vmem:[#allocation8 + $0x480] sm:$0xff] }
 0x118   :  { %7527 = vmatprep.subr.bf16.mxu0 %v9718_v54  ;;  %v9782_v54 = vcombine.high %v1441_v48, %v1445_v49 }
 0x119   :  { %7854 = vmatpush1.bf16.msra.mxu1 %v9711_v63  ;;  %v9775_v63 = vcombine.low %v1434_v52, %v1438_v53  ;;  %v9816_v53 = vcombine.high %v1474_v45, %v1478_v46 }
 0x11a   :  { %7855 = vmatprep.subr.bf16.mxu1 %v9720_v3  ;;  %v9784_v3 = vcombine.high %v1442_v60, %v1446_v61 }
 0x11b   :  { %7528 = vmatpush1.bf16.msra.mxu0 %v9717_v59  ;;  %v9781_v59 = vcombine.low %v1441_v48, %v1445_v49 }
 0x11c   :  { %7529 = vmatprep.subr.bf16.mxu0 %v9726_v62  ;;  %v9790_v62 = vcombine.high %v1449_v56, %v1453_v57 }
 0x11d   :  { %7856 = vmatpush1.bf16.msra.mxu1 %v9719_v9  ;;  %v9783_v9 = vcombine.low %v1442_v60, %v1446_v61  ;;  %v9815_v60 = vcombine.low %v1474_v45, %v1478_v46 }
 0x11e   :  { %7857 = vmatprep.subr.bf16.mxu1 %v9728_v12  ;;  %v1462_v12 = vld [vmem:[#allocation8 + $0x428] sm:$0xff] }
 0x11f   :  { %7530 = vmatpush1.bf16.msra.mxu0 %v9725_v4  ;;  %v9789_v4 = vcombine.low %v1449_v56, %v1453_v57  ;;  %v9800_v14 = vcombine.high %v1458_v11, %v1462_v12  ;;  %v9799_v38 = vcombine.low %v1458_v11, %v1462_v12  ;;  %v1482_v56 = vld [vmem:[#allocation8 + $0x4c8] sm:$0xff] }
 0x120   :  { %7531 = vmatprep.subr.bf16.mxu0 %v9734_v8  ;;  %v9798_v8 = vcombine.high %v11391_v1, %v11393_v2  ;;  %v1486_v57 = vld [vmem:[#allocation8 + $0x4e8] sm:$0xff] }
 0x121   :  { %7858 = vmatpush1.bf16.msra.mxu1 %v9727_v17  ;;  %v1498_v11 = vld [vmem:[#allocation8 + $0x548] sm:$0xff] }
 0x122   :  { %7859 = vmatprep.subr.bf16.mxu1 %v9736_v20  ;;  %v1502_v12 = vld [vmem:[#allocation8 + $0x568] sm:$0xff] }
 0x123   :  { %7532 = vmatpush1.bf16.msra.mxu0 %v9733_v13  ;;  %v9791_v13 = vcombine.low %v1450_v5, %v1454_v7  ;;  %v9823_v5 = vcombine.low %v1482_v56, %v1486_v57 }
 0x124   :  { %7533 = vmatprep.subr.bf16.mxu0 %v9742_v16  ;;  %v11397_v16 = vshrl.u32 %v249_v15, 7 }
 0x125   :  { %7860 = vmatpush1.bf16.msra.mxu1 %v9735_v25 }
 0x126   :  { %7861 = vmatprep.subr.bf16.mxu1 %v9744_v28  ;;  %v11400_v17 = vsub.s32 0, %v11397_v16  ;;  %v11405_v19 = vsub.s32 1, %v11397_v16  ;;  %v11412_v23 = vsub.s32 3, %v11397_v16 }
 0x127   :  { %7534 = vmatpush1.bf16.msra.mxu0 %v9741_v21 }
 0x128   :  { %7535 = vmatprep.subr.bf16.mxu0 %v9750_v24  ;;  %v252_v20 = vrot.slane %v11402_v18, %v11400_v17  ;;  %v256_v21 = vrot.slane %v11402_v18, %v11405_v19  ;;  %v264_v35 = vrot.slane %v11402_v18, %v11412_v23 }
 0x129   :  { %7862 = vmatpush1.bf16.msra.mxu1 %v9743_v33  ;;  %v1466_v33 = vld [vmem:[#allocation8 + $0x448] sm:$0xff] }
 0x12a   :  { %7863 = vmatprep.subr.bf16.mxu1 %v9752_v36  ;;  %v9808_v42 = vcombine.high %v1466_v33, %v1470_v34 }
 0x12b   :  { %7536 = vmatpush1.bf16.msra.mxu0 %v9749_v29 }
 0x12c   :  { %7537 = vmatprep.subr.bf16.mxu0 %v9758_v32  ;;  %v1469_v32 = vld [vmem:[#allocation8 + $0x460] sm:$0xff] }
 0x12d   :  { %7864 = vmatpush1.bf16.msra.mxu1 %v9751_v41  ;;  %v9806_v41 = vcombine.high %v1465_v30, %v1469_v32  ;;  %v9805_v49 = vcombine.low %v1465_v30, %v1469_v32  ;;  %v1513_v30 = vld [vmem:[#allocation8 + $0x5c0] sm:$0xff]  ;;  %v1514_v32 = vld [vmem:[#allocation8 + $0x5c8] sm:$0xff] }
 0x12e   :  { %7865 = vmatprep.subr.bf16.mxu1 %v9760_v6 }
 0x12f   :  { %7538 = vmatpush1.bf16.msra.mxu0 %v9757_v37  ;;  %v9797_v37 = vcombine.low %v11391_v1, %v11393_v2  ;;  %v1493_v1 = vld [vmem:[#allocation8 + $0x520] sm:$0xff]  ;;  %v1490_v2 = vld [vmem:[#allocation8 + $0x508] sm:$0xff] }
 0x130   :  { %7539 = vmatprep.subr.bf16.mxu0 %v9766_v40 }
 0x131   :  { %7866 = vmatpush1.bf16.msra.mxu1 %v9759_v47 }
 0x132   :  { %7867 = vmatprep.subr.bf16.mxu1 %v9768_v50  ;;  %v9807_v50 = vcombine.low %v1466_v33, %v1470_v34  ;;  %v1518_v33 = vld [vmem:[#allocation8 + $0x5e8] sm:$0xff] }
 0x133   :  { %7540 = vmatpush1.bf16.msra.mxu0 %v9765_v44  ;;  %v1477_v44 = vld [vmem:[#allocation8 + $0x4a0] sm:$0xff] }
 0x134   :  { %7541 = vmatprep.subr.bf16.mxu0 %v9774_v0  ;;  %v9814_v52 = vcombine.high %v1473_v43, %v1477_v44 }
 0x135   :  { %7868 = vmatpush1.bf16.msra.mxu1 %v9767_v55  ;;  %v1485_v55 = vld [vmem:[#allocation8 + $0x4e0] sm:$0xff] }
 0x136   :  { %7869 = vmatprep.subr.bf16.mxu1 %v9776_v58 }
 0x137   :  { %7542 = vmatpush1.bf16.msra.mxu0 %v9773_v51 }
 0x138   :  { %7543 = vmatprep.subr.bf16.mxu0 %v9782_v54  ;;  %v1481_v54 = vld [vmem:[#allocation8 + $0x4c0] sm:$0xff] }
 0x139   :  { %7870 = vmatpush1.bf16.msra.mxu1 %v9775_v63  ;;  %v9822_v61 = vcombine.high %v1481_v54, %v1485_v55  ;;  %v1489_v63 = vld [vmem:[#allocation8 + $0x500] sm:$0xff] }
 0x13a   :  { %7871 = vmatprep.subr.bf16.mxu1 %v9784_v3  ;;  %v1494_v3 = vld [vmem:[#allocation8 + $0x528] sm:$0xff]  ;;  %v9830_v7 = vcombine.high %v1489_v63, %v1493_v1 }
 0x13b   :  { %7544 = vmatpush1.bf16.msra.mxu0 %v9781_v59  ;;  %v9813_v59 = vcombine.low %v1473_v43, %v1477_v44  ;;  %v1522_v43 = vld [vmem:[#allocation8 + $0x608] sm:$0xff] }
 0x13c   :  { %7545 = vmatprep.subr.bf16.mxu0 %v9790_v62  ;;  %v9824_v62 = vcombine.high %v1482_v56, %v1486_v57 }
 0x13d   :  { %7872 = vmatpush1.bf16.msra.mxu1 %v9783_v9  ;;  %v1497_v9 = vld [vmem:[#allocation8 + $0x540] sm:$0xff] }
 0x13e   :  { %7873 = vmatprep.subr.bf16.mxu1 %v9792_v10  ;;  %v1501_v10 = vld [vmem:[#allocation8 + $0x560] sm:$0xff] }
 0x13f   :  { %7546 = vmatpush1.bf16.msra.mxu0 %v9789_v4  ;;  %v9821_v4 = vcombine.low %v1481_v54, %v1485_v55  ;;  %v9838_v15 = vcombine.high %v1497_v9, %v1501_v10  ;;  %v1534_v54 = vld [vmem:[#allocation8 + $0x668] sm:$0xff] }
 0x140   :  { %7556 = vmatprep.subr.bf16.mxu0 %v9798_v8  ;;  %v9832_v8 = vcombine.high %v1490_v2, %v1494_v3 }
 0x141   :  { %7874 = vmatpush1.bf16.msra.mxu1 %v9791_v13  ;;  %v9829_v13 = vcombine.low %v1489_v63, %v1493_v1  ;;  %v1541_v63 = vld [vmem:[#allocation8 + $0x6a0] sm:$0xff]  ;;  %v1538_v1 = vld [vmem:[#allocation8 + $0x688] sm:$0xff] }
 0x142   :  { %7884 = vmatprep.subr.bf16.mxu1 %v9800_v14  ;;  %v9831_v14 = vcombine.low %v1490_v2, %v1494_v3  ;;  %v1542_v2 = vld [vmem:[#allocation8 + $0x6a8] sm:$0xff] }
 0x175   :  { %v1003_v22 = vpop.f32.mrb[0].mxu0  ;;  %v11420_v39 = vpop.f32.mrb[0].mxu1 }
 0x176   :  { %v1004_v24 = vadd.f32 %v1003_v22, %v252_v20  ;;  %v1005_v25 = vpop.f32.mrb[1].mxu0  ;;  %v1046_v6 = vpop.f32.mrb[1].mxu1  ;;  %v9840_v20 = vcombine.high %v1498_v11, %v1502_v12  ;;  %v1509_v22 = vld [vmem:[#allocation8 + $0x5a0] sm:$0xff] }
 0x177   :  { %v1006_v26 = vadd.f32 %v1005_v25, %v256_v21  ;;  %v1007_v27 = vpop.f32.mrb[2].mxu0  ;;  %v1047_v0 = vadd.f32 %v1046_v6, %v264_v35  ;;  %v1048_v47 = vpop.f32.mrb[2].mxu1  ;;  %v1505_v21 = vld [vmem:[#allocation8 + $0x580] sm:$0xff]  ;;  %v1510_v25 = vld [vmem:[#allocation8 + $0x5a8] sm:$0xff] }
 0x178   :  { %v1297_v28 = vmax.f32 %v1004_v24, 0.0  ;;  %v1008_v29 = vpop.f32.mrb[3].mxu0  ;;  %v1049_v48 = vpop.f32.mrb[3].mxu1  ;;  %v1506_v24 = vld [vmem:[#allocation8 + $0x588] sm:$0xff]  ;;  %v9839_v27 = vcombine.low %v1498_v11, %v1502_v12  ;;  %v9845_v34 = vcombine.low %v1505_v21, %v1509_v22  ;;  %v1549_v11 = vld [vmem:[#allocation8 + $0x6e0] sm:$0xff] }
 0x179   :  { %v1298_v31 = vmax.f32 %v1006_v26, 0.0  ;;  %v1300_v51 = vmax.f32 %v1047_v0, 0.0  ;;  %v9837_v26 = vcombine.low %v1497_v9, %v1501_v10  ;;  %v9848_v29 = vcombine.high %v1506_v24, %v1510_v25  ;;  %v1526_v6 = vld [vmem:[#allocation8 + $0x628] sm:$0xff]  ;;  %v1545_v10 = vld [vmem:[#allocation8 + $0x6c0] sm:$0xff] }
 0x17a   :  { %v11422_v40 = vpack.c.bf16 %v1297_v28, %v1297_v28  ;;  %v9846_v28 = vcombine.high %v1505_v21, %v1509_v22  ;;  %v9847_v35 = vcombine.low %v1506_v24, %v1510_v25  ;;  %v9855_v0 = vcombine.low %v1514_v32, %v1518_v33  ;;  %v1546_v12 = vld [vmem:[#allocation8 + $0x6c8] sm:$0xff]  ;;  %v1553_v22 = vld [vmem:[#allocation8 + $0x700] sm:$0xff] }
 0x17b   :  { %v11416_v36 = vpack.c.bf16 %v1298_v31, %v1298_v31  ;;  %v11428_v58 = vpack.c.bf16 %v1300_v51, %v1300_v51  ;;  %v1517_v31 = vld [vmem:[#allocation8 + $0x5e0] sm:$0xff]  ;;  %v9863_v56 = vcombine.low %v1522_v43, %v1526_v6  ;;  %v9880_v9 = vcombine.high %v1538_v1, %v1542_v2  ;;  %v1554_v25 = vld [vmem:[#allocation8 + $0x708] sm:$0xff] }
 0x17c   :  { %v9853_v46 = vcombine.low %v1513_v30, %v1517_v31  ;;  %v1557_v24 = vld [vmem:[#allocation8 + $0x720] sm:$0xff] }
 0x17d   :  { %7547 = vmatprep.mubr.bf16.mxu0 %v11416_v36  ;;  %7875 = vmatprep.mubr.bf16.mxu1 %v11416_v36 }
 0x17e   :  { %7548 = vmatmul.mubr.bf16.vlgmr.msra.gmra.mrb[16].mxu0 %v11422_v40  ;;  %7876 = vmatmul.mubr.bf16.vlgmr.msra.gmra.mrb[16].mxu1 %v11422_v40 }
 0x17f   :  { %7557 = vmatpush1.bf16.msra.mxu0 %v9797_v37  ;;  %7885 = vmatpush1.bf16.msra.mxu1 %v9799_v38  ;;  %v9854_v37 = vcombine.high %v1513_v30, %v1517_v31  ;;  %v9856_v38 = vcombine.high %v1514_v32, %v1518_v33  ;;  %v1561_v31 = vld [vmem:[#allocation8 + $0x740] sm:$0xff]  ;;  %v1562_v33 = vld [vmem:[#allocation8 + $0x748] sm:$0xff] }
 0x180   :  { %7558 = vmatprep.subr.bf16.mxu0 %v9806_v41  ;;  %7886 = vmatprep.subr.bf16.mxu1 %v9808_v42  ;;  %v1521_v41 = vld [vmem:[#allocation8 + $0x600] sm:$0xff] }
 0x181   :  { %7588 = vmatprep.mubr.bf16.mxu0 %v11428_v58  ;;  %7916 = vmatprep.mubr.bf16.mxu1 %v11428_v58  ;;  %v1525_v42 = vld [vmem:[#allocation8 + $0x620] sm:$0xff] }
 0x182   :  { %v9862_v48 = vcombine.high %v1521_v41, %v1525_v42  ;;  %v9861_v55 = vcombine.low %v1521_v41, %v1525_v42  ;;  %v1565_v32 = vld [vmem:[#allocation8 + $0x760] sm:$0xff] }
 0x183   :  { %7559 = vmatpush1.bf16.msra.mxu0 %v9805_v49  ;;  %7887 = vmatpush1.bf16.msra.mxu1 %v9807_v50  ;;  %v9864_v49 = vcombine.high %v1522_v43, %v1526_v6  ;;  %v1529_v50 = vld [vmem:[#allocation8 + $0x640] sm:$0xff]  ;;  %v9902_v41 = vcombine.high %v1561_v31, %v1565_v32 }
 0x184   :  { %7560 = vmatprep.subr.bf16.mxu0 %v9814_v52  ;;  %7888 = vmatprep.subr.bf16.mxu1 %v9816_v53  ;;  %v1533_v52 = vld [vmem:[#allocation8 + $0x660] sm:$0xff]  ;;  %v1530_v53 = vld [vmem:[#allocation8 + $0x648] sm:$0xff] }
 0x185   :  { %v1569_v43 = vld [vmem:[#allocation8 + $0x780] sm:$0xff] }
 0x186   :  { %v1573_v6 = vld [vmem:[#allocation8 + $0x7a0] sm:$0xff] }
 0x187   :  { %7561 = vmatpush1.bf16.msra.mxu0 %v9813_v59  ;;  %7889 = vmatpush1.bf16.msra.mxu1 %v9815_v60  ;;  %v9870_v59 = vcombine.high %v1529_v50, %v1533_v52  ;;  %v9872_v60 = vcombine.high %v1530_v53, %v1534_v54 }
 0x188   :  { %7562 = vmatprep.subr.bf16.mxu0 %v9822_v61  ;;  %7890 = vmatprep.subr.bf16.mxu1 %v9824_v62  ;;  %v1537_v61 = vld [vmem:[#allocation8 + $0x680] sm:$0xff] }
 0x18b   :  { %7563 = vmatpush1.bf16.msra.mxu0 %v9821_v4  ;;  %7891 = vmatpush1.bf16.msra.mxu1 %v9823_v5  ;;  %v9869_v5 = vcombine.low %v1529_v50, %v1533_v52 }
 0x18c   :  { %7564 = vmatprep.subr.bf16.mxu0 %v9830_v7  ;;  %7892 = vmatprep.subr.bf16.mxu1 %v9832_v8  ;;  %v9871_v7 = vcombine.low %v1530_v53, %v1534_v54  ;;  %v9878_v8 = vcombine.high %v1537_v61, %v1541_v63  ;;  %v1577_v53 = vld [vmem:[#allocation8 + $0x7c0] sm:$0xff] }
 0x18d   :  { %v1581_v54 = vld [vmem:[#allocation8 + $0x7e0] sm:$0xff] }
 0x18f   :  { %7565 = vmatpush1.bf16.msra.mxu0 %v9829_v13  ;;  %7893 = vmatpush1.bf16.msra.mxu1 %v9831_v14  ;;  %v1550_v13 = vld [vmem:[#allocation8 + $0x6e8] sm:$0xff]  ;;  %v9877_v14 = vcombine.low %v1537_v61, %v1541_v63 }
 0x190   :  { %7566 = vmatprep.subr.bf16.mxu0 %v9838_v15  ;;  %7894 = vmatprep.subr.bf16.mxu1 %v9840_v20  ;;  %v9879_v15 = vcombine.low %v1538_v1, %v1542_v2  ;;  %v9886_v20 = vcombine.high %v1545_v10, %v1549_v11  ;;  %v9888_v21 = vcombine.high %v1546_v12, %v1550_v13 }
 0x191   :  { %v9918_v1 = vcombine.high %v1577_v53, %v1581_v54 }
 0x193   :  { %7567 = vmatpush1.bf16.msra.mxu0 %v9837_v26  ;;  %7895 = vmatpush1.bf16.msra.mxu1 %v9839_v27  ;;  %v1558_v26 = vld [vmem:[#allocation8 + $0x728] sm:$0xff]  ;;  %v9885_v27 = vcombine.low %v1545_v10, %v1549_v11  ;;  %v9917_v11 = vcombine.low %v1577_v53, %v1581_v54  ;;  %v1609_v54 = vld [vmem:[#allocation8 + $0x8c0] sm:$0xff] }
 0x194   :  { %7568 = vmatprep.subr.bf16.mxu0 %v9846_v28  ;;  %7896 = vmatprep.subr.bf16.mxu1 %v9848_v29  ;;  %v9887_v28 = vcombine.low %v1546_v12, %v1550_v13  ;;  %v9894_v29 = vcombine.high %v1553_v22, %v1557_v24  ;;  %v9896_v30 = vcombine.high %v1554_v25, %v1558_v26  ;;  %v11456_v13 = vld [vmem:[#allocation7 + $0x8] sm:$0xff] }
 0x195   :  { %v11432_v44 = vpop.f32.mrb[4].mxu0 }
 0x196   :  { %v11434_v45 = vpop.f32.mrb[5].mxu0 }
 0x197   :  { %7569 = vmatpush1.bf16.msra.mxu0 %v9845_v34  ;;  %7897 = vmatpush1.bf16.msra.mxu1 %v9847_v35  ;;  %v1089_v47 = vpop.f32.mrb[6].mxu0  ;;  %v11436_v57 = vpop.f32.mrb[4].mxu1  ;;  %v1566_v34 = vld [vmem:[#allocation8 + $0x768] sm:$0xff]  ;;  %v9893_v35 = vcombine.low %v1553_v22, %v1557_v24  ;;  %v1597_v22 = vld [vmem:[#allocation8 + $0x860] sm:$0xff] }
 0x198   :  { %7570 = vmatprep.subr.bf16.mxu0 %v9854_v37  ;;  %7898 = vmatprep.subr.bf16.mxu1 %v9856_v38  ;;  %v1090_v51 = vpop.f32.mrb[7].mxu0  ;;  %v11438_v62 = vpop.f32.mrb[5].mxu1  ;;  %v9895_v37 = vcombine.low %v1554_v25, %v1558_v26  ;;  %v11441_v38 = vsub.s32 2, %v11397_v16  ;;  %v9904_v42 = vcombine.high %v1562_v33, %v1566_v34  ;;  %v11444_v47 = vsub.s32 5, %v11397_v16  ;;  %v1594_v25 = vld [vmem:[#allocation8 + $0x848] sm:$0xff] }
 0x199   :  { %v1130_v3 = vpop.f32.mrb[6].mxu1  ;;  %v9910_v51 = vcombine.high %v1569_v43, %v1573_v6  ;;  %v1598_v26 = vld [vmem:[#allocation8 + $0x868] sm:$0xff] }
 0x19a   :  { %v1131_v4 = vpop.f32.mrb[7].mxu1  ;;  %v260_v50 = vrot.slane %v11402_v18, %v11441_v38  ;;  %v1585_v3 = vld [vmem:[#allocation8 + $0x800] sm:$0xff] }
 0x19b   :  { %7571 = vmatpush1.bf16.msra.mxu0 %v9853_v46  ;;  %7899 = vmatpush1.bf16.msra.mxu1 %v9855_v0  ;;  %v1570_v46 = vld [vmem:[#allocation8 + $0x788] sm:$0xff]  ;;  %v1589_v4 = vld [vmem:[#allocation8 + $0x820] sm:$0xff] }
 0x19c   :  { %7572 = vmatprep.subr.bf16.mxu0 %v9862_v48  ;;  %7900 = vmatprep.subr.bf16.mxu1 %v9864_v49  ;;  %v1574_v0 = vld [vmem:[#allocation8 + $0x7a8] sm:$0xff]  ;;  %v9901_v48 = vcombine.low %v1561_v31, %v1565_v32  ;;  %v9903_v49 = vcombine.low %v1562_v33, %v1566_v34  ;;  %v1045_v63 = vadd.f32 %v11420_v39, %v260_v50 }
 0x19d   :  { %v9912_v52 = vcombine.high %v1570_v46, %v1574_v0  ;;  %v9911_v61 = vcombine.low %v1570_v46, %v1574_v0  ;;  %v9936_v34 = vcombine.high %v1594_v25, %v1598_v26 }
 0x19f   :  { %7573 = vmatpush1.bf16.msra.mxu0 %v9861_v55  ;;  %7901 = vmatpush1.bf16.msra.mxu1 %v9863_v56  ;;  %v1578_v55 = vld [vmem:[#allocation8 + $0x7c8] sm:$0xff] }
 0x1a0   :  { %7574 = vmatprep.subr.bf16.mxu0 %v9870_v59  ;;  %7902 = vmatprep.subr.bf16.mxu1 %v9872_v60  ;;  %v1582_v56 = vld [vmem:[#allocation8 + $0x7e8] sm:$0xff]  ;;  %v272_v59 = vrot.slane %v11402_v18, %v11444_v47  ;;  %v9909_v60 = vcombine.low %v1569_v43, %v1573_v6 }
 0x1a1   :  { %v9920_v2 = vcombine.high %v1578_v55, %v1582_v56  ;;  %v9919_v12 = vcombine.low %v1578_v55, %v1582_v56  ;;  %v1602_v43 = vld [vmem:[#allocation8 + $0x888] sm:$0xff]  ;;  %v1613_v55 = vld [vmem:[#allocation8 + $0x8e0] sm:$0xff] }
 0x1a2   :  { %v1606_v6 = vld [vmem:[#allocation8 + $0x8a8] sm:$0xff] }
 0x1a3   :  { %7575 = vmatpush1.bf16.msra.mxu0 %v9869_v5  ;;  %7903 = vmatpush1.bf16.msra.mxu1 %v9871_v7  ;;  %v1586_v5 = vld [vmem:[#allocation8 + $0x808] sm:$0xff]  ;;  %v9944_v53 = vcombine.high %v1602_v43, %v1606_v6 }
 0x1a4   :  { %7576 = vmatprep.subr.bf16.mxu0 %v9878_v8  ;;  %7904 = vmatprep.subr.bf16.mxu1 %v9880_v9  ;;  %v1590_v7 = vld [vmem:[#allocation8 + $0x828] sm:$0xff]  ;;  %v1088_v8 = vadd.f32 %v11434_v45, %v272_v59  ;;  %v292_v45 = vrot.slane %v11456_v13, %v11441_v38 }
 0x1a5   :  { %v1610_v56 = vld [vmem:[#allocation8 + $0x8c8] sm:$0xff] }
 0x1a6   :  { %v1614_v59 = vld [vmem:[#allocation8 + $0x8e8] sm:$0xff] }
 0x1a7   :  { %7577 = vmatpush1.bf16.msra.mxu0 %v9877_v14  ;;  %7905 = vmatpush1.bf16.msra.mxu1 %v9879_v15  ;;  %v1299_v14 = vmax.f32 %v1045_v63, 0.0  ;;  %v9926_v15 = vcombine.high %v1585_v3, %v1589_v4  ;;  %v9950_v63 = vcombine.high %v1609_v54, %v1613_v55 }
 0x1a8   :  { %7578 = vmatprep.subr.bf16.mxu0 %v9886_v20  ;;  %7906 = vmatprep.subr.bf16.mxu1 %v9888_v21  ;;  %v9928_v20 = vcombine.high %v1586_v5, %v1590_v7  ;;  %v1593_v21 = vld [vmem:[#allocation8 + $0x840] sm:$0xff] }
 0x1a9   :  { %v9934_v31 = vcombine.high %v1593_v21, %v1597_v22  ;;  %v11462_v33 = vpack.c.bf16 %v1299_v14, %v1299_v14  ;;  %v9933_v50 = vcombine.low %v1593_v21, %v1597_v22  ;;  %v1629_v14 = vld [vmem:[#allocation8 + $0x960] sm:$0xff] }
 0x1ab   :  { %7579 = vmatpush1.bf16.msra.mxu0 %v9885_v27  ;;  %7907 = vmatpush1.bf16.msra.mxu1 %v9887_v28  ;;  %v1302_v27 = vmax.f32 %v1088_v8, 0.0  ;;  %v296_v28 = vrot.slane %v11456_v13, %v11412_v23  ;;  %v9951_v8 = vcombine.low %v1610_v56, %v1614_v59 }
 0x1ac   :  { %7580 = vmatprep.subr.bf16.mxu0 %v9894_v29  ;;  %7908 = vmatprep.subr.bf16.mxu1 %v9896_v30  ;;  %v9925_v29 = vcombine.low %v1585_v3, %v1589_v4  ;;  %v9927_v30 = vcombine.low %v1586_v5, %v1590_v7  ;;  %v1621_v3 = vld [vmem:[#allocation8 + $0x920] sm:$0xff]  ;;  %v1618_v4 = vld [vmem:[#allocation8 + $0x908] sm:$0xff]  ;;  %v9949_v7 = vcombine.low %v1609_v54, %v1613_v55 }
 0x1ad   :  { %v11466_v46 = vpack.c.bf16 %v1302_v27, %v1302_v27  ;;  %v1622_v5 = vld [vmem:[#allocation8 + $0x928] sm:$0xff]  ;;  %v1653_v54 = vld [vmem:[#allocation8 + $0xa20] sm:$0xff] }
 0x1ae   :  { %v9959_v22 = vcombine.low %v1618_v4, %v1622_v5  ;;  %v1634_v27 = vld [vmem:[#allocation8 + $0x988] sm:$0xff] }
 0x1af   :  { %7581 = vmatpush1.bf16.msra.mxu0 %v9893_v35  ;;  %7909 = vmatpush1.bf16.msra.mxu1 %v9895_v37  ;;  %v1601_v35 = vld [vmem:[#allocation8 + $0x880] sm:$0xff]  ;;  %v1650_v55 = vld [vmem:[#allocation8 + $0xa08] sm:$0xff] }
 0x1b0   :  { %7582 = vmatprep.subr.bf16.mxu0 %v9902_v41  ;;  %7910 = vmatprep.subr.bf16.mxu1 %v9904_v42  ;;  %v1605_v42 = vld [vmem:[#allocation8 + $0x8a0] sm:$0xff] }
 0x1b3   :  { %7583 = vmatpush1.bf16.msra.mxu0 %v9901_v48  ;;  %7911 = vmatpush1.bf16.msra.mxu1 %v9903_v49 }
 0x1b4   :  { %7584 = vmatprep.subr.bf16.mxu0 %v9910_v51  ;;  %7912 = vmatprep.subr.bf16.mxu1 %v9912_v52  ;;  %v9935_v51 = vcombine.low %v1594_v25, %v1598_v26  ;;  %v9942_v52 = vcombine.high %v1601_v35, %v1605_v42  ;;  %v1633_v25 = vld [vmem:[#allocation8 + $0x980] sm:$0xff] }
 0x1b5   :  { %v11452_v9 = vpop.f32.mrb[8].mxu0  ;;  %v1637_v26 = vld [vmem:[#allocation8 + $0x9a0] sm:$0xff] }
 0x1b6   :  { %v11454_v10 = vpop.f32.mrb[9].mxu0 }
 0x1b7   :  { %7585 = vmatpush1.bf16.msra.mxu0 %v9909_v60  ;;  %7913 = vmatpush1.bf16.msra.mxu1 %v9911_v61  ;;  %v1171_v39 = vpop.f32.mrb[10].mxu0  ;;  %v1208_v32 = vpop.f32.mrb[8].mxu1  ;;  %v9941_v60 = vcombine.low %v1601_v35, %v1605_v42  ;;  %v9943_v61 = vcombine.low %v1602_v43, %v1606_v6  ;;  %v1641_v35 = vld [vmem:[#allocation8 + $0x9c0] sm:$0xff]  ;;  %v1642_v42 = vld [vmem:[#allocation8 + $0x9c8] sm:$0xff] }
 0x1b8   :  { %7586 = vmatprep.subr.bf16.mxu0 %v9918_v1  ;;  %7914 = vmatprep.subr.bf16.mxu1 %v9920_v2  ;;  %v1172_v24 = vpop.f32.mrb[11].mxu0  ;;  %v11464_v37 = vadd.f32 %v1208_v32, %v292_v45  ;;  %v1210_v41 = vpop.f32.mrb[9].mxu1  ;;  %v9952_v1 = vcombine.high %v1610_v56, %v1614_v59  ;;  %v1617_v2 = vld [vmem:[#allocation8 + $0x900] sm:$0xff]  ;;  %v9974_v32 = vcombine.high %v1633_v25, %v1637_v26  ;;  %v1646_v43 = vld [vmem:[#allocation8 + $0x9e8] sm:$0xff] }
 0x1b9   :  { %v11468_v0 = vadd.f32 %v1210_v41, %v296_v28  ;;  %v1212_v48 = vpop.f32.mrb[10].mxu1  ;;  %v1625_v39 = vld [vmem:[#allocation8 + $0x940] sm:$0xff]  ;;  %v9957_v21 = vcombine.low %v1617_v2, %v1621_v3  ;;  %v1638_v28 = vld [vmem:[#allocation8 + $0x9a8] sm:$0xff] }
 0x1ba   :  { %v1213_v49 = vpop.f32.mrb[11].mxu1  ;;  %v9966_v45 = vcombine.high %v1625_v39, %v1629_v14  ;;  %v1645_v41 = vld [vmem:[#allocation8 + $0x9e0] sm:$0xff]  ;;  %v9973_v48 = vcombine.low %v1633_v25, %v1637_v26  ;;  %v1654_v56 = vld [vmem:[#allocation8 + $0xa28] sm:$0xff] }
 0x1bb   :  { %7587 = vmatpush1.bf16.msra.mxu0 %v9917_v11  ;;  %7915 = vmatpush1.bf16.msra.mxu1 %v9919_v12  ;;  %v9958_v11 = vcombine.high %v1617_v2, %v1621_v3  ;;  %v9960_v12 = vcombine.high %v1618_v4, %v1622_v5  ;;  %v9975_v49 = vcombine.low %v1634_v27, %v1638_v28  ;;  %v1665_v26 = vld [vmem:[#allocation8 + $0xa80] sm:$0xff] }
 0x1bc   :  { %7597 = vmatprep.subr.bf16.mxu0 %v9926_v15  ;;  %7925 = vmatprep.subr.bf16.mxu1 %v9928_v20  ;;  %v1626_v15 = vld [vmem:[#allocation8 + $0x948] sm:$0xff]  ;;  %v9981_v2 = vcombine.low %v1641_v35, %v1645_v41  ;;  %v9983_v3 = vcombine.low %v1642_v42, %v1646_v43 }
 0x1bd   :  { %v1630_v20 = vld [vmem:[#allocation8 + $0x968] sm:$0xff] }
 0x1be   :  { %7589 = vmatmul.mubr.bf16.vlgmr.msra.gmra.mrb[16].mxu0 %v11462_v33  ;;  %7917 = vmatmul.mubr.bf16.vlgmr.msra.gmra.mrb[16].mxu1 %v11462_v33  ;;  %v9968_v24 = vcombine.high %v1626_v15, %v1630_v20 }
 0x1bf   :  { %7598 = vmatpush1.bf16.msra.mxu0 %v9925_v29  ;;  %7926 = vmatpush1.bf16.msra.mxu1 %v9927_v30  ;;  %v9965_v29 = vcombine.low %v1625_v39, %v1629_v14  ;;  %v9967_v30 = vcombine.low %v1626_v15, %v1630_v20  ;;  %v1661_v14 = vld [vmem:[#allocation8 + $0xa60] sm:$0xff]  ;;  %v1658_v15 = vld [vmem:[#allocation8 + $0xa48] sm:$0xff] }
 0x1c0   :  { %7599 = vmatprep.subr.bf16.mxu0 %v9934_v31  ;;  %7927 = vmatprep.subr.bf16.mxu1 %v9936_v34  ;;  %v11475_v31 = vsub.s32 4, %v11397_v16  ;;  %v9976_v34 = vcombine.high %v1634_v27, %v1638_v28 }
 0x1c1   :  { %7629 = vmatprep.mubr.bf16.mxu0 %v11466_v46  ;;  %7957 = vmatprep.mubr.bf16.mxu1 %v11466_v46 }
 0x1c2   :  { %v300_v6 = vrot.slane %v11456_v13, %v11475_v31 }
 0x1c3   :  { %7600 = vmatpush1.bf16.msra.mxu0 %v9933_v50  ;;  %7928 = vmatpush1.bf16.msra.mxu1 %v9935_v51  ;;  %v304_v50 = vrot.slane %v11456_v13, %v11444_v47  ;;  %v9982_v51 = vcombine.high %v1641_v35, %v1645_v41 }
 0x1c4   :  { %7601 = vmatprep.subr.bf16.mxu0 %v9942_v52  ;;  %7929 = vmatprep.subr.bf16.mxu1 %v9944_v53  ;;  %v9984_v52 = vcombine.high %v1642_v42, %v1646_v43  ;;  %v1649_v53 = vld [vmem:[#allocation8 + $0xa00] sm:$0xff] }
 0x1c7   :  { %7602 = vmatpush1.bf16.msra.mxu0 %v9941_v60  ;;  %7930 = vmatpush1.bf16.msra.mxu1 %v9943_v61  ;;  %v11482_v60 = vsub.s32 6, %v11397_v16 }
 0x1c8   :  { %7603 = vmatprep.subr.bf16.mxu0 %v9950_v63  ;;  %7931 = vmatprep.subr.bf16.mxu1 %v9952_v1  ;;  %v11487_v1 = vsub.s32 7, %v11397_v16  ;;  %v1662_v16 = vld [vmem:[#allocation8 + $0xa68] sm:$0xff] }
 0x1c9   :  { %v10000_v25 = vcombine.high %v1658_v15, %v1662_v16  ;;  %v9999_v43 = vcombine.low %v1658_v15, %v1662_v16  ;;  %v1694_v15 = vld [vmem:[#allocation8 + $0xb68] sm:$0xff] }
 0x1ca   :  { %v312_v20 = vrot.slane %v11456_v13, %v11487_v1 }
 0x1cb   :  { %7604 = vmatpush1.bf16.msra.mxu0 %v9949_v7  ;;  %7932 = vmatpush1.bf16.msra.mxu1 %v9951_v8  ;;  %v9990_v7 = vcombine.high %v1649_v53, %v1653_v54  ;;  %v9992_v8 = vcombine.high %v1650_v55, %v1654_v56 }
 0x1cc   :  { %7605 = vmatprep.subr.bf16.mxu0 %v9958_v11  ;;  %7933 = vmatprep.subr.bf16.mxu1 %v9960_v12  ;;  %v1657_v11 = vld [vmem:[#allocation8 + $0xa40] sm:$0xff]  ;;  %v308_v12 = vrot.slane %v11456_v13, %v11482_v60 }
 0x1cd   :  { %v9997_v42 = vcombine.low %v1657_v11, %v1661_v14 }
 0x1cf   :  { %7606 = vmatpush1.bf16.msra.mxu0 %v9957_v21  ;;  %7934 = vmatpush1.bf16.msra.mxu1 %v9959_v22  ;;  %v9989_v21 = vcombine.low %v1649_v53, %v1653_v54  ;;  %v9991_v22 = vcombine.low %v1650_v55, %v1654_v56 }
 0x1d0   :  { %7607 = vmatprep.subr.bf16.mxu0 %v9966_v45  ;;  %7935 = vmatprep.subr.bf16.mxu1 %v9968_v24  ;;  %v9998_v24 = vcombine.high %v1657_v11, %v1661_v14  ;;  %v1690_v14 = vld [vmem:[#allocation8 + $0xb48] sm:$0xff] }
 0x1d3   :  { %7608 = vmatpush1.bf16.msra.mxu0 %v9965_v29  ;;  %7936 = vmatpush1.bf16.msra.mxu1 %v9967_v30  ;;  %v1669_v29 = vld [vmem:[#allocation8 + $0xaa0] sm:$0xff]  ;;  %v1666_v30 = vld [vmem:[#allocation8 + $0xa88] sm:$0xff] }
 0x1d4   :  { %7609 = vmatprep.subr.bf16.mxu0 %v9974_v32  ;;  %7937 = vmatprep.subr.bf16.mxu1 %v9976_v34  ;;  %v1670_v32 = vld [vmem:[#allocation8 + $0xaa8] sm:$0xff]  ;;  %v10005_v53 = vcombine.low %v1665_v26, %v1669_v29 }
 0x1d5   :  { %v1249_v59 = vpop.f32.mrb[12].mxu0  ;;  %v10007_v54 = vcombine.low %v1666_v30, %v1670_v32 }
 0x1d6   :  { %v11484_v61 = vadd.f32 %v1249_v59, %v300_v6  ;;  %v1251_v63 = vpop.f32.mrb[13].mxu0  ;;  %v10006_v6 = vcombine.high %v1665_v26, %v1669_v29  ;;  %v1681_v59 = vld [vmem:[#allocation8 + $0xb00] sm:$0xff]  ;;  %v1702_v26 = vld [vmem:[#allocation8 + $0xba8] sm:$0xff]  ;;  %v10031_v29 = vcombine.low %v1690_v14, %v1694_v15 }
 0x1d7   :  { %7610 = vmatpush1.bf16.msra.mxu0 %v9973_v48  ;;  %7938 = vmatpush1.bf16.msra.mxu1 %v9975_v49  ;;  %v11489_v4 = vadd.f32 %v1251_v63, %v304_v50  ;;  %v1253_v5 = vpop.f32.mrb[14].mxu0  ;;  %v1290_v45 = vpop.f32.mrb[12].mxu1  ;;  %v10008_v48 = vcombine.high %v1666_v30, %v1670_v32  ;;  %v1673_v49 = vld [vmem:[#allocation8 + $0xac0] sm:$0xff]  ;;  %v268_v30 = vrot.slane %v11402_v18, %v11475_v31 }
 0x1d8   :  { %7611 = vmatprep.subr.bf16.mxu0 %v9982_v51  ;;  %7939 = vmatprep.subr.bf16.mxu1 %v9984_v52  ;;  %v1254_v39 = vpop.f32.mrb[15].mxu0  ;;  %v11495_v27 = vadd.f32 %v1290_v45, %v308_v12  ;;  %v1292_v28 = vpop.f32.mrb[13].mxu1  ;;  %v1677_v50 = vld [vmem:[#allocation8 + $0xae0] sm:$0xff]  ;;  %v1674_v51 = vld [vmem:[#allocation8 + $0xac8] sm:$0xff] }
 0x1d9   :  { %v11497_v34 = vadd.f32 %v1292_v28, %v312_v20  ;;  %v1294_v35 = vpop.f32.mrb[14].mxu1  ;;  %v1678_v52 = vld [vmem:[#allocation8 + $0xae8] sm:$0xff]  ;;  %v10014_v55 = vcombine.high %v1673_v49, %v1677_v50  ;;  %v1685_v63 = vld [vmem:[#allocation8 + $0xb20] sm:$0xff]  ;;  %v10013_v5 = vcombine.low %v1673_v49, %v1677_v50 }
 0x1da   :  { %v1295_v41 = vpop.f32.mrb[15].mxu1  ;;  %v10016_v56 = vcombine.high %v1674_v51, %v1678_v52  ;;  %v1689_v12 = vld [vmem:[#allocation8 + $0xb40] sm:$0xff]  ;;  %v10021_v16 = vcombine.low %v1681_v59, %v1685_v63 }
 0x1db   :  { %7612 = vmatpush1.bf16.msra.mxu0 %v9981_v2  ;;  %7940 = vmatpush1.bf16.msra.mxu1 %v9983_v3  ;;  %v1682_v2 = vld [vmem:[#allocation8 + $0xb08] sm:$0xff]  ;;  %v1693_v39 = vld [vmem:[#allocation8 + $0xb60] sm:$0xff] }
 0x1dc   :  { %7613 = vmatprep.subr.bf16.mxu0 %v9990_v7  ;;  %7941 = vmatprep.subr.bf16.mxu1 %v9992_v8  ;;  %v1686_v3 = vld [vmem:[#allocation8 + $0xb28] sm:$0xff]  ;;  %v10015_v7 = vcombine.low %v1674_v51, %v1678_v52  ;;  %v10022_v8 = vcombine.high %v1681_v59, %v1685_v63  ;;  %v1697_v45 = vld [vmem:[#allocation8 + $0xb80] sm:$0xff]  ;;  %v10029_v28 = vcombine.low %v1689_v12, %v1693_v39 }
 0x1dd   :  { %v10024_v11 = vcombine.high %v1682_v2, %v1686_v3  ;;  %v10023_v20 = vcombine.low %v1682_v2, %v1686_v3  ;;  %v1705_v41 = vld [vmem:[#allocation8 + $0xbc0] sm:$0xff]  ;;  %v1086_v51 = vadd.f32 %v11432_v44, %v268_v30  ;;  %v1714_v59 = vld [vmem:[#allocation8 + $0xc08] sm:$0xff] }
 0x1de   :  { %v1718_v63 = vld [vmem:[#allocation8 + $0xc28] sm:$0xff] }
 0x1df   :  { %7614 = vmatpush1.bf16.msra.mxu0 %v9989_v21  ;;  %7942 = vmatpush1.bf16.msra.mxu1 %v9991_v22  ;;  %v10030_v21 = vcombine.high %v1689_v12, %v1693_v39  ;;  %v10032_v22 = vcombine.high %v1690_v14, %v1694_v15  ;;  %v1301_v3 = vmax.f32 %v1086_v51, 0.0  ;;  %v1722_v12 = vld [vmem:[#allocation8 + $0xc48] sm:$0xff]  ;;  %v10055_v15 = vcombine.low %v1714_v59, %v1718_v63  ;;  %v1749_v51 = vld [vmem:[#allocation8 + $0xd20] sm:$0xff] }
 0x1e0   :  { %7615 = vmatprep.subr.bf16.mxu0 %v9998_v24  ;;  %7943 = vmatprep.subr.bf16.mxu1 %v10000_v25  ;;  %v1701_v24 = vld [vmem:[#allocation8 + $0xba0] sm:$0xff]  ;;  %v1698_v25 = vld [vmem:[#allocation8 + $0xb88] sm:$0xff] }
 0x1e1   :  { %v10038_v32 = vcombine.high %v1697_v45, %v1701_v24  ;;  %v10040_v35 = vcombine.high %v1698_v25, %v1702_v26  ;;  %v10037_v49 = vcombine.low %v1697_v45, %v1701_v24  ;;  %v10039_v50 = vcombine.low %v1698_v25, %v1702_v26  ;;  %v1726_v39 = vld [vmem:[#allocation8 + $0xc68] sm:$0xff]  ;;  %v1733_v45 = vld [vmem:[#allocation8 + $0xca0] sm:$0xff] }
 0x1e2   :  { %v11505_v14 = vpack.c.bf16 %v1301_v3, %v1301_v3  ;;  %v1730_v24 = vld [vmem:[#allocation8 + $0xc88] sm:$0xff] }
 0x1e3   :  { %7616 = vmatpush1.bf16.msra.mxu0 %v9997_v42  ;;  %7944 = vmatpush1.bf16.msra.mxu1 %v9999_v43  ;;  %v280_v42 = vrot.slane %v11402_v18, %v11487_v1  ;;  %v1709_v43 = vld [vmem:[#allocation8 + $0xbe0] sm:$0xff]  ;;  %v1734_v25 = vld [vmem:[#allocation8 + $0xca8] sm:$0xff] }
 0x1e4   :  { %7617 = vmatprep.subr.bf16.mxu0 %v10006_v6  ;;  %7945 = vmatprep.subr.bf16.mxu1 %v10008_v48  ;;  %v1706_v6 = vld [vmem:[#allocation8 + $0xbc8] sm:$0xff]  ;;  %v10046_v52 = vcombine.high %v1705_v41, %v1709_v43  ;;  %v10045_v18 = vcombine.low %v1705_v41, %v1709_v43  ;;  %v10072_v30 = vcombine.high %v1730_v24, %v1734_v25 }
 0x1e5   :  { %v1710_v48 = vld [vmem:[#allocation8 + $0xbe8] sm:$0xff] }
 0x1e6   :  { %v10047_v2 = vcombine.low %v1706_v6, %v1710_v48  ;;  %v1738_v41 = vld [vmem:[#allocation8 + $0xcc8] sm:$0xff] }
 0x1e7   :  { %7618 = vmatpush1.bf16.msra.mxu0 %v10005_v53  ;;  %7946 = vmatpush1.bf16.msra.mxu1 %v10007_v54  ;;  %v10048_v53 = vcombine.high %v1706_v6, %v1710_v48  ;;  %v1713_v54 = vld [vmem:[#allocation8 + $0xc00] sm:$0xff]  ;;  %v10071_v6 = vcombine.low %v1730_v24, %v1734_v25  ;;  %v1758_v3 = vld [vmem:[#allocation8 + $0xd68] sm:$0xff] }
 0x1e8   :  { %7619 = vmatprep.subr.bf16.mxu0 %v10014_v55  ;;  %7947 = vmatprep.subr.bf16.mxu1 %v10016_v56  ;;  %v1129_v55 = vadd.f32 %v11438_v62, %v280_v42  ;;  %v1717_v56 = vld [vmem:[#allocation8 + $0xc20] sm:$0xff]  ;;  %v1742_v42 = vld [vmem:[#allocation8 + $0xce8] sm:$0xff] }
 0x1e9   :  { %v10053_v62 = vcombine.low %v1713_v54, %v1717_v56  ;;  %v1773_v24 = vld [vmem:[#allocation8 + $0xde0] sm:$0xff]  ;;  %v1770_v25 = vld [vmem:[#allocation8 + $0xdc8] sm:$0xff] }
 0x1ea   :  { %v1304_v44 = vmax.f32 %v1129_v55, 0.0  ;;  %v10079_v55 = vcombine.low %v1738_v41, %v1742_v42 }
 0x1eb   :  { %7620 = vmatpush1.bf16.msra.mxu0 %v10013_v5  ;;  %7948 = vmatpush1.bf16.msra.mxu1 %v10015_v7  ;;  %v10054_v5 = vcombine.high %v1713_v54, %v1717_v56  ;;  %v10056_v7 = vcombine.high %v1714_v59, %v1718_v63  ;;  %v1753_v63 = vld [vmem:[#allocation8 + $0xd40] sm:$0xff] }
 0x1ec   :  { %7621 = vmatprep.subr.bf16.mxu0 %v10022_v8  ;;  %7949 = vmatprep.subr.bf16.mxu1 %v10024_v11  ;;  %v1721_v8 = vld [vmem:[#allocation8 + $0xc40] sm:$0xff] }
 0x1ed   :  { %v1725_v11 = vld [vmem:[#allocation8 + $0xc60] sm:$0xff] }
 0x1ee   :  { %v10061_v26 = vcombine.low %v1721_v8, %v1725_v11 }
 0x1ef   :  { %7622 = vmatpush1.bf16.msra.mxu0 %v10021_v16  ;;  %7950 = vmatpush1.bf16.msra.mxu1 %v10023_v20  ;;  %v11507_v16 = vpack.c.bf16 %v1304_v44, %v1304_v44  ;;  %v10062_v20 = vcombine.high %v1721_v8, %v1725_v11  ;;  %v1761_v11 = vld [vmem:[#allocation8 + $0xd80] sm:$0xff] }
 0x1f0   :  { %7623 = vmatprep.subr.bf16.mxu0 %v10030_v21  ;;  %7951 = vmatprep.subr.bf16.mxu1 %v10032_v22  ;;  %v10064_v21 = vcombine.high %v1722_v12, %v1726_v39  ;;  %v1729_v22 = vld [vmem:[#allocation8 + $0xc80] sm:$0xff] }
 0x1f1   :  { %v10069_v43 = vcombine.low %v1729_v22, %v1733_v45 }
 0x1f3   :  { %7624 = vmatpush1.bf16.msra.mxu0 %v10029_v28  ;;  %7952 = vmatpush1.bf16.msra.mxu1 %v10031_v29  ;;  %v10063_v28 = vcombine.low %v1722_v12, %v1726_v39  ;;  %v10070_v29 = vcombine.high %v1729_v22, %v1733_v45  ;;  %v1765_v12 = vld [vmem:[#allocation8 + $0xda0] sm:$0xff]  ;;  %v1762_v39 = vld [vmem:[#allocation8 + $0xd88] sm:$0xff] }
 0x1f4   :  { %7625 = vmatprep.subr.bf16.mxu0 %v10038_v32  ;;  %7953 = vmatprep.subr.bf16.mxu1 %v10040_v35  ;;  %v1737_v32 = vld [vmem:[#allocation8 + $0xcc0] sm:$0xff] }
 0x1f5   :  { %v1741_v35 = vld [vmem:[#allocation8 + $0xce0] sm:$0xff] }
 0x1f6   :  { %v10078_v48 = vcombine.high %v1737_v32, %v1741_v35  ;;  %v10077_v54 = vcombine.low %v1737_v32, %v1741_v35  ;;  %v1769_v45 = vld [vmem:[#allocation8 + $0xdc0] sm:$0xff] }
 0x1f7   :  { %7626 = vmatpush1.bf16.msra.mxu0 %v10037_v49  ;;  %7954 = vmatpush1.bf16.msra.mxu1 %v10039_v50  ;;  %v10080_v49 = vcombine.high %v1738_v41, %v1742_v42  ;;  %v1745_v50 = vld [vmem:[#allocation8 + $0xd00] sm:$0xff]  ;;  %v1778_v42 = vld [vmem:[#allocation8 + $0xe08] sm:$0xff] }
 0x1f8   :  { %7627 = vmatprep.subr.bf16.mxu0 %v10046_v52  ;;  %7955 = vmatprep.subr.bf16.mxu1 %v10048_v53  ;;  %v1746_v52 = vld [vmem:[#allocation8 + $0xd08] sm:$0xff]  ;;  %v10086_v56 = vcombine.high %v1745_v50, %v1749_v51  ;;  %v1777_v35 = vld [vmem:[#allocation8 + $0xe00] sm:$0xff] }
 0x1f9   :  { %v1750_v53 = vld [vmem:[#allocation8 + $0xd28] sm:$0xff]  ;;  %v1781_v41 = vld [vmem:[#allocation8 + $0xe20] sm:$0xff] }
 0x1fa   :  { %v10088_v59 = vcombine.high %v1746_v52, %v1750_v53 }
 0x1fb   :  { %7628 = vmatpush1.bf16.msra.mxu0 %v10045_v18  ;;  %7956 = vmatpush1.bf16.msra.mxu1 %v10047_v2  ;;  %v1757_v18 = vld [vmem:[#allocation8 + $0xd60] sm:$0xff]  ;;  %v1754_v2 = vld [vmem:[#allocation8 + $0xd48] sm:$0xff] }
 0x1fc   :  { %7638 = vmatprep.subr.bf16.mxu0 %v10054_v5  ;;  %7966 = vmatprep.subr.bf16.mxu1 %v10056_v7  ;;  %v10085_v5 = vcombine.low %v1745_v50, %v1749_v51  ;;  %v10087_v7 = vcombine.low %v1746_v52, %v1750_v53  ;;  %v10094_v44 = vcombine.high %v1753_v63, %v1757_v18  ;;  %v1785_v51 = vld [vmem:[#allocation8 + $0xe40] sm:$0xff]  ;;  %v1786_v53 = vld [vmem:[#allocation8 + $0xe48] sm:$0xff] }
 0x1fd   :  { %v10096_v8 = vcombine.high %v1754_v2, %v1758_v3  ;;  %v1789_v52 = vld [vmem:[#allocation8 + $0xe60] sm:$0xff] }
 0x1fe   :  { %7630 = vmatmul.mubr.bf16.vlgmr.msra.gmra.mrb[16].mxu0 %v11505_v14  ;;  %7958 = vmatmul.mubr.bf16.vlgmr.msra.gmra.mrb[16].mxu1 %v11505_v14 }
 0x1ff   :  { %7639 = vmatpush1.bf16.msra.mxu0 %v10053_v62  ;;  %7670 = vmatprep.mubr.bf16.mxu0 %v11507_v16  ;;  %v1766_v62 = vld [vmem:[#allocation8 + $0xda8] sm:$0xff] }
 0x200   :  { %7967 = vmatpush1.bf16.msra.mxu1 %v10055_v15  ;;  %7998 = vmatprep.mubr.bf16.mxu1 %v11507_v16  ;;  %v10093_v15 = vcombine.low %v1753_v63, %v1757_v18  ;;  %v10104_v22 = vcombine.high %v1762_v39, %v1766_v62  ;;  %v1793_v18 = vld [vmem:[#allocation8 + $0xe80] sm:$0xff] }
 0x201   :  { %7640 = vmatprep.subr.bf16.mxu0 %v10062_v20  ;;  %7968 = vmatprep.subr.bf16.mxu1 %v10064_v21  ;;  %v10095_v20 = vcombine.low %v1754_v2, %v1758_v3  ;;  %v10102_v21 = vcombine.high %v1761_v11, %v1765_v12  ;;  %v1797_v2 = vld [vmem:[#allocation8 + $0xea0] sm:$0xff]  ;;  %v1794_v3 = vld [vmem:[#allocation8 + $0xe88] sm:$0xff] }
 0x203   :  { %7641 = vmatpush1.bf16.msra.mxu0 %v10061_v26  ;;  %v1774_v26 = vld [vmem:[#allocation8 + $0xde8] sm:$0xff] }
 0x204   :  { %7969 = vmatpush1.bf16.msra.mxu1 %v10063_v28  ;;  %7642 = vmatprep.subr.bf16.mxu0 %v10070_v29  ;;  %v10101_v28 = vcombine.low %v1761_v11, %v1765_v12  ;;  %v10103_v29 = vcombine.low %v1762_v39, %v1766_v62  ;;  %v10112_v32 = vcombine.high %v1770_v25, %v1774_v26  ;;  %v1801_v12 = vld [vmem:[#allocation8 + $0xec0] sm:$0xff]  ;;  %v1802_v62 = vld [vmem:[#allocation8 + $0xec8] sm:$0xff] }
 0x205   :  { %7970 = vmatprep.subr.bf16.mxu1 %v10072_v30  ;;  %v10110_v30 = vcombine.high %v1769_v45, %v1773_v24  ;;  %v1805_v39 = vld [vmem:[#allocation8 + $0xee0] sm:$0xff] }
 0x207   :  { %7643 = vmatpush1.bf16.msra.mxu0 %v10069_v43  ;;  %v1782_v43 = vld [vmem:[#allocation8 + $0xe28] sm:$0xff] }
 0x208   :  { %7971 = vmatpush1.bf16.msra.mxu1 %v10071_v6  ;;  %7644 = vmatprep.subr.bf16.mxu0 %v10078_v48  ;;  %v10109_v6 = vcombine.low %v1769_v45, %v1773_v24  ;;  %v10111_v48 = vcombine.low %v1770_v25, %v1774_v26  ;;  %v10120_v50 = vcombine.high %v1778_v42, %v1782_v43  ;;  %v1809_v24 = vld [vmem:[#allocation8 + $0xf00] sm:$0xff]  ;;  %v1810_v26 = vld [vmem:[#allocation8 + $0xf08] sm:$0xff] }
 0x209   :  { %7972 = vmatprep.subr.bf16.mxu1 %v10080_v49  ;;  %v10118_v49 = vcombine.high %v1777_v35, %v1781_v41  ;;  %v1813_v25 = vld [vmem:[#allocation8 + $0xf20] sm:$0xff] }
 0x20b   :  { %7645 = vmatpush1.bf16.msra.mxu0 %v10077_v54  ;;  %v1790_v54 = vld [vmem:[#allocation8 + $0xe68] sm:$0xff] }
 0x20c   :  { %7973 = vmatpush1.bf16.msra.mxu1 %v10079_v55  ;;  %7646 = vmatprep.subr.bf16.mxu0 %v10086_v56  ;;  %v10117_v55 = vcombine.low %v1777_v35, %v1781_v41  ;;  %v10119_v56 = vcombine.low %v1778_v42, %v1782_v43  ;;  %v10128_v63 = vcombine.high %v1786_v53, %v1790_v54  ;;  %v1817_v41 = vld [vmem:[#allocation8 + $0xf40] sm:$0xff]  ;;  %v1818_v43 = vld [vmem:[#allocation8 + $0xf48] sm:$0xff] }
 0x20d   :  { %7974 = vmatprep.subr.bf16.mxu1 %v10088_v59  ;;  %v10126_v59 = vcombine.high %v1785_v51, %v1789_v52  ;;  %v1821_v42 = vld [vmem:[#allocation8 + $0xf60] sm:$0xff] }
 0x20f   :  { %7647 = vmatpush1.bf16.msra.mxu0 %v10085_v5  ;;  %v1798_v5 = vld [vmem:[#allocation8 + $0xea8] sm:$0xff] }
 0x210   :  { %7975 = vmatpush1.bf16.msra.mxu1 %v10087_v7  ;;  %7648 = vmatprep.subr.bf16.mxu0 %v10094_v44  ;;  %v10125_v7 = vcombine.low %v1785_v51, %v1789_v52  ;;  %v10127_v44 = vcombine.low %v1786_v53, %v1790_v54  ;;  %v10136_v11 = vcombine.high %v1794_v3, %v1798_v5  ;;  %v1825_v52 = vld [vmem:[#allocation8 + $0xf80] sm:$0xff]  ;;  %v1826_v54 = vld [vmem:[#allocation8 + $0xf88] sm:$0xff] }
 0x211   :  { %7976 = vmatprep.subr.bf16.mxu1 %v10096_v8  ;;  %v10134_v8 = vcombine.high %v1793_v18, %v1797_v2  ;;  %v1829_v53 = vld [vmem:[#allocation8 + $0xfa0] sm:$0xff] }
 0x213   :  { %7649 = vmatpush1.bf16.msra.mxu0 %v10093_v15  ;;  %v1806_v15 = vld [vmem:[#allocation8 + $0xee8] sm:$0xff] }
 0x214   :  { %7977 = vmatpush1.bf16.msra.mxu1 %v10095_v20  ;;  %7650 = vmatprep.subr.bf16.mxu0 %v10102_v21  ;;  %v10133_v20 = vcombine.low %v1793_v18, %v1797_v2  ;;  %v10135_v21 = vcombine.low %v1794_v3, %v1798_v5  ;;  %v10144_v45 = vcombine.high %v1802_v62, %v1806_v15  ;;  %v1833_v5 = vld [vmem:[#allocation8 + $0xfc0] sm:$0xff] }
 0x215   :  { %7978 = vmatprep.subr.bf16.mxu1 %v10104_v22  ;;  %v10142_v22 = vcombine.high %v1801_v12, %v1805_v39  ;;  %v10166_v2 = vcombine.high %v1825_v52, %v1829_v53 }
 0x217   :  { %7651 = vmatpush1.bf16.msra.mxu0 %v10101_v28  ;;  %v1814_v28 = vld [vmem:[#allocation8 + $0xf28] sm:$0xff] }
 0x218   :  { %7979 = vmatpush1.bf16.msra.mxu1 %v10103_v29  ;;  %7652 = vmatprep.subr.bf16.mxu0 %v10110_v30  ;;  %v10141_v29 = vcombine.low %v1801_v12, %v1805_v39  ;;  %v10143_v30 = vcombine.low %v1802_v62, %v1806_v15  ;;  %v10152_v35 = vcombine.high %v1810_v26, %v1814_v28 }
 0x219   :  { %7980 = vmatprep.subr.bf16.mxu1 %v10112_v32  ;;  %v10150_v32 = vcombine.high %v1809_v24, %v1813_v25  ;;  %v10165_v12 = vcombine.low %v1825_v52, %v1829_v53  ;;  %v1858_v53 = vld [vmem:[#allocation8 + $0x1088] sm:$0xff] }
 0x21b   :  { %7653 = vmatpush1.bf16.msra.mxu0 %v10109_v6  ;;  %v1822_v6 = vld [vmem:[#allocation8 + $0xf68] sm:$0xff] }
 0x21c   :  { %7981 = vmatpush1.bf16.msra.mxu1 %v10111_v48  ;;  %7654 = vmatprep.subr.bf16.mxu0 %v10118_v49  ;;  %v10149_v48 = vcombine.low %v1809_v24, %v1813_v25  ;;  %v10151_v49 = vcombine.low %v1810_v26, %v1814_v28  ;;  %v10160_v51 = vcombine.high %v1818_v43, %v1822_v6  ;;  %v1842_v24 = vld [vmem:[#allocation8 + $0x1008] sm:$0xff] }
 0x21d   :  { %7982 = vmatprep.subr.bf16.mxu1 %v10120_v50  ;;  %v10158_v50 = vcombine.high %v1817_v41, %v1821_v42  ;;  %v10159_v18 = vcombine.low %v1818_v43, %v1822_v6  ;;  %v1846_v25 = vld [vmem:[#allocation8 + $0x1028] sm:$0xff] }
 0x21e   :  { %v1854_v43 = vld [vmem:[#allocation8 + $0x1068] sm:$0xff] }
 0x21f   :  { %7655 = vmatpush1.bf16.msra.mxu0 %v10117_v55  ;;  %v1830_v55 = vld [vmem:[#allocation8 + $0xfa8] sm:$0xff] }
 0x220   :  { %7983 = vmatpush1.bf16.msra.mxu1 %v10119_v56  ;;  %7656 = vmatprep.subr.bf16.mxu0 %v10126_v59  ;;  %v10157_v56 = vcombine.low %v1817_v41, %v1821_v42  ;;  %v11044_v59 = vld [vmem:[#allocation7] sm:$0xff]  ;;  %v10168_v3 = vcombine.high %v1826_v54, %v1830_v55  ;;  %v10167_v62 = vcombine.low %v1826_v54, %v1830_v55  ;;  %v1850_v42 = vld [vmem:[#allocation8 + $0x1048] sm:$0xff] }
 0x221   :  { %7984 = vmatprep.subr.bf16.mxu1 %v10128_v63  ;;  %v276_v63 = vrot.slane %v11044_v59, %v11482_v60  ;;  %v10192_v52 = vcombine.high %v1850_v42, %v1854_v43  ;;  %v1862_v54 = vld [vmem:[#allocation8 + $0x10a8] sm:$0xff] }
 0x223   :  { %7657 = vmatpush1.bf16.msra.mxu0 %v10125_v7  ;;  %v1837_v7 = vld [vmem:[#allocation8 + $0xfe0] sm:$0xff]  ;;  %v1127_v39 = vadd.f32 %v11436_v57, %v276_v63  ;;  %v10184_v57 = vcombine.high %v1842_v24, %v1846_v25  ;;  %v10200_v63 = vcombine.high %v1858_v53, %v1862_v54 }
 0x224   :  { %7985 = vmatpush1.bf16.msra.mxu1 %v10127_v44  ;;  %7658 = vmatprep.subr.bf16.mxu0 %v10134_v8  ;;  %v288_v44 = vrot.slane %v11456_v13, %v11405_v19  ;;  %v1834_v8 = vld [vmem:[#allocation8 + $0xfc8] sm:$0xff]  ;;  %v10174_v15 = vcombine.high %v1833_v5, %v1837_v7  ;;  %v10173_v13 = vcombine.low %v1833_v5, %v1837_v7 }
 0x225   :  { %7986 = vmatprep.subr.bf16.mxu1 %v10136_v11  ;;  %v1838_v11 = vld [vmem:[#allocation8 + $0xfe8] sm:$0xff]  ;;  %v1303_v26 = vmax.f32 %v1127_v39, 0.0  ;;  %v1877_v39 = vld [vmem:[#allocation8 + $0x1120] sm:$0xff] }
 0x226   :  { %v10175_v28 = vcombine.low %v1834_v8, %v1838_v11  ;;  %v1870_v5 = vld [vmem:[#allocation8 + $0x10e8] sm:$0xff] }
 0x227   :  { %7659 = vmatpush1.bf16.msra.mxu0 %v10133_v20  ;;  %v10176_v20 = vcombine.high %v1834_v8, %v1838_v11  ;;  %v11518_v6 = vpack.c.bf16 %v1303_v26, %v1303_v26  ;;  %v1886_v26 = vld [vmem:[#allocation8 + $0x1168] sm:$0xff] }
 0x228   :  { %7987 = vmatpush1.bf16.msra.mxu1 %v10135_v21  ;;  %7660 = vmatprep.subr.bf16.mxu0 %v10142_v22  ;;  %v1841_v21 = vld [vmem:[#allocation8 + $0x1000] sm:$0xff] }
 0x229   :  { %7988 = vmatprep.subr.bf16.mxu1 %v10144_v45  ;;  %v1845_v22 = vld [vmem:[#allocation8 + $0x1020] sm:$0xff]  ;;  %v1170_v45 = vadd.f32 %v11454_v10, %v288_v44  ;;  %v10183_v10 = vcombine.low %v1842_v24, %v1846_v25  ;;  %v10199_v44 = vcombine.low %v1858_v53, %v1862_v54  ;;  %v1898_v53 = vld [vmem:[#allocation8 + $0x11c8] sm:$0xff] }
 0x22a   :  { %v10181_v41 = vcombine.low %v1841_v21, %v1845_v22  ;;  %v1881_v24 = vld [vmem:[#allocation8 + $0x1140] sm:$0xff]  ;;  %v1902_v54 = vld [vmem:[#allocation8 + $0x11e8] sm:$0xff] }
 0x22b   :  { %7661 = vmatpush1.bf16.msra.mxu0 %v10141_v29  ;;  %v10182_v29 = vcombine.high %v1841_v21, %v1845_v22  ;;  %v1885_v25 = vld [vmem:[#allocation8 + $0x1160] sm:$0xff] }
 0x22c   :  { %7989 = vmatpush1.bf16.msra.mxu1 %v10143_v30  ;;  %7662 = vmatprep.subr.bf16.mxu0 %v10150_v32  ;;  %v1306_v30 = vmax.f32 %v1170_v45, 0.0  ;;  %v1849_v32 = vld [vmem:[#allocation8 + $0x1040] sm:$0xff] }
 0x22d   :  { %7990 = vmatprep.subr.bf16.mxu1 %v10152_v35  ;;  %v1853_v35 = vld [vmem:[#allocation8 + $0x1060] sm:$0xff] }
 0x22e   :  { %v10189_v55 = vcombine.low %v1849_v32, %v1853_v35 }
 0x22f   :  { %7663 = vmatpush1.bf16.msra.mxu0 %v10149_v48  ;;  %v10190_v48 = vcombine.high %v1849_v32, %v1853_v35  ;;  %v1889_v32 = vld [vmem:[#allocation8 + $0x1180] sm:$0xff] }
 0x230   :  { %7991 = vmatpush1.bf16.msra.mxu1 %v10151_v49  ;;  %7664 = vmatprep.subr.bf16.mxu0 %v10158_v50  ;;  %v1857_v49 = vld [vmem:[#allocation8 + $0x1080] sm:$0xff] }
 0x231   :  { %7992 = vmatprep.subr.bf16.mxu1 %v10160_v51  ;;  %v1861_v50 = vld [vmem:[#allocation8 + $0x10a0] sm:$0xff]  ;;  %v11520_v51 = vpack.c.bf16 %v1306_v30, %v1306_v30 }
 0x232   :  { %v10198_v59 = vcombine.high %v1857_v49, %v1861_v50  ;;  %v10197_v7 = vcombine.low %v1857_v49, %v1861_v50  ;;  %v1893_v35 = vld [vmem:[#allocation8 + $0x11a0] sm:$0xff] }
 0x233   :  { %7665 = vmatpush1.bf16.msra.mxu0 %v10157_v56  ;;  %v10191_v56 = vcombine.low %v1850_v42, %v1854_v43  ;;  %v1894_v42 = vld [vmem:[#allocation8 + $0x11a8] sm:$0xff]  ;;  %v10221_v43 = vcombine.low %v1881_v24, %v1885_v25  ;;  %v1897_v50 = vld [vmem:[#allocation8 + $0x11c0] sm:$0xff] }
 0x234   :  { %7993 = vmatpush1.bf16.msra.mxu1 %v10159_v18  ;;  %7666 = vmatprep.subr.bf16.mxu0 %v10166_v2  ;;  %v1865_v18 = vld [vmem:[#allocation8 + $0x10c0] sm:$0xff] }
 0x235   :  { %7994 = vmatprep.subr.bf16.mxu1 %v10168_v3  ;;  %v1869_v2 = vld [vmem:[#allocation8 + $0x10e0] sm:$0xff]  ;;  %v1866_v3 = vld [vmem:[#allocation8 + $0x10c8] sm:$0xff] }
 0x236   :  { %v10206_v8 = vcombine.high %v1865_v18, %v1869_v2  ;;  %v10208_v11 = vcombine.high %v1866_v3, %v1870_v5  ;;  %v10207_v21 = vcombine.low %v1866_v3, %v1870_v5  ;;  %v1906_v3 = vld [vmem:[#allocation8 + $0x1208] sm:$0xff] }
 0x237   :  { %7667 = vmatpush1.bf16.msra.mxu0 %v10165_v12  ;;  %v1873_v12 = vld [vmem:[#allocation8 + $0x1100] sm:$0xff]  ;;  %v1910_v5 = vld [vmem:[#allocation8 + $0x1228] sm:$0xff] }
 0x238   :  { %7995 = vmatpush1.bf16.msra.mxu1 %v10167_v62  ;;  %7668 = vmatprep.subr.bf16.mxu0 %v10174_v15  ;;  %v1874_v62 = vld [vmem:[#allocation8 + $0x1108] sm:$0xff]  ;;  %v10214_v22 = vcombine.high %v1873_v12, %v1877_v39 }
 0x239   :  { %7996 = vmatprep.subr.bf16.mxu1 %v10176_v20  ;;  %v1878_v15 = vld [vmem:[#allocation8 + $0x1128] sm:$0xff]  ;;  %v10205_v20 = vcombine.low %v1865_v18, %v1869_v2  ;;  %v1905_v18 = vld [vmem:[#allocation8 + $0x1200] sm:$0xff] }
 0x23a   :  { %v10216_v45 = vcombine.high %v1874_v62, %v1878_v15  ;;  %v1909_v2 = vld [vmem:[#allocation8 + $0x1220] sm:$0xff] }
 0x23b   :  { %7669 = vmatpush1.bf16.msra.mxu0 %v10173_v13  ;;  %v1882_v13 = vld [vmem:[#allocation8 + $0x1148] sm:$0xff] }
 0x23c   :  { %7997 = vmatpush1.bf16.msra.mxu1 %v10175_v28  ;;  %7679 = vmatprep.subr.bf16.mxu0 %v10182_v29  ;;  %v10213_v28 = vcombine.low %v1873_v12, %v1877_v39  ;;  %v10215_v29 = vcombine.low %v1874_v62, %v1878_v15  ;;  %v10224_v30 = vcombine.high %v1882_v13, %v1886_v26  ;;  %v1913_v12 = vld [vmem:[#allocation8 + $0x1240] sm:$0xff]  ;;  %v1914_v62 = vld [vmem:[#allocation8 + $0x1248] sm:$0xff] }
 0x23d   :  { %8007 = vmatprep.subr.bf16.mxu1 %v10184_v57  ;;  %v10222_v57 = vcombine.high %v1881_v24, %v1885_v25  ;;  %v1917_v39 = vld [vmem:[#allocation8 + $0x1260] sm:$0xff]  ;;  %v1918_v15 = vld [vmem:[#allocation8 + $0x1268] sm:$0xff] }
 0x23e   :  { %7671 = vmatmul.mubr.bf16.vlgmr.msra.gmra.mrb[16].mxu0 %v11518_v6  ;;  %v1921_v24 = vld [vmem:[#allocation8 + $0x1280] sm:$0xff] }
 0x23f   :  { %7999 = vmatmul.mubr.bf16.vlgmr.msra.gmra.mrb[16].mxu1 %v11518_v6  ;;  %7680 = vmatpush1.bf16.msra.mxu0 %v10181_v41  ;;  %v1890_v41 = vld [vmem:[#allocation8 + $0x1188] sm:$0xff]  ;;  %v1925_v25 = vld [vmem:[#allocation8 + $0x12a0] sm:$0xff] }
 0x240   :  { %7711 = vmatprep.mubr.bf16.mxu0 %v11520_v51  ;;  %8008 = vmatpush1.bf16.msra.mxu1 %v10183_v10  ;;  %v10223_v10 = vcombine.low %v1882_v13, %v1886_v26  ;;  %v10232_v49 = vcombine.high %v1890_v41, %v1894_v42  ;;  %v1922_v13 = vld [vmem:[#allocation8 + $0x1288] sm:$0xff] }
 0x241   :  { %8039 = vmatprep.mubr.bf16.mxu1 %v11520_v51  ;;  %7681 = vmatprep.subr.bf16.mxu0 %v10190_v48  ;;  %v10230_v48 = vcombine.high %v1889_v32, %v1893_v35  ;;  %v1926_v26 = vld [vmem:[#allocation8 + $0x12a8] sm:$0xff] }
 0x242   :  { %8009 = vmatprep.subr.bf16.mxu1 %v10192_v52  ;;  %v1901_v52 = vld [vmem:[#allocation8 + $0x11e0] sm:$0xff] }
 0x243   :  { %7682 = vmatpush1.bf16.msra.mxu0 %v10189_v55  ;;  %v10229_v55 = vcombine.low %v1889_v32, %v1893_v35  ;;  %v1929_v32 = vld [vmem:[#allocation8 + $0x12c0] sm:$0xff] }
 0x244   :  { %8010 = vmatpush1.bf16.msra.mxu1 %v10191_v56  ;;  %7683 = vmatprep.subr.bf16.mxu0 %v10198_v59  ;;  %v10231_v56 = vcombine.low %v1890_v41, %v1894_v42  ;;  %v10238_v59 = vcombine.high %v1897_v50, %v1901_v52  ;;  %v1933_v35 = vld [vmem:[#allocation8 + $0x12e0] sm:$0xff]  ;;  %v1930_v41 = vld [vmem:[#allocation8 + $0x12c8] sm:$0xff] }
 0x245   :  { %8011 = vmatprep.subr.bf16.mxu1 %v10200_v63  ;;  %v10240_v63 = vcombine.high %v1898_v53, %v1902_v54  ;;  %v1934_v42 = vld [vmem:[#allocation8 + $0x12e8] sm:$0xff] }
 0x247   :  { %7684 = vmatpush1.bf16.msra.mxu0 %v10197_v7  ;;  %v10237_v7 = vcombine.low %v1897_v50, %v1901_v52  ;;  %v1937_v50 = vld [vmem:[#allocation8 + $0x1300] sm:$0xff] }
 0x248   :  { %8012 = vmatpush1.bf16.msra.mxu1 %v10199_v44  ;;  %7685 = vmatprep.subr.bf16.mxu0 %v10206_v8  ;;  %v10239_v44 = vcombine.low %v1898_v53, %v1902_v54  ;;  %v10246_v8 = vcombine.high %v1905_v18, %v1909_v2  ;;  %v1941_v52 = vld [vmem:[#allocation8 + $0x1320] sm:$0xff]  ;;  %v1938_v53 = vld [vmem:[#allocation8 + $0x1308] sm:$0xff] }
 0x249   :  { %8013 = vmatprep.subr.bf16.mxu1 %v10208_v11  ;;  %v10248_v11 = vcombine.high %v1906_v3, %v1910_v5  ;;  %v1942_v54 = vld [vmem:[#allocation8 + $0x1328] sm:$0xff] }
 0x24b   :  { %7686 = vmatpush1.bf16.msra.mxu0 %v10205_v20  ;;  %v10245_v20 = vcombine.low %v1905_v18, %v1909_v2  ;;  %v1945_v18 = vld [vmem:[#allocation8 + $0x1340] sm:$0xff] }
 0x24c   :  { %8014 = vmatpush1.bf16.msra.mxu1 %v10207_v21  ;;  %7687 = vmatprep.subr.bf16.mxu0 %v10214_v22  ;;  %v10247_v21 = vcombine.low %v1906_v3, %v1910_v5  ;;  %v10254_v22 = vcombine.high %v1913_v12, %v1917_v39  ;;  %v1949_v2 = vld [vmem:[#allocation8 + $0x1360] sm:$0xff]  ;;  %v1946_v3 = vld [vmem:[#allocation8 + $0x1348] sm:$0xff] }
 0x24d   :  { %8015 = vmatprep.subr.bf16.mxu1 %v10216_v45  ;;  %v10256_v45 = vcombine.high %v1914_v62, %v1918_v15  ;;  %v1950_v5 = vld [vmem:[#allocation8 + $0x1368] sm:$0xff] }
 0x24f   :  { %7688 = vmatpush1.bf16.msra.mxu0 %v10213_v28  ;;  %v10253_v28 = vcombine.low %v1913_v12, %v1917_v39  ;;  %v1953_v12 = vld [vmem:[#allocation8 + $0x1380] sm:$0xff] }
 0x250   :  { %8016 = vmatpush1.bf16.msra.mxu1 %v10215_v29  ;;  %7689 = vmatprep.subr.bf16.mxu0 %v10222_v57  ;;  %v10255_v29 = vcombine.low %v1914_v62, %v1918_v15  ;;  %v10262_v57 = vcombine.high %v1921_v24, %v1925_v25  ;;  %v1957_v39 = vld [vmem:[#allocation8 + $0x13a0] sm:$0xff]  ;;  %v1954_v62 = vld [vmem:[#allocation8 + $0x1388] sm:$0xff] }
 0x251   :  { %8017 = vmatprep.subr.bf16.mxu1 %v10224_v30  ;;  %v10264_v30 = vcombine.high %v1922_v13, %v1926_v26  ;;  %v1958_v15 = vld [vmem:[#allocation8 + $0x13a8] sm:$0xff] }
 0x253   :  { %7690 = vmatpush1.bf16.msra.mxu0 %v10221_v43  ;;  %v10261_v43 = vcombine.low %v1921_v24, %v1925_v25  ;;  %v10294_v24 = vcombine.high %v1953_v12, %v1957_v39  ;;  %v10296_v25 = vcombine.high %v1954_v62, %v1958_v15 }
 0x254   :  { %8018 = vmatpush1.bf16.msra.mxu1 %v10223_v10  ;;  %7691 = vmatprep.subr.bf16.mxu0 %v10230_v48  ;;  %v10263_v10 = vcombine.low %v1922_v13, %v1926_v26  ;;  %v10270_v48 = vcombine.high %v1929_v32, %v1933_v35  ;;  %v1961_v13 = vld [vmem:[#allocation8 + $0x13c0] sm:$0xff] }
 0x255   :  { %8019 = vmatprep.subr.bf16.mxu1 %v10232_v49  ;;  %v10272_v49 = vcombine.high %v1930_v41, %v1934_v42  ;;  %v1965_v26 = vld [vmem:[#allocation8 + $0x13e0] sm:$0xff] }
 0x257   :  { %7692 = vmatpush1.bf16.msra.mxu0 %v10229_v55  ;;  %v10269_v55 = vcombine.low %v1929_v32, %v1933_v35  ;;  %v10295_v32 = vcombine.low %v1954_v62, %v1958_v15  ;;  %v10302_v35 = vcombine.high %v1961_v13, %v1965_v26 }
 0x258   :  { %8020 = vmatpush1.bf16.msra.mxu1 %v10231_v56  ;;  %7693 = vmatprep.subr.bf16.mxu0 %v10238_v59  ;;  %v10271_v56 = vcombine.low %v1930_v41, %v1934_v42  ;;  %v10278_v59 = vcombine.high %v1937_v50, %v1941_v52  ;;  %v1969_v42 = vld [vmem:[#allocation8 + $0x1400] sm:$0xff] }
 0x259   :  { %8021 = vmatprep.subr.bf16.mxu1 %v10240_v63  ;;  %v10280_v63 = vcombine.high %v1938_v53, %v1942_v54 }
 0x25b   :  { %7694 = vmatpush1.bf16.msra.mxu0 %v10237_v7  ;;  %v10277_v7 = vcombine.low %v1937_v50, %v1941_v52 }
 0x25c   :  { %8022 = vmatpush1.bf16.msra.mxu1 %v10239_v44  ;;  %7695 = vmatprep.subr.bf16.mxu0 %v10246_v8  ;;  %v10279_v44 = vcombine.low %v1938_v53, %v1942_v54  ;;  %v10286_v8 = vcombine.high %v1945_v18, %v1949_v2 }
 0x25d   :  { %8023 = vmatprep.subr.bf16.mxu1 %v10248_v11  ;;  %v10288_v11 = vcombine.high %v1946_v3, %v1950_v5 }
 0x25f   :  { %7696 = vmatpush1.bf16.msra.mxu0 %v10245_v20  ;;  %v10285_v20 = vcombine.low %v1945_v18, %v1949_v2  ;;  %v1982_v18 = vld [vmem:[#allocation8 + $0x1468] sm:$0xff] }
 0x260   :  { %8024 = vmatpush1.bf16.msra.mxu1 %v10247_v21  ;;  %7697 = vmatprep.subr.bf16.mxu0 %v10254_v22  ;;  %v11045_v21 = vld [vmem:[#allocation7 + $0x8] sm:$0xff] }
 0x261   :  { %8025 = vmatprep.subr.bf16.mxu1 %v10256_v45  ;;  %v284_v22 = vrot.slane %v11045_v21, %v11400_v17  ;;  %v10287_v45 = vcombine.low %v1946_v3, %v1950_v5  ;;  %v1993_v21 = vld [vmem:[#allocation8 + $0x14c0] sm:$0xff] }
 0x263   :  { %7698 = vmatpush1.bf16.msra.mxu0 %v10253_v28  ;;  %v1962_v28 = vld [vmem:[#allocation8 + $0x13c8] sm:$0xff] }
 0x264   :  { %8026 = vmatpush1.bf16.msra.mxu1 %v10255_v29  ;;  %7699 = vmatprep.subr.bf16.mxu0 %v10262_v57  ;;  %v1966_v29 = vld [vmem:[#allocation8 + $0x13e8] sm:$0xff]  ;;  %v10293_v57 = vcombine.low %v1953_v12, %v1957_v39 }
 0x265   :  { %8027 = vmatprep.subr.bf16.mxu1 %v10264_v30  ;;  %v1168_v30 = vadd.f32 %v11452_v9, %v284_v22  ;;  %v10304_v41 = vcombine.high %v1962_v28, %v1966_v29  ;;  %v10303_v52 = vcombine.low %v1962_v28, %v1966_v29  ;;  %v1308_v9 = vmax.f32 %v11468_v0, 0.0  ;;  %v1990_v12 = vld [vmem:[#allocation8 + $0x14a8] sm:$0xff]  ;;  %v1997_v22 = vld [vmem:[#allocation8 + $0x14e0] sm:$0xff] }
 0x266   :  { %v2001_v29 = vld [vmem:[#allocation8 + $0x1500] sm:$0xff] }
 0x267   :  { %7700 = vmatpush1.bf16.msra.mxu0 %v10261_v43  ;;  %v1973_v43 = vld [vmem:[#allocation8 + $0x1420] sm:$0xff]  ;;  %v1305_v50 = vmax.f32 %v1168_v30, 0.0  ;;  %v2002_v30 = vld [vmem:[#allocation8 + $0x1508] sm:$0xff] }
 0x268   :  { %8028 = vmatpush1.bf16.msra.mxu1 %v10263_v10  ;;  %7701 = vmatprep.subr.bf16.mxu0 %v10270_v48  ;;  %v1970_v10 = vld [vmem:[#allocation8 + $0x1408] sm:$0xff]  ;;  %v10310_v53 = vcombine.high %v1969_v42, %v1973_v43 }
 0x269   :  { %8029 = vmatprep.subr.bf16.mxu1 %v10272_v49  ;;  %v1974_v48 = vld [vmem:[#allocation8 + $0x1428] sm:$0xff]  ;;  %v10301_v49 = vcombine.low %v1961_v13, %v1965_v26  ;;  %v11529_v2 = vpack.c.bf16 %v1305_v50, %v1305_v50  ;;  %v10334_v26 = vcombine.high %v1993_v21, %v1997_v22 }
 0x26a   :  { %v10312_v54 = vcombine.high %v1970_v10, %v1974_v48  ;;  %v10311_v3 = vcombine.low %v1970_v10, %v1974_v48  ;;  %v2009_v10 = vld [vmem:[#allocation8 + $0x1540] sm:$0xff]  ;;  %v2014_v50 = vld [vmem:[#allocation8 + $0x1568] sm:$0xff] }
 0x26b   :  { %7702 = vmatpush1.bf16.msra.mxu0 %v10269_v55  ;;  %v1977_v55 = vld [vmem:[#allocation8 + $0x1440] sm:$0xff] }
 0x26c   :  { %8030 = vmatpush1.bf16.msra.mxu1 %v10271_v56  ;;  %7703 = vmatprep.subr.bf16.mxu0 %v10278_v59  ;;  %v1981_v56 = vld [vmem:[#allocation8 + $0x1460] sm:$0xff]  ;;  %v10309_v59 = vcombine.low %v1969_v42, %v1973_v43 }
 0x26d   :  { %8031 = vmatprep.subr.bf16.mxu1 %v10280_v63  ;;  %v1978_v63 = vld [vmem:[#allocation8 + $0x1448] sm:$0xff]  ;;  %v10318_v5 = vcombine.high %v1977_v55, %v1981_v56  ;;  %v10317_v39 = vcombine.low %v1977_v55, %v1981_v56  ;;  %v2013_v48 = vld [vmem:[#allocation8 + $0x1560] sm:$0xff] }
 0x26e   :  { %v10320_v0 = vcombine.high %v1978_v63, %v1982_v18  ;;  %v10319_v62 = vcombine.low %v1978_v63, %v1982_v18  ;;  %v2017_v55 = vld [vmem:[#allocation8 + $0x1580] sm:$0xff]  ;;  %v2022_v63 = vld [vmem:[#allocation8 + $0x15a8] sm:$0xff]  ;;  %v10349_v18 = vcombine.low %v2009_v10, %v2013_v48 }
 0x26f   :  { %7704 = vmatpush1.bf16.msra.mxu0 %v10277_v7  ;;  %v1985_v7 = vld [vmem:[#allocation8 + $0x1480] sm:$0xff] }
 0x270   :  { %8032 = vmatpush1.bf16.msra.mxu1 %v10279_v44  ;;  %7705 = vmatprep.subr.bf16.mxu0 %v10286_v8  ;;  %v1989_v44 = vld [vmem:[#allocation8 + $0x14a0] sm:$0xff]  ;;  %v11531_v8 = vpack.c.bf16 %v1308_v9, %v1308_v9 }
 0x271   :  { %8033 = vmatprep.subr.bf16.mxu1 %v10288_v11  ;;  %v1986_v11 = vld [vmem:[#allocation8 + $0x1488] sm:$0xff]  ;;  %v10326_v15 = vcombine.high %v1985_v7, %v1989_v44  ;;  %v2021_v56 = vld [vmem:[#allocation8 + $0x15a0] sm:$0xff] }
 0x272   :  { %v10327_v13 = vcombine.low %v1986_v11, %v1990_v12 }
 0x273   :  { %7706 = vmatpush1.bf16.msra.mxu0 %v10285_v20  ;;  %v10328_v20 = vcombine.high %v1986_v11, %v1990_v12  ;;  %v2026_v11 = vld [vmem:[#allocation8 + $0x15c8] sm:$0xff] }
 0x274   :  { %8034 = vmatpush1.bf16.msra.mxu1 %v10287_v45  ;;  %7707 = vmatprep.subr.bf16.mxu0 %v10294_v24  ;;  %v1994_v45 = vld [vmem:[#allocation8 + $0x14c8] sm:$0xff] }
 0x275   :  { %8035 = vmatprep.subr.bf16.mxu1 %v10296_v25  ;;  %v1998_v24 = vld [vmem:[#allocation8 + $0x14e8] sm:$0xff]  ;;  %v10325_v25 = vcombine.low %v1985_v7, %v1989_v44  ;;  %v2025_v44 = vld [vmem:[#allocation8 + $0x15c0] sm:$0xff] }
 0x276   :  { %v10336_v28 = vcombine.high %v1994_v45, %v1998_v24  ;;  %v2030_v12 = vld [vmem:[#allocation8 + $0x15e8] sm:$0xff] }
 0x277   :  { %7708 = vmatpush1.bf16.msra.mxu0 %v10293_v57  ;;  %v2005_v57 = vld [vmem:[#allocation8 + $0x1520] sm:$0xff] }
 0x278   :  { %8036 = vmatpush1.bf16.msra.mxu1 %v10295_v32  ;;  %7709 = vmatprep.subr.bf16.mxu0 %v10302_v35  ;;  %v2006_v32 = vld [vmem:[#allocation8 + $0x1528] sm:$0xff]  ;;  %v10333_v35 = vcombine.low %v1993_v21, %v1997_v22  ;;  %v10342_v42 = vcombine.high %v2001_v29, %v2005_v57  ;;  %v2033_v21 = vld [vmem:[#allocation8 + $0x1600] sm:$0xff] }
 0x279   :  { %8037 = vmatprep.subr.bf16.mxu1 %v10304_v41  ;;  %v10335_v41 = vcombine.low %v1994_v45, %v1998_v24  ;;  %v10344_v43 = vcombine.high %v2002_v30, %v2006_v32  ;;  %v2037_v22 = vld [vmem:[#allocation8 + $0x1620] sm:$0xff]  ;;  %v2034_v45 = vld [vmem:[#allocation8 + $0x1608] sm:$0xff] }
 0x27a   :  { %v2038_v24 = vld [vmem:[#allocation8 + $0x1628] sm:$0xff] }
 0x27b   :  { %7710 = vmatpush1.bf16.msra.mxu0 %v10301_v49  ;;  %v2010_v49 = vld [vmem:[#allocation8 + $0x1548] sm:$0xff] }
 0x27c   :  { %8038 = vmatpush1.bf16.msra.mxu1 %v10303_v52  ;;  %7720 = vmatprep.subr.bf16.mxu0 %v10310_v53  ;;  %v10341_v52 = vcombine.low %v2001_v29, %v2005_v57  ;;  %v10343_v53 = vcombine.low %v2002_v30, %v2006_v32  ;;  %v10352_v9 = vcombine.high %v2010_v49, %v2014_v50  ;;  %v2041_v29 = vld [vmem:[#allocation8 + $0x1640] sm:$0xff]  ;;  %v2042_v30 = vld [vmem:[#allocation8 + $0x1648] sm:$0xff] }
 0x27d   :  { %8048 = vmatprep.subr.bf16.mxu1 %v10312_v54  ;;  %v10350_v54 = vcombine.high %v2009_v10, %v2013_v48  ;;  %v2045_v57 = vld [vmem:[#allocation8 + $0x1660] sm:$0xff]  ;;  %v2046_v32 = vld [vmem:[#allocation8 + $0x1668] sm:$0xff] }
 0x27e   :  { %7712 = vmatmul.mubr.bf16.vlgmr.msra.gmra.mrb[16].mxu0 %v11529_v2  ;;  %v2049_v10 = vld [vmem:[#allocation8 + $0x1680] sm:$0xff] }
 0x27f   :  { %8040 = vmatmul.mubr.bf16.vlgmr.msra.gmra.mrb[16].mxu1 %v11529_v2  ;;  %7721 = vmatpush1.bf16.msra.mxu0 %v10309_v59  ;;  %v2018_v59 = vld [vmem:[#allocation8 + $0x1588] sm:$0xff]  ;;  %v2053_v48 = vld [vmem:[#allocation8 + $0x16a0] sm:$0xff] }
 0x280   :  { %7752 = vmatprep.mubr.bf16.mxu0 %v11531_v8  ;;  %8049 = vmatpush1.bf16.msra.mxu1 %v10311_v3  ;;  %v10351_v3 = vcombine.low %v2010_v49, %v2014_v50  ;;  %v10360_v7 = vcombine.high %v2018_v59, %v2022_v63  ;;  %v2050_v49 = vld [vmem:[#allocation8 + $0x1688] sm:$0xff] }
 0x281   :  { %8080 = vmatprep.mubr.bf16.mxu1 %v11531_v8  ;;  %7722 = vmatprep.subr.bf16.mxu0 %v10318_v5  ;;  %v10358_v5 = vcombine.high %v2017_v55, %v2021_v56  ;;  %v2054_v50 = vld [vmem:[#allocation8 + $0x16a8] sm:$0xff] }
 0x282   :  { %8050 = vmatprep.subr.bf16.mxu1 %v10320_v0  ;;  %v2029_v0 = vld [vmem:[#allocation8 + $0x15e0] sm:$0xff] }
 0x283   :  { %7723 = vmatpush1.bf16.msra.mxu0 %v10317_v39  ;;  %v10357_v39 = vcombine.low %v2017_v55, %v2021_v56  ;;  %v2057_v55 = vld [vmem:[#allocation8 + $0x16c0] sm:$0xff] }
 0x284   :  { %8051 = vmatpush1.bf16.msra.mxu1 %v10319_v62  ;;  %7724 = vmatprep.subr.bf16.mxu0 %v10326_v15  ;;  %v10359_v62 = vcombine.low %v2018_v59, %v2022_v63  ;;  %v10366_v15 = vcombine.high %v2025_v44, %v2029_v0  ;;  %v2061_v56 = vld [vmem:[#allocation8 + $0x16e0] sm:$0xff]  ;;  %v2058_v59 = vld [vmem:[#allocation8 + $0x16c8] sm:$0xff] }
 0x285   :  { %8052 = vmatprep.subr.bf16.mxu1 %v10328_v20  ;;  %v10368_v20 = vcombine.high %v2026_v11, %v2030_v12  ;;  %v2062_v63 = vld [vmem:[#allocation8 + $0x16e8] sm:$0xff] }
 0x287   :  { %7725 = vmatpush1.bf16.msra.mxu0 %v10325_v25  ;;  %v10365_v25 = vcombine.low %v2025_v44, %v2029_v0  ;;  %v2065_v44 = vld [vmem:[#allocation8 + $0x1700] sm:$0xff] }
 0x288   :  { %8053 = vmatpush1.bf16.msra.mxu1 %v10327_v13  ;;  %7726 = vmatprep.subr.bf16.mxu0 %v10334_v26  ;;  %v10367_v13 = vcombine.low %v2026_v11, %v2030_v12  ;;  %v10374_v26 = vcombine.high %v2033_v21, %v2037_v22  ;;  %v2069_v0 = vld [vmem:[#allocation8 + $0x1720] sm:$0xff]  ;;  %v2066_v11 = vld [vmem:[#allocation8 + $0x1708] sm:$0xff] }
 0x289   :  { %8054 = vmatprep.subr.bf16.mxu1 %v10336_v28  ;;  %v10376_v28 = vcombine.high %v2034_v45, %v2038_v24  ;;  %v2070_v12 = vld [vmem:[#allocation8 + $0x1728] sm:$0xff] }
 0x28b   :  { %7727 = vmatpush1.bf16.msra.mxu0 %v10333_v35  ;;  %v10373_v35 = vcombine.low %v2033_v21, %v2037_v22  ;;  %v2073_v21 = vld [vmem:[#allocation8 + $0x1740] sm:$0xff] }
 0x28c   :  { %8055 = vmatpush1.bf16.msra.mxu1 %v10335_v41  ;;  %7728 = vmatprep.subr.bf16.mxu0 %v10342_v42  ;;  %v10375_v41 = vcombine.low %v2034_v45, %v2038_v24  ;;  %v10382_v42 = vcombine.high %v2041_v29, %v2045_v57  ;;  %v2077_v22 = vld [vmem:[#allocation8 + $0x1760] sm:$0xff]  ;;  %v2074_v45 = vld [vmem:[#allocation8 + $0x1748] sm:$0xff] }
 0x28d   :  { %8056 = vmatprep.subr.bf16.mxu1 %v10344_v43  ;;  %v10384_v43 = vcombine.high %v2042_v30, %v2046_v32  ;;  %v2078_v24 = vld [vmem:[#allocation8 + $0x1768] sm:$0xff] }
 0x28f   :  { %7729 = vmatpush1.bf16.msra.mxu0 %v10341_v52  ;;  %v10381_v52 = vcombine.low %v2041_v29, %v2045_v57  ;;  %v2081_v29 = vld [vmem:[#allocation8 + $0x1780] sm:$0xff] }
 0x290   :  { %8057 = vmatpush1.bf16.msra.mxu1 %v10343_v53  ;;  %7730 = vmatprep.subr.bf16.mxu0 %v10350_v54  ;;  %v10383_v53 = vcombine.low %v2042_v30, %v2046_v32  ;;  %v10390_v54 = vcombine.high %v2049_v10, %v2053_v48  ;;  %v2085_v57 = vld [vmem:[#allocation8 + $0x17a0] sm:$0xff]  ;;  %v2082_v30 = vld [vmem:[#allocation8 + $0x1788] sm:$0xff] }
 0x291   :  { %8058 = vmatprep.subr.bf16.mxu1 %v10352_v9  ;;  %v10392_v9 = vcombine.high %v2050_v49, %v2054_v50  ;;  %v2086_v32 = vld [vmem:[#allocation8 + $0x17a8] sm:$0xff] }
 0x293   :  { %7731 = vmatpush1.bf16.msra.mxu0 %v10349_v18  ;;  %v10389_v18 = vcombine.low %v2049_v10, %v2053_v48  ;;  %v2089_v10 = vld [vmem:[#allocation8 + $0x17c0] sm:$0xff] }
 0x294   :  { %8059 = vmatpush1.bf16.msra.mxu1 %v10351_v3  ;;  %7732 = vmatprep.subr.bf16.mxu0 %v10358_v5  ;;  %v10391_v3 = vcombine.low %v2050_v49, %v2054_v50  ;;  %v10398_v5 = vcombine.high %v2057_v55, %v2061_v56  ;;  %v2093_v48 = vld [vmem:[#allocation8 + $0x17e0] sm:$0xff]  ;;  %v2090_v49 = vld [vmem:[#allocation8 + $0x17c8] sm:$0xff] }
 0x295   :  { %8060 = vmatprep.subr.bf16.mxu1 %v10360_v7  ;;  %v10400_v7 = vcombine.high %v2058_v59, %v2062_v63  ;;  %v2094_v50 = vld [vmem:[#allocation8 + $0x17e8] sm:$0xff] }
 0x297   :  { %7733 = vmatpush1.bf16.msra.mxu0 %v10357_v39  ;;  %v10397_v39 = vcombine.low %v2057_v55, %v2061_v56  ;;  %v2097_v55 = vld [vmem:[#allocation8 + $0x1800] sm:$0xff] }
 0x298   :  { %8061 = vmatpush1.bf16.msra.mxu1 %v10359_v62  ;;  %7734 = vmatprep.subr.bf16.mxu0 %v10366_v15  ;;  %v10399_v62 = vcombine.low %v2058_v59, %v2062_v63  ;;  %v10406_v15 = vcombine.high %v2065_v44, %v2069_v0  ;;  %v2101_v56 = vld [vmem:[#allocation8 + $0x1820] sm:$0xff]  ;;  %v2098_v59 = vld [vmem:[#allocation8 + $0x1808] sm:$0xff] }
 0x299   :  { %8062 = vmatprep.subr.bf16.mxu1 %v10368_v20  ;;  %v10408_v20 = vcombine.high %v2066_v11, %v2070_v12  ;;  %v2102_v63 = vld [vmem:[#allocation8 + $0x1828] sm:$0xff] }
 0x29b   :  { %7735 = vmatpush1.bf16.msra.mxu0 %v10365_v25  ;;  %v10405_v25 = vcombine.low %v2065_v44, %v2069_v0  ;;  %v10440_v44 = vcombine.high %v2098_v59, %v2102_v63  ;;  %v1310_v0 = vmax.f32 %v11489_v4, 0.0 }
 0x29c   :  { %8063 = vmatpush1.bf16.msra.mxu1 %v10367_v13  ;;  %7736 = vmatprep.subr.bf16.mxu0 %v10374_v26  ;;  %v10407_v13 = vcombine.low %v2066_v11, %v2070_v12  ;;  %v10414_v26 = vcombine.high %v2073_v21, %v2077_v22  ;;  %v2105_v11 = vld [vmem:[#allocation8 + $0x1840] sm:$0xff] }
 0x29d   :  { %8064 = vmatprep.subr.bf16.mxu1 %v10376_v28  ;;  %v10416_v28 = vcombine.high %v2074_v45, %v2078_v24  ;;  %v2109_v12 = vld [vmem:[#allocation8 + $0x1860] sm:$0xff] }
 0x29f   :  { %7737 = vmatpush1.bf16.msra.mxu0 %v10373_v35  ;;  %v10413_v35 = vcombine.low %v2073_v21, %v2077_v22  ;;  %v10439_v21 = vcombine.low %v2098_v59, %v2102_v63  ;;  %v2113_v22 = vld [vmem:[#allocation8 + $0x1880] sm:$0xff] }
 0x2a0   :  { %8065 = vmatpush1.bf16.msra.mxu1 %v10375_v41  ;;  %7738 = vmatprep.subr.bf16.mxu0 %v10382_v42  ;;  %v10415_v41 = vcombine.low %v2074_v45, %v2078_v24  ;;  %v10422_v42 = vcombine.high %v2081_v29, %v2085_v57  ;;  %v2117_v45 = vld [vmem:[#allocation8 + $0x18a0] sm:$0xff]  ;;  %v11541_v24 = vpack.c.bf16 %v1310_v0, %v1310_v0 }
 0x2a1   :  { %8066 = vmatprep.subr.bf16.mxu1 %v10384_v43  ;;  %v10424_v43 = vcombine.high %v2082_v30, %v2086_v32  ;;  %v2137_v59 = vld [vmem:[#allocation8 + $0x1940] sm:$0xff] }
 0x2a2   :  { %v2141_v63 = vld [vmem:[#allocation8 + $0x1960] sm:$0xff] }
 0x2a3   :  { %7739 = vmatpush1.bf16.msra.mxu0 %v10381_v52  ;;  %v10421_v52 = vcombine.low %v2081_v29, %v2085_v57  ;;  %v10454_v29 = vcombine.high %v2113_v22, %v2117_v45 }
 0x2a4   :  { %8067 = vmatpush1.bf16.msra.mxu1 %v10383_v53  ;;  %7740 = vmatprep.subr.bf16.mxu0 %v10390_v54  ;;  %v10423_v53 = vcombine.low %v2082_v30, %v2086_v32  ;;  %v10430_v54 = vcombine.high %v2089_v10, %v2093_v48  ;;  %v2121_v30 = vld [vmem:[#allocation8 + $0x18c0] sm:$0xff] }
 0x2a5   :  { %8068 = vmatprep.subr.bf16.mxu1 %v10392_v9  ;;  %v10432_v9 = vcombine.high %v2090_v49, %v2094_v50  ;;  %v2125_v32 = vld [vmem:[#allocation8 + $0x18e0] sm:$0xff] }
 0x2a7   :  { %7741 = vmatpush1.bf16.msra.mxu0 %v10389_v18  ;;  %v10429_v18 = vcombine.low %v2089_v10, %v2093_v48  ;;  %v10462_v10 = vcombine.high %v2121_v30, %v2125_v32 }
 0x2a8   :  { %8069 = vmatpush1.bf16.msra.mxu1 %v10391_v3  ;;  %7742 = vmatprep.subr.bf16.mxu0 %v10398_v5  ;;  %v1307_v3 = vmax.f32 %v11464_v37, 0.0  ;;  %v10431_v5 = vcombine.low %v2090_v49, %v2094_v50  ;;  %v10446_v37 = vcombine.high %v2105_v11, %v2109_v12  ;;  %v2129_v49 = vld [vmem:[#allocation8 + $0x1900] sm:$0xff] }
 0x2a9   :  { %8070 = vmatprep.subr.bf16.mxu1 %v10400_v7  ;;  %v10438_v7 = vcombine.high %v2097_v55, %v2101_v56  ;;  %v2133_v50 = vld [vmem:[#allocation8 + $0x1920] sm:$0xff] }
 0x2ab   :  { %7743 = vmatpush1.bf16.msra.mxu0 %v10397_v39  ;;  %v10437_v39 = vcombine.low %v2097_v55, %v2101_v56  ;;  %v10470_v55 = vcombine.high %v2129_v49, %v2133_v50 }
 0x2ac   :  { %8071 = vmatpush1.bf16.msra.mxu1 %v10399_v62  ;;  %7744 = vmatprep.subr.bf16.mxu0 %v10406_v15  ;;  %v2106_v62 = vld [vmem:[#allocation8 + $0x1848] sm:$0xff] }
 0x2ad   :  { %8072 = vmatprep.subr.bf16.mxu1 %v10408_v20  ;;  %v2110_v15 = vld [vmem:[#allocation8 + $0x1868] sm:$0xff]  ;;  %v11539_v20 = vpack.c.bf16 %v1307_v3, %v1307_v3 }
 0x2ae   :  { %v10448_v4 = vcombine.high %v2106_v62, %v2110_v15  ;;  %v2142_v3 = vld [vmem:[#allocation8 + $0x1968] sm:$0xff] }
 0x2af   :  { %7745 = vmatpush1.bf16.msra.mxu0 %v10405_v25  ;;  %v2114_v25 = vld [vmem:[#allocation8 + $0x1888] sm:$0xff] }
 0x2b0   :  { %8073 = vmatpush1.bf16.msra.mxu1 %v10407_v13  ;;  %7746 = vmatprep.subr.bf16.mxu0 %v10414_v26  ;;  %v2118_v13 = vld [vmem:[#allocation8 + $0x18a8] sm:$0xff]  ;;  %v10445_v26 = vcombine.low %v2105_v11, %v2109_v12  ;;  %v2145_v11 = vld [vmem:[#allocation8 + $0x1980] sm:$0xff] }
 0x2b1   :  { %8074 = vmatprep.subr.bf16.mxu1 %v10416_v28  ;;  %v10447_v28 = vcombine.low %v2106_v62, %v2110_v15  ;;  %v10456_v57 = vcombine.high %v2114_v25, %v2118_v13  ;;  %v2149_v12 = vld [vmem:[#allocation8 + $0x19a0] sm:$0xff]  ;;  %v2150_v62 = vld [vmem:[#allocation8 + $0x19a8] sm:$0xff]  ;;  %v10477_v15 = vcombine.low %v2137_v59, %v2141_v63 }
 0x2b3   :  { %7747 = vmatpush1.bf16.msra.mxu0 %v10413_v35  ;;  %v2122_v35 = vld [vmem:[#allocation8 + $0x18c8] sm:$0xff] }
 0x2b4   :  { %8075 = vmatpush1.bf16.msra.mxu1 %v10415_v41  ;;  %7748 = vmatprep.subr.bf16.mxu0 %v10422_v42  ;;  %v2126_v41 = vld [vmem:[#allocation8 + $0x18e8] sm:$0xff]  ;;  %v10453_v42 = vcombine.low %v2113_v22, %v2117_v45  ;;  %v2153_v45 = vld [vmem:[#allocation8 + $0x19c0] sm:$0xff] }
 0x2b5   :  { %8076 = vmatprep.subr.bf16.mxu1 %v10424_v43  ;;  %v10455_v43 = vcombine.low %v2114_v25, %v2118_v13  ;;  %v10464_v48 = vcombine.high %v2122_v35, %v2126_v41  ;;  %v2154_v25 = vld [vmem:[#allocation8 + $0x19c8] sm:$0xff] }
 0x2b6   :  { %v2158_v13 = vld [vmem:[#allocation8 + $0x19e8] sm:$0xff] }
 0x2b7   :  { %7749 = vmatpush1.bf16.msra.mxu0 %v10421_v52  ;;  %v2130_v52 = vld [vmem:[#allocation8 + $0x1908] sm:$0xff] }
 0x2b8   :  { %8077 = vmatpush1.bf16.msra.mxu1 %v10423_v53  ;;  %7750 = vmatprep.subr.bf16.mxu0 %v10430_v54  ;;  %v2134_v53 = vld [vmem:[#allocation8 + $0x1928] sm:$0xff]  ;;  %v10461_v54 = vcombine.low %v2121_v30, %v2125_v32  ;;  %v2161_v30 = vld [vmem:[#allocation8 + $0x1a00] sm:$0xff] }
 0x2b9   :  { %8078 = vmatprep.subr.bf16.mxu1 %v10432_v9  ;;  %v10463_v9 = vcombine.low %v2122_v35, %v2126_v41  ;;  %v10472_v56 = vcombine.high %v2130_v52, %v2134_v53  ;;  %v2165_v32 = vld [vmem:[#allocation8 + $0x1a20] sm:$0xff]  ;;  %v2162_v35 = vld [vmem:[#allocation8 + $0x1a08] sm:$0xff] }
 0x2ba   :  { %v2166_v41 = vld [vmem:[#allocation8 + $0x1a28] sm:$0xff] }
 0x2bb   :  { %7751 = vmatpush1.bf16.msra.mxu0 %v10429_v18  ;;  %v2138_v18 = vld [vmem:[#allocation8 + $0x1948] sm:$0xff] }
 0x2bc   :  { %8079 = vmatpush1.bf16.msra.mxu1 %v10431_v5  ;;  %7761 = vmatprep.subr.bf16.mxu0 %v10438_v7  ;;  %v10469_v5 = vcombine.low %v2129_v49, %v2133_v50  ;;  %v10471_v7 = vcombine.low %v2130_v52, %v2134_v53  ;;  %v10480_v0 = vcombine.high %v2138_v18, %v2142_v3  ;;  %v2169_v49 = vld [vmem:[#allocation8 + $0x1a40] sm:$0xff]  ;;  %v2170_v52 = vld [vmem:[#allocation8 + $0x1a48] sm:$0xff] }
 0x2bd   :  { %8089 = vmatprep.subr.bf16.mxu1 %v10440_v44  ;;  %v10478_v44 = vcombine.high %v2137_v59, %v2141_v63  ;;  %v2173_v50 = vld [vmem:[#allocation8 + $0x1a60] sm:$0xff]  ;;  %v2174_v53 = vld [vmem:[#allocation8 + $0x1a68] sm:$0xff] }
 0x2be   :  { %7753 = vmatmul.mubr.bf16.vlgmr.msra.gmra.mrb[16].mxu0 %v11539_v20  ;;  %v2177_v59 = vld [vmem:[#allocation8 + $0x1a80] sm:$0xff] }
 0x2bf   :  { %8081 = vmatmul.mubr.bf16.vlgmr.msra.gmra.mrb[16].mxu1 %v11539_v20  ;;  %7762 = vmatpush1.bf16.msra.mxu0 %v10437_v39  ;;  %v2146_v39 = vld [vmem:[#allocation8 + $0x1988] sm:$0xff]  ;;  %v2181_v63 = vld [vmem:[#allocation8 + $0x1aa0] sm:$0xff] }
 0x2c0   :  { %7793 = vmatprep.mubr.bf16.mxu0 %v11541_v24  ;;  %8090 = vmatpush1.bf16.msra.mxu1 %v10439_v21  ;;  %v10479_v21 = vcombine.low %v2138_v18, %v2142_v3  ;;  %v10488_v22 = vcombine.high %v2146_v39, %v2150_v62  ;;  %v2178_v18 = vld [vmem:[#allocation8 + $0x1a88] sm:$0xff] }
 0x2c1   :  { %8121 = vmatprep.mubr.bf16.mxu1 %v11541_v24  ;;  %7763 = vmatprep.subr.bf16.mxu0 %v10446_v37  ;;  %v10486_v37 = vcombine.high %v2145_v11, %v2149_v12  ;;  %v2182_v3 = vld [vmem:[#allocation8 + $0x1aa8] sm:$0xff] }
 0x2c2   :  { %8091 = vmatprep.subr.bf16.mxu1 %v10448_v4  ;;  %v2157_v4 = vld [vmem:[#allocation8 + $0x19e0] sm:$0xff] }
 0x2c3   :  { %7764 = vmatpush1.bf16.msra.mxu0 %v10445_v26  ;;  %v10485_v26 = vcombine.low %v2145_v11, %v2149_v12  ;;  %v2185_v11 = vld [vmem:[#allocation8 + $0x1ac0] sm:$0xff] }
 0x2c4   :  { %8092 = vmatpush1.bf16.msra.mxu1 %v10447_v28  ;;  %7765 = vmatprep.subr.bf16.mxu0 %v10454_v29  ;;  %v10487_v28 = vcombine.low %v2146_v39, %v2150_v62  ;;  %v10494_v29 = vcombine.high %v2153_v45, %v2157_v4  ;;  %v2189_v12 = vld [vmem:[#allocation8 + $0x1ae0] sm:$0xff]  ;;  %v2186_v39 = vld [vmem:[#allocation8 + $0x1ac8] sm:$0xff] }
 0x2c5   :  { %8093 = vmatprep.subr.bf16.mxu1 %v10456_v57  ;;  %v10496_v57 = vcombine.high %v2154_v25, %v2158_v13  ;;  %v2190_v62 = vld [vmem:[#allocation8 + $0x1ae8] sm:$0xff] }
 0x2c7   :  { %7766 = vmatpush1.bf16.msra.mxu0 %v10453_v42  ;;  %v10493_v42 = vcombine.low %v2153_v45, %v2157_v4  ;;  %v2193_v45 = vld [vmem:[#allocation8 + $0x1b00] sm:$0xff] }
 0x2c8   :  { %8094 = vmatpush1.bf16.msra.mxu1 %v10455_v43  ;;  %7767 = vmatprep.subr.bf16.mxu0 %v10462_v10  ;;  %v10495_v43 = vcombine.low %v2154_v25, %v2158_v13  ;;  %v10502_v10 = vcombine.high %v2161_v30, %v2165_v32  ;;  %v2197_v4 = vld [vmem:[#allocation8 + $0x1b20] sm:$0xff]  ;;  %v2194_v25 = vld [vmem:[#allocation8 + $0x1b08] sm:$0xff] }
 0x2c9   :  { %8095 = vmatprep.subr.bf16.mxu1 %v10464_v48  ;;  %v10504_v48 = vcombine.high %v2162_v35, %v2166_v41  ;;  %v2198_v13 = vld [vmem:[#allocation8 + $0x1b28] sm:$0xff] }
 0x2cb   :  { %7768 = vmatpush1.bf16.msra.mxu0 %v10461_v54  ;;  %v10501_v54 = vcombine.low %v2161_v30, %v2165_v32  ;;  %v2201_v30 = vld [vmem:[#allocation8 + $0x1b40] sm:$0xff] }
 0x2cc   :  { %8096 = vmatpush1.bf16.msra.mxu1 %v10463_v9  ;;  %7769 = vmatprep.subr.bf16.mxu0 %v10470_v55  ;;  %v10503_v9 = vcombine.low %v2162_v35, %v2166_v41  ;;  %v10510_v55 = vcombine.high %v2169_v49, %v2173_v50  ;;  %v2205_v32 = vld [vmem:[#allocation8 + $0x1b60] sm:$0xff]  ;;  %v2202_v35 = vld [vmem:[#allocation8 + $0x1b48] sm:$0xff] }
 0x2cd   :  { %8097 = vmatprep.subr.bf16.mxu1 %v10472_v56  ;;  %v10512_v56 = vcombine.high %v2170_v52, %v2174_v53  ;;  %v2206_v41 = vld [vmem:[#allocation8 + $0x1b68] sm:$0xff] }
 0x2cf   :  { %7770 = vmatpush1.bf16.msra.mxu0 %v10469_v5  ;;  %v10509_v5 = vcombine.low %v2169_v49, %v2173_v50  ;;  %v2209_v49 = vld [vmem:[#allocation8 + $0x1b80] sm:$0xff] }
 0x2d0   :  { %8098 = vmatpush1.bf16.msra.mxu1 %v10471_v7  ;;  %7771 = vmatprep.subr.bf16.mxu0 %v10478_v44  ;;  %v10511_v7 = vcombine.low %v2170_v52, %v2174_v53  ;;  %v10518_v44 = vcombine.high %v2177_v59, %v2181_v63  ;;  %v2213_v50 = vld [vmem:[#allocation8 + $0x1ba0] sm:$0xff]  ;;  %v2210_v52 = vld [vmem:[#allocation8 + $0x1b88] sm:$0xff] }
 0x2d1   :  { %8099 = vmatprep.subr.bf16.mxu1 %v10480_v0  ;;  %v10520_v0 = vcombine.high %v2178_v18, %v2182_v3  ;;  %v2214_v53 = vld [vmem:[#allocation8 + $0x1ba8] sm:$0xff] }
 0x2d3   :  { %7772 = vmatpush1.bf16.msra.mxu0 %v10477_v15  ;;  %v10517_v15 = vcombine.low %v2177_v59, %v2181_v63  ;;  %v2217_v59 = vld [vmem:[#allocation8 + $0x1bc0] sm:$0xff] }
 0x2d4   :  { %8100 = vmatpush1.bf16.msra.mxu1 %v10479_v21  ;;  %7773 = vmatprep.subr.bf16.mxu0 %v10486_v37  ;;  %v10519_v21 = vcombine.low %v2178_v18, %v2182_v3  ;;  %v10526_v37 = vcombine.high %v2185_v11, %v2189_v12  ;;  %v2221_v63 = vld [vmem:[#allocation8 + $0x1be0] sm:$0xff]  ;;  %v2218_v18 = vld [vmem:[#allocation8 + $0x1bc8] sm:$0xff] }
 0x2d5   :  { %8101 = vmatprep.subr.bf16.mxu1 %v10488_v22  ;;  %v10528_v22 = vcombine.high %v2186_v39, %v2190_v62  ;;  %v2222_v3 = vld [vmem:[#allocation8 + $0x1be8] sm:$0xff] }
 0x2d7   :  { %7774 = vmatpush1.bf16.msra.mxu0 %v10485_v26  ;;  %v10525_v26 = vcombine.low %v2185_v11, %v2189_v12  ;;  %v2225_v11 = vld [vmem:[#allocation8 + $0x1c00] sm:$0xff] }
 0x2d8   :  { %8102 = vmatpush1.bf16.msra.mxu1 %v10487_v28  ;;  %7775 = vmatprep.subr.bf16.mxu0 %v10494_v29  ;;  %v10527_v28 = vcombine.low %v2186_v39, %v2190_v62  ;;  %v10534_v29 = vcombine.high %v2193_v45, %v2197_v4  ;;  %v2229_v12 = vld [vmem:[#allocation8 + $0x1c20] sm:$0xff]  ;;  %v2226_v39 = vld [vmem:[#allocation8 + $0x1c08] sm:$0xff] }
 0x2d9   :  { %8103 = vmatprep.subr.bf16.mxu1 %v10496_v57  ;;  %v10536_v57 = vcombine.high %v2194_v25, %v2198_v13  ;;  %v2230_v62 = vld [vmem:[#allocation8 + $0x1c28] sm:$0xff] }
 0x2db   :  { %7776 = vmatpush1.bf16.msra.mxu0 %v10493_v42  ;;  %v10533_v42 = vcombine.low %v2193_v45, %v2197_v4  ;;  %v10568_v45 = vcombine.high %v2226_v39, %v2230_v62  ;;  %v1312_v4 = vmax.f32 %v11497_v34, 0.0 }
 0x2dc   :  { %8104 = vmatpush1.bf16.msra.mxu1 %v10495_v43  ;;  %7777 = vmatprep.subr.bf16.mxu0 %v10502_v10  ;;  %v10535_v43 = vcombine.low %v2194_v25, %v2198_v13  ;;  %v10542_v10 = vcombine.high %v2201_v30, %v2205_v32  ;;  %v2233_v25 = vld [vmem:[#allocation8 + $0x1c40] sm:$0xff] }
 0x2dd   :  { %8105 = vmatprep.subr.bf16.mxu1 %v10504_v48  ;;  %v10544_v48 = vcombine.high %v2202_v35, %v2206_v41  ;;  %v2237_v13 = vld [vmem:[#allocation8 + $0x1c60] sm:$0xff] }
 0x2df   :  { %7778 = vmatpush1.bf16.msra.mxu0 %v10501_v54  ;;  %v10541_v54 = vcombine.low %v2201_v30, %v2205_v32  ;;  %v10567_v30 = vcombine.low %v2226_v39, %v2230_v62  ;;  %v2241_v32 = vld [vmem:[#allocation8 + $0x1c80] sm:$0xff] }
 0x2e0   :  { %8106 = vmatpush1.bf16.msra.mxu1 %v10503_v9  ;;  %7779 = vmatprep.subr.bf16.mxu0 %v10510_v55  ;;  %v10543_v9 = vcombine.low %v2202_v35, %v2206_v41  ;;  %v10550_v55 = vcombine.high %v2209_v49, %v2213_v50  ;;  %v2245_v35 = vld [vmem:[#allocation8 + $0x1ca0] sm:$0xff]  ;;  %v11551_v41 = vpack.c.bf16 %v1312_v4, %v1312_v4 }
 0x2e1   :  { %8107 = vmatprep.subr.bf16.mxu1 %v10512_v56  ;;  %v10552_v56 = vcombine.high %v2210_v52, %v2214_v53  ;;  %v2265_v39 = vld [vmem:[#allocation8 + $0x1d40] sm:$0xff] }
 0x2e2   :  { %v2269_v62 = vld [vmem:[#allocation8 + $0x1d60] sm:$0xff] }
 0x2e3   :  { %7780 = vmatpush1.bf16.msra.mxu0 %v10509_v5  ;;  %v10549_v5 = vcombine.low %v2209_v49, %v2213_v50  ;;  %v10582_v49 = vcombine.high %v2241_v32, %v2245_v35 }
 0x2e4   :  { %8108 = vmatpush1.bf16.msra.mxu1 %v10511_v7  ;;  %7781 = vmatprep.subr.bf16.mxu0 %v10518_v44  ;;  %v10551_v7 = vcombine.low %v2210_v52, %v2214_v53  ;;  %v10558_v44 = vcombine.high %v2217_v59, %v2221_v63  ;;  %v2249_v52 = vld [vmem:[#allocation8 + $0x1cc0] sm:$0xff] }
 0x2e5   :  { %8109 = vmatprep.subr.bf16.mxu1 %v10520_v0  ;;  %v10560_v0 = vcombine.high %v2218_v18, %v2222_v3  ;;  %v2253_v53 = vld [vmem:[#allocation8 + $0x1ce0] sm:$0xff] }
 0x2e7   :  { %7782 = vmatpush1.bf16.msra.mxu0 %v10517_v15  ;;  %v10557_v15 = vcombine.low %v2217_v59, %v2221_v63  ;;  %v10590_v59 = vcombine.high %v2249_v52, %v2253_v53 }
 0x2e8   :  { %8110 = vmatpush1.bf16.msra.mxu1 %v10519_v21  ;;  %7783 = vmatprep.subr.bf16.mxu0 %v10526_v37  ;;  %v1309_v21 = vmax.f32 %v11484_v61, 0.0  ;;  %v10559_v37 = vcombine.low %v2218_v18, %v2222_v3  ;;  %v10574_v61 = vcombine.high %v2233_v25, %v2237_v13  ;;  %v2257_v18 = vld [vmem:[#allocation8 + $0x1d00] sm:$0xff] }
 0x2e9   :  { %8111 = vmatprep.subr.bf16.mxu1 %v10528_v22  ;;  %v10566_v22 = vcombine.high %v2225_v11, %v2229_v12  ;;  %v2261_v3 = vld [vmem:[#allocation8 + $0x1d20] sm:$0xff] }
 0x2eb   :  { %7784 = vmatpush1.bf16.msra.mxu0 %v10525_v26  ;;  %v10565_v26 = vcombine.low %v2225_v11, %v2229_v12  ;;  %v10598_v11 = vcombine.high %v2257_v18, %v2261_v3 }
 0x2ec   :  { %8112 = vmatpush1.bf16.msra.mxu1 %v10527_v28  ;;  %7785 = vmatprep.subr.bf16.mxu0 %v10534_v29  ;;  %v2234_v28 = vld [vmem:[#allocation8 + $0x1c48] sm:$0xff] }
 0x2ed   :  { %8113 = vmatprep.subr.bf16.mxu1 %v10536_v57  ;;  %v2238_v29 = vld [vmem:[#allocation8 + $0x1c68] sm:$0xff]  ;;  %v11549_v57 = vpack.c.bf16 %v1309_v21, %v1309_v21 }
 0x2ee   :  { %v10576_v34 = vcombine.high %v2234_v28, %v2238_v29  ;;  %v2270_v21 = vld [vmem:[#allocation8 + $0x1d68] sm:$0xff] }
 0x2ef   :  { %7786 = vmatpush1.bf16.msra.mxu0 %v10533_v42  ;;  %v2242_v42 = vld [vmem:[#allocation8 + $0x1c88] sm:$0xff] }
 0x2f0   :  { %8114 = vmatpush1.bf16.msra.mxu1 %v10535_v43  ;;  %7787 = vmatprep.subr.bf16.mxu0 %v10542_v10  ;;  %v2246_v43 = vld [vmem:[#allocation8 + $0x1ca8] sm:$0xff]  ;;  %v10573_v10 = vcombine.low %v2233_v25, %v2237_v13  ;;  %v2273_v25 = vld [vmem:[#allocation8 + $0x1d80] sm:$0xff] }
 0x2f1   :  { %8115 = vmatprep.subr.bf16.mxu1 %v10544_v48  ;;  %v10575_v48 = vcombine.low %v2234_v28, %v2238_v29  ;;  %v10584_v50 = vcombine.high %v2242_v42, %v2246_v43  ;;  %v2277_v13 = vld [vmem:[#allocation8 + $0x1da0] sm:$0xff]  ;;  %v2278_v28 = vld [vmem:[#allocation8 + $0x1da8] sm:$0xff]  ;;  %v10605_v29 = vcombine.low %v2265_v39, %v2269_v62 }
 0x2f3   :  { %7788 = vmatpush1.bf16.msra.mxu0 %v10541_v54  ;;  %v2250_v54 = vld [vmem:[#allocation8 + $0x1cc8] sm:$0xff] }
 0x2f4   :  { %8116 = vmatpush1.bf16.msra.mxu1 %v10543_v9  ;;  %7789 = vmatprep.subr.bf16.mxu0 %v10550_v55  ;;  %v2254_v9 = vld [vmem:[#allocation8 + $0x1ce8] sm:$0xff]  ;;  %v10581_v55 = vcombine.low %v2241_v32, %v2245_v35  ;;  %v2281_v35 = vld [vmem:[#allocation8 + $0x1dc0] sm:$0xff] }
 0x2f5   :  { %8117 = vmatprep.subr.bf16.mxu1 %v10552_v56  ;;  %v10583_v56 = vcombine.low %v2242_v42, %v2246_v43  ;;  %v10592_v63 = vcombine.high %v2250_v54, %v2254_v9  ;;  %v2282_v42 = vld [vmem:[#allocation8 + $0x1dc8] sm:$0xff] }
 0x2f6   :  { %v2286_v43 = vld [vmem:[#allocation8 + $0x1de8] sm:$0xff] }
 0x2f7   :  { %7790 = vmatpush1.bf16.msra.mxu0 %v10549_v5  ;;  %v2258_v5 = vld [vmem:[#allocation8 + $0x1d08] sm:$0xff] }
 0x2f8   :  { %8118 = vmatpush1.bf16.msra.mxu1 %v10551_v7  ;;  %7791 = vmatprep.subr.bf16.mxu0 %v10558_v44  ;;  %v2262_v7 = vld [vmem:[#allocation8 + $0x1d28] sm:$0xff]  ;;  %v10589_v44 = vcombine.low %v2249_v52, %v2253_v53  ;;  %v2289_v52 = vld [vmem:[#allocation8 + $0x1e00] sm:$0xff] }
 0x2f9   :  { %8119 = vmatprep.subr.bf16.mxu1 %v10560_v0  ;;  %v10591_v0 = vcombine.low %v2250_v54, %v2254_v9  ;;  %v10600_v12 = vcombine.high %v2258_v5, %v2262_v7  ;;  %v2293_v53 = vld [vmem:[#allocation8 + $0x1e20] sm:$0xff]  ;;  %v2290_v54 = vld [vmem:[#allocation8 + $0x1e08] sm:$0xff] }
 0x2fa   :  { %v2294_v9 = vld [vmem:[#allocation8 + $0x1e28] sm:$0xff] }
 0x2fb   :  { %7792 = vmatpush1.bf16.msra.mxu0 %v10557_v15  ;;  %v2266_v15 = vld [vmem:[#allocation8 + $0x1d48] sm:$0xff] }
 0x2fc   :  { %8120 = vmatpush1.bf16.msra.mxu1 %v10559_v37  ;;  %7802 = vmatprep.subr.bf16.mxu0 %v10566_v22  ;;  %v10597_v37 = vcombine.low %v2257_v18, %v2261_v3  ;;  %v10599_v22 = vcombine.low %v2258_v5, %v2262_v7  ;;  %v10608_v4 = vcombine.high %v2266_v15, %v2270_v21  ;;  %v2297_v18 = vld [vmem:[#allocation8 + $0x1e40] sm:$0xff]  ;;  %v2298_v5 = vld [vmem:[#allocation8 + $0x1e48] sm:$0xff] }
 0x2fd   :  { %8130 = vmatprep.subr.bf16.mxu1 %v10568_v45  ;;  %v10606_v45 = vcombine.high %v2265_v39, %v2269_v62  ;;  %v2301_v3 = vld [vmem:[#allocation8 + $0x1e60] sm:$0xff]  ;;  %v2302_v7 = vld [vmem:[#allocation8 + $0x1e68] sm:$0xff] }
 0x2fe   :  { %7794 = vmatmul.mubr.bf16.vlgmr.msra.gmra.mrb[16].mxu0 %v11549_v57  ;;  %v2305_v39 = vld [vmem:[#allocation8 + $0x1e80] sm:$0xff] }
 0x2ff   :  { %8122 = vmatmul.mubr.bf16.vlgmr.msra.gmra.mrb[16].mxu1 %v11549_v57  ;;  %7803 = vmatpush1.bf16.msra.mxu0 %v10565_v26  ;;  %v2274_v26 = vld [vmem:[#allocation8 + $0x1d88] sm:$0xff]  ;;  %v2309_v62 = vld [vmem:[#allocation8 + $0x1ea0] sm:$0xff] }
 0x300   :  { %7834 = vmatprep.mubr.bf16.mxu0 %v11551_v41  ;;  %8131 = vmatpush1.bf16.msra.mxu1 %v10567_v30  ;;  %v10607_v30 = vcombine.low %v2266_v15, %v2270_v21  ;;  %v10616_v32 = vcombine.high %v2274_v26, %v2278_v28  ;;  %v2306_v15 = vld [vmem:[#allocation8 + $0x1e88] sm:$0xff] }
 0x301   :  { %8162 = vmatprep.mubr.bf16.mxu1 %v11551_v41  ;;  %7804 = vmatprep.subr.bf16.mxu0 %v10574_v61  ;;  %v10614_v61 = vcombine.high %v2273_v25, %v2277_v13  ;;  %v2310_v21 = vld [vmem:[#allocation8 + $0x1ea8] sm:$0xff] }
 0x302   :  { %8132 = vmatprep.subr.bf16.mxu1 %v10576_v34  ;;  %v2285_v34 = vld [vmem:[#allocation8 + $0x1de0] sm:$0xff] }
 0x303   :  { %7805 = vmatpush1.bf16.msra.mxu0 %v10573_v10  ;;  %v10613_v10 = vcombine.low %v2273_v25, %v2277_v13  ;;  %v2313_v25 = vld [vmem:[#allocation8 + $0x1ec0] sm:$0xff] }
 0x304   :  { %8133 = vmatpush1.bf16.msra.mxu1 %v10575_v48  ;;  %7806 = vmatprep.subr.bf16.mxu0 %v10582_v49  ;;  %v10615_v48 = vcombine.low %v2274_v26, %v2278_v28  ;;  %v10622_v49 = vcombine.high %v2281_v35, %v2285_v34  ;;  %v2317_v13 = vld [vmem:[#allocation8 + $0x1ee0] sm:$0xff]  ;;  %v2314_v26 = vld [vmem:[#allocation8 + $0x1ec8] sm:$0xff] }
 0x305   :  { %8134 = vmatprep.subr.bf16.mxu1 %v10584_v50  ;;  %v10624_v50 = vcombine.high %v2282_v42, %v2286_v43  ;;  %v2318_v28 = vld [vmem:[#allocation8 + $0x1ee8] sm:$0xff] }
 0x307   :  { %7807 = vmatpush1.bf16.msra.mxu0 %v10581_v55  ;;  %v10621_v55 = vcombine.low %v2281_v35, %v2285_v34  ;;  %v2321_v35 = vld [vmem:[#allocation8 + $0x1f00] sm:$0xff] }
 0x308   :  { %8135 = vmatpush1.bf16.msra.mxu1 %v10583_v56  ;;  %7808 = vmatprep.subr.bf16.mxu0 %v10590_v59  ;;  %v10623_v56 = vcombine.low %v2282_v42, %v2286_v43  ;;  %v10630_v59 = vcombine.high %v2289_v52, %v2293_v53  ;;  %v2325_v34 = vld [vmem:[#allocation8 + $0x1f20] sm:$0xff]  ;;  %v2322_v42 = vld [vmem:[#allocation8 + $0x1f08] sm:$0xff] }
 0x309   :  { %8136 = vmatprep.subr.bf16.mxu1 %v10592_v63  ;;  %v10632_v63 = vcombine.high %v2290_v54, %v2294_v9  ;;  %v2326_v43 = vld [vmem:[#allocation8 + $0x1f28] sm:$0xff] }
 0x30b   :  { %7809 = vmatpush1.bf16.msra.mxu0 %v10589_v44  ;;  %v10629_v44 = vcombine.low %v2289_v52, %v2293_v53  ;;  %v2329_v52 = vld [vmem:[#allocation8 + $0x1f40] sm:$0xff] }
 0x30c   :  { %8137 = vmatpush1.bf16.msra.mxu1 %v10591_v0  ;;  %7810 = vmatprep.subr.bf16.mxu0 %v10598_v11  ;;  %v10631_v0 = vcombine.low %v2290_v54, %v2294_v9  ;;  %v10638_v11 = vcombine.high %v2297_v18, %v2301_v3  ;;  %v2333_v53 = vld [vmem:[#allocation8 + $0x1f60] sm:$0xff]  ;;  %v2330_v54 = vld [vmem:[#allocation8 + $0x1f48] sm:$0xff] }
 0x30d   :  { %8138 = vmatprep.subr.bf16.mxu1 %v10600_v12  ;;  %v10640_v12 = vcombine.high %v2298_v5, %v2302_v7  ;;  %v2334_v9 = vld [vmem:[#allocation8 + $0x1f68] sm:$0xff] }
 0x30f   :  { %7811 = vmatpush1.bf16.msra.mxu0 %v10597_v37  ;;  %v10637_v37 = vcombine.low %v2297_v18, %v2301_v3  ;;  %v2337_v18 = vld [vmem:[#allocation8 + $0x1f80] sm:$0xff] }
 0x310   :  { %8139 = vmatpush1.bf16.msra.mxu1 %v10599_v22  ;;  %7812 = vmatprep.subr.bf16.mxu0 %v10606_v45  ;;  %v10639_v22 = vcombine.low %v2298_v5, %v2302_v7  ;;  %v10646_v45 = vcombine.high %v2305_v39, %v2309_v62  ;;  %v2341_v3 = vld [vmem:[#allocation8 + $0x1fa0] sm:$0xff]  ;;  %v2338_v5 = vld [vmem:[#allocation8 + $0x1f88] sm:$0xff] }
 0x311   :  { %8140 = vmatprep.subr.bf16.mxu1 %v10608_v4  ;;  %v10648_v4 = vcombine.high %v2306_v15, %v2310_v21  ;;  %v2342_v7 = vld [vmem:[#allocation8 + $0x1fa8] sm:$0xff] }
 0x313   :  { %7813 = vmatpush1.bf16.msra.mxu0 %v10605_v29  ;;  %v10645_v29 = vcombine.low %v2305_v39, %v2309_v62  ;;  %v2345_v39 = vld [vmem:[#allocation8 + $0x1fc0] sm:$0xff] }
 0x314   :  { %8141 = vmatpush1.bf16.msra.mxu1 %v10607_v30  ;;  %7814 = vmatprep.subr.bf16.mxu0 %v10614_v61  ;;  %v10647_v30 = vcombine.low %v2306_v15, %v2310_v21  ;;  %v10654_v61 = vcombine.high %v2313_v25, %v2317_v13  ;;  %v2349_v62 = vld [vmem:[#allocation8 + $0x1fe0] sm:$0xff]  ;;  %v2346_v15 = vld [vmem:[#allocation8 + $0x1fc8] sm:$0xff] }
 0x315   :  { %8142 = vmatprep.subr.bf16.mxu1 %v10616_v32  ;;  %v10656_v32 = vcombine.high %v2314_v26, %v2318_v28  ;;  %v2350_v21 = vld [vmem:[#allocation8 + $0x1fe8] sm:$0xff] }
 0x317   :  { %7815 = vmatpush1.bf16.msra.mxu0 %v10613_v10  ;;  %v10653_v10 = vcombine.low %v2313_v25, %v2317_v13  ;;  %v1331_v25 = vld [vmem:[#allocation8 + $0x10] sm:$0xff] }
 0x318   :  { %8143 = vmatpush1.bf16.msra.mxu1 %v10615_v48  ;;  %7816 = vmatprep.subr.bf16.mxu0 %v10622_v49  ;;  %v10655_v48 = vcombine.low %v2314_v26, %v2318_v28  ;;  %v10662_v49 = vcombine.high %v2321_v35, %v2325_v34  ;;  %v1335_v13 = vld [vmem:[#allocation8 + $0x30] sm:$0xff]  ;;  %v1332_v26 = vld [vmem:[#allocation8 + $0x18] sm:$0xff] }
 0x319   :  { %8144 = vmatprep.subr.bf16.mxu1 %v10624_v50  ;;  %v10664_v50 = vcombine.high %v2322_v42, %v2326_v43  ;;  %v1336_v28 = vld [vmem:[#allocation8 + $0x38] sm:$0xff] }
 0x31b   :  { %7817 = vmatpush1.bf16.msra.mxu0 %v10621_v55  ;;  %v10661_v55 = vcombine.low %v2321_v35, %v2325_v34  ;;  %v9676_v35 = vcombine.high %v1332_v26, %v1336_v28  ;;  %v1339_v34 = vld [vmem:[#allocation8 + $0x50] sm:$0xff] }
 0x31c   :  { %8145 = vmatpush1.bf16.msra.mxu1 %v10623_v56  ;;  %7818 = vmatprep.subr.bf16.mxu0 %v10630_v59  ;;  %v10663_v56 = vcombine.low %v2322_v42, %v2326_v43  ;;  %v10670_v59 = vcombine.high %v2329_v52, %v2333_v53  ;;  %v1343_v42 = vld [vmem:[#allocation8 + $0x70] sm:$0xff]  ;;  %v9673_v43 = vcombine.low %v1331_v25, %v1335_v13 }
 0x31d   :  { %8146 = vmatprep.subr.bf16.mxu1 %v10632_v63  ;;  %v10672_v63 = vcombine.high %v2330_v54, %v2334_v9 }
 0x31f   :  { %7819 = vmatpush1.bf16.msra.mxu0 %v10629_v44  ;;  %v10669_v44 = vcombine.low %v2329_v52, %v2333_v53  ;;  %v9682_v52 = vcombine.high %v1339_v34, %v1343_v42  ;;  %v1351_v53 = vld [vmem:[#allocation8 + $0xb0] sm:$0xff] }
 0x320   :  { %8147 = vmatpush1.bf16.msra.mxu1 %v10631_v0  ;;  %7820 = vmatprep.subr.bf16.mxu0 %v10638_v11  ;;  %v10671_v0 = vcombine.low %v2330_v54, %v2334_v9  ;;  %v10678_v11 = vcombine.high %v2337_v18, %v2341_v3  ;;  %v1348_v9 = vld [vmem:[#allocation8 + $0x98] sm:$0xff] }
 0x321   :  { %8148 = vmatprep.subr.bf16.mxu1 %v10640_v12  ;;  %v10680_v12 = vcombine.high %v2338_v5, %v2342_v7 }
 0x323   :  { %7821 = vmatpush1.bf16.msra.mxu0 %v10637_v37  ;;  %v10677_v37 = vcombine.low %v2337_v18, %v2341_v3  ;;  %v1355_v3 = vld [vmem:[#allocation8 + $0xd0] sm:$0xff] }
 0x324   :  { %8149 = vmatpush1.bf16.msra.mxu1 %v10639_v22  ;;  %7822 = vmatprep.subr.bf16.mxu0 %v10646_v45  ;;  %v10679_v22 = vcombine.low %v2338_v5, %v2342_v7  ;;  %v10686_v45 = vcombine.high %v2345_v39, %v2349_v62  ;;  %v1359_v5 = vld [vmem:[#allocation8 + $0xf0] sm:$0xff]  ;;  %v1356_v7 = vld [vmem:[#allocation8 + $0xd8] sm:$0xff] }
 0x325   :  { %8150 = vmatprep.subr.bf16.mxu1 %v10648_v4  ;;  %v10688_v4 = vcombine.high %v2346_v15, %v2350_v21 }
 0x327   :  { %7823 = vmatpush1.bf16.msra.mxu0 %v10645_v29  ;;  %v10685_v29 = vcombine.low %v2345_v39, %v2349_v62  ;;  %v1363_v62 = vld [vmem:[#allocation8 + $0x110] sm:$0xff] }
 0x328   :  { %8151 = vmatpush1.bf16.msra.mxu1 %v10647_v30  ;;  %7824 = vmatprep.subr.bf16.mxu0 %v10654_v61  ;;  %v1311_v30 = vmax.f32 %v11495_v27, 0.0  ;;  %v10687_v61 = vcombine.low %v2346_v15, %v2350_v21  ;;  %v1347_v27 = vld [vmem:[#allocation8 + $0x90] sm:$0xff]  ;;  %v1364_v21 = vld [vmem:[#allocation8 + $0x118] sm:$0xff] }
 0x329   :  { %8152 = vmatprep.subr.bf16.mxu1 %v10656_v32  ;;  %v9674_v32 = vcombine.high %v1331_v25, %v1335_v13  ;;  %v1367_v15 = vld [vmem:[#allocation8 + $0x130] sm:$0xff] }
 0x32a   :  { %v1371_v25 = vld [vmem:[#allocation8 + $0x150] sm:$0xff] }
 0x32b   :  { %7825 = vmatpush1.bf16.msra.mxu0 %v10653_v10  ;;  %v1340_v10 = vld [vmem:[#allocation8 + $0x58] sm:$0xff]  ;;  %v1375_v13 = vld [vmem:[#allocation8 + $0x170] sm:$0xff] }
 0x32c   :  { %8153 = vmatpush1.bf16.msra.mxu1 %v10655_v48  ;;  %7826 = vmatprep.subr.bf16.mxu0 %v10662_v49  ;;  %v1344_v48 = vld [vmem:[#allocation8 + $0x78] sm:$0xff]  ;;  %v11558_v49 = vpack.c.bf16 %v1311_v30, %v1311_v30 }
 0x32d   :  { %8154 = vmatprep.subr.bf16.mxu1 %v10664_v50  ;;  %v9675_v50 = vcombine.low %v1332_v26, %v1336_v28  ;;  %v9684_v54 = vcombine.high %v1340_v10, %v1344_v48  ;;  %v1372_v26 = vld [vmem:[#allocation8 + $0x158] sm:$0xff] }
 0x32e   :  { %v1376_v28 = vld [vmem:[#allocation8 + $0x178] sm:$0xff] }
 0x32f   :  { %7827 = vmatpush1.bf16.msra.mxu0 %v10661_v55  ;;  %v1352_v55 = vld [vmem:[#allocation8 + $0xb8] sm:$0xff] }
 0x330   :  { %8155 = vmatpush1.bf16.msra.mxu1 %v10663_v56  ;;  %7828 = vmatprep.subr.bf16.mxu0 %v10670_v59  ;;  %v9681_v56 = vcombine.low %v1339_v34, %v1343_v42  ;;  %v9683_v59 = vcombine.low %v1340_v10, %v1344_v48  ;;  %v9692_v18 = vcombine.high %v1348_v9, %v1352_v55  ;;  %v1383_v34 = vld [vmem:[#allocation8 + $0x1b0] sm:$0xff]  ;;  %v1380_v42 = vld [vmem:[#allocation8 + $0x198] sm:$0xff] }
 0x331   :  { %8156 = vmatprep.subr.bf16.mxu1 %v10672_v63  ;;  %v9690_v63 = vcombine.high %v1347_v27, %v1351_v53  ;;  %v9713_v10 = vcombine.low %v1371_v25, %v1375_v13  ;;  %v9715_v48 = vcombine.low %v1372_v26, %v1376_v28 }
 0x333   :  { %7829 = vmatpush1.bf16.msra.mxu0 %v10669_v44  ;;  %v1360_v44 = vld [vmem:[#allocation8 + $0xf8] sm:$0xff] }
 0x334   :  { %8157 = vmatpush1.bf16.msra.mxu1 %v10671_v0  ;;  %7830 = vmatprep.subr.bf16.mxu0 %v10678_v11  ;;  %v9689_v0 = vcombine.low %v1347_v27, %v1351_v53  ;;  %v9691_v11 = vcombine.low %v1348_v9, %v1352_v55  ;;  %v9700_v39 = vcombine.high %v1356_v7, %v1360_v44  ;;  %v1387_v27 = vld [vmem:[#allocation8 + $0x1d0] sm:$0xff]  ;;  %v1392_v9 = vld [vmem:[#allocation8 + $0x1f8] sm:$0xff] }
 0x335   :  { %8158 = vmatprep.subr.bf16.mxu1 %v10680_v12  ;;  %v9698_v12 = vcombine.high %v1355_v3, %v1359_v5  ;;  %v1391_v53 = vld [vmem:[#allocation8 + $0x1f0] sm:$0xff] }
 0x337   :  { %7831 = vmatpush1.bf16.msra.mxu0 %v10677_v37  ;;  %v1368_v37 = vld [vmem:[#allocation8 + $0x138] sm:$0xff] }
 0x338   :  { %8159 = vmatpush1.bf16.msra.mxu1 %v10679_v22  ;;  %7832 = vmatprep.subr.bf16.mxu0 %v10686_v45  ;;  %v9699_v22 = vcombine.low %v1356_v7, %v1360_v44  ;;  %v9706_v45 = vcombine.high %v1363_v62, %v1367_v15  ;;  %v9707_v30 = vcombine.low %v1364_v21, %v1368_v37  ;;  %v1400_v7 = vld [vmem:[#allocation8 + $0x238] sm:$0xff] }
 0x339   :  { %8160 = vmatprep.subr.bf16.mxu1 %v10688_v4  ;;  %v9708_v4 = vcombine.high %v1364_v21, %v1368_v37  ;;  %v9729_v44 = vcombine.low %v1387_v27, %v1391_v53  ;;  %v1408_v21 = vld [vmem:[#allocation8 + $0x278] sm:$0xff] }
 0x33b   :  { %7833 = vmatpush1.bf16.msra.mxu0 %v10685_v29  ;;  %v9705_v29 = vcombine.low %v1363_v62, %v1367_v15  ;;  %v1407_v62 = vld [vmem:[#allocation8 + $0x270] sm:$0xff]  ;;  %v1404_v15 = vld [vmem:[#allocation8 + $0x258] sm:$0xff] }
 0x33c   :  { %8161 = vmatpush1.bf16.msra.mxu1 %v10687_v61  ;;  %8171 = vmatprep.subr.bf16.mxu0 %v9674_v32  ;;  %v9714_v61 = vcombine.high %v1371_v25, %v1375_v13  ;;  %v9716_v32 = vcombine.high %v1372_v26, %v1376_v28  ;;  %v1415_v25 = vld [vmem:[#allocation8 + $0x2b0] sm:$0xff]  ;;  %v1412_v13 = vld [vmem:[#allocation8 + $0x298] sm:$0xff] }
 0x33d   :  { %8499 = vmatprep.subr.bf16.mxu1 %v9676_v35  ;;  %v1379_v35 = vld [vmem:[#allocation8 + $0x190] sm:$0xff]  ;;  %v1416_v26 = vld [vmem:[#allocation8 + $0x2b8] sm:$0xff] }
 0x33e   :  { %7835 = vmatmul.mubr.bf16.vlgmr.msra.gmra.mrb[16].mxu0 %v11558_v49  ;;  %v9721_v55 = vcombine.low %v1379_v35, %v1383_v34 }
 0x33f   :  { %8163 = vmatmul.mubr.bf16.vlgmr.msra.gmra.mrb[16].mxu1 %v11558_v49  ;;  %8172 = vmatpush1.bf16.msra.mxu0 %v9673_v43  ;;  %v1384_v43 = vld [vmem:[#allocation8 + $0x1b8] sm:$0xff] }
 0x340   :  { %8203 = vmatprep.mubr.bf16.mxu0 %v11416_v36  ;;  %8500 = vmatpush1.bf16.msra.mxu1 %v9675_v50  ;;  %v9722_v50 = vcombine.high %v1379_v35, %v1383_v34  ;;  %v1423_v35 = vld [vmem:[#allocation8 + $0x2f0] sm:$0xff]  ;;  %v1420_v34 = vld [vmem:[#allocation8 + $0x2d8] sm:$0xff] }
 0x341   :  { %8531 = vmatprep.mubr.bf16.mxu1 %v11416_v36  ;;  %8173 = vmatprep.subr.bf16.mxu0 %v9682_v52  ;;  %v9697_v36 = vcombine.low %v1355_v3, %v1359_v5  ;;  %v9724_v52 = vcombine.high %v1380_v42, %v1384_v43  ;;  %v1399_v3 = vld [vmem:[#allocation8 + $0x230] sm:$0xff]  ;;  %v1396_v5 = vld [vmem:[#allocation8 + $0x218] sm:$0xff] }
 0x342   :  { %8501 = vmatprep.subr.bf16.mxu1 %v9684_v54  ;;  %v1388_v54 = vld [vmem:[#allocation8 + $0x1d8] sm:$0xff] }
 0x343   :  { %8174 = vmatpush1.bf16.msra.mxu0 %v9681_v56  ;;  %v9723_v56 = vcombine.low %v1380_v42, %v1384_v43  ;;  %v1424_v42 = vld [vmem:[#allocation8 + $0x2f8] sm:$0xff] }
 0x344   :  { %8502 = vmatpush1.bf16.msra.mxu1 %v9683_v59  ;;  %8175 = vmatprep.subr.bf16.mxu0 %v9690_v63  ;;  %v9730_v59 = vcombine.high %v1387_v27, %v1391_v53  ;;  %v9732_v63 = vcombine.high %v1388_v54, %v1392_v9  ;;  %v1431_v27 = vld [vmem:[#allocation8 + $0x330] sm:$0xff]  ;;  %v1428_v53 = vld [vmem:[#allocation8 + $0x318] sm:$0xff] }
 0x345   :  { %8503 = vmatprep.subr.bf16.mxu1 %v9692_v18  ;;  %v1395_v18 = vld [vmem:[#allocation8 + $0x210] sm:$0xff] }
 0x346   :  { %v9737_v37 = vcombine.low %v1395_v18, %v1399_v3 }
 0x347   :  { %8176 = vmatpush1.bf16.msra.mxu0 %v9689_v0  ;;  %v9731_v0 = vcombine.low %v1388_v54, %v1392_v9  ;;  %v1432_v54 = vld [vmem:[#allocation8 + $0x338] sm:$0xff] }
 0x348   :  { %8504 = vmatpush1.bf16.msra.mxu1 %v9691_v11  ;;  %8177 = vmatprep.subr.bf16.mxu0 %v9698_v12  ;;  %v9738_v11 = vcombine.high %v1395_v18, %v1399_v3  ;;  %v9740_v12 = vcombine.high %v1396_v5, %v1400_v7  ;;  %v1439_v18 = vld [vmem:[#allocation8 + $0x370] sm:$0xff]  ;;  %v1436_v3 = vld [vmem:[#allocation8 + $0x358] sm:$0xff] }
 0x349   :  { %8505 = vmatprep.subr.bf16.mxu1 %v9700_v39  ;;  %v1403_v39 = vld [vmem:[#allocation8 + $0x250] sm:$0xff] }
 0x34a   :  { %v9745_v28 = vcombine.low %v1403_v39, %v1407_v62 }
 0x34b   :  { %8178 = vmatpush1.bf16.msra.mxu0 %v9697_v36  ;;  %v9739_v36 = vcombine.low %v1396_v5, %v1400_v7  ;;  %v1440_v5 = vld [vmem:[#allocation8 + $0x378] sm:$0xff] }
 0x34c   :  { %8506 = vmatpush1.bf16.msra.mxu1 %v9699_v22  ;;  %8179 = vmatprep.subr.bf16.mxu0 %v9706_v45  ;;  %v9746_v22 = vcombine.high %v1403_v39, %v1407_v62  ;;  %v9748_v45 = vcombine.high %v1404_v15, %v1408_v21  ;;  %v1447_v39 = vld [vmem:[#allocation8 + $0x3b0] sm:$0xff]  ;;  %v1444_v62 = vld [vmem:[#allocation8 + $0x398] sm:$0xff] }
 0x34d   :  { %8507 = vmatprep.subr.bf16.mxu1 %v9708_v4  ;;  %v1411_v4 = vld [vmem:[#allocation8 + $0x290] sm:$0xff] }
 0x34e   :  { %v9753_v43 = vcombine.low %v1411_v4, %v1415_v25 }
 0x34f   :  { %8180 = vmatpush1.bf16.msra.mxu0 %v9705_v29  ;;  %v9747_v29 = vcombine.low %v1404_v15, %v1408_v21  ;;  %v1448_v15 = vld [vmem:[#allocation8 + $0x3b8] sm:$0xff] }
 0x350   :  { %8508 = vmatpush1.bf16.msra.mxu1 %v9707_v30  ;;  %8181 = vmatprep.subr.bf16.mxu0 %v9714_v61  ;;  %v9754_v30 = vcombine.high %v1411_v4, %v1415_v25  ;;  %v9756_v61 = vcombine.high %v1412_v13, %v1416_v26  ;;  %v1455_v4 = vld [vmem:[#allocation8 + $0x3f0] sm:$0xff]  ;;  %v1452_v25 = vld [vmem:[#allocation8 + $0x3d8] sm:$0xff] }
 0x351   :  { %8509 = vmatprep.subr.bf16.mxu1 %v9716_v32  ;;  %v1419_v32 = vld [vmem:[#allocation8 + $0x2d0] sm:$0xff] }
 0x352   :  { %v9761_v9 = vcombine.low %v1419_v32, %v1423_v35 }
 0x353   :  { %8182 = vmatpush1.bf16.msra.mxu0 %v9713_v10  ;;  %v9755_v10 = vcombine.low %v1412_v13, %v1416_v26  ;;  %v1456_v13 = vld [vmem:[#allocation8 + $0x3f8] sm:$0xff] }
 0x354   :  { %8510 = vmatpush1.bf16.msra.mxu1 %v9715_v48  ;;  %8183 = vmatprep.subr.bf16.mxu0 %v9722_v50  ;;  %v9762_v48 = vcombine.high %v1419_v32, %v1423_v35  ;;  %v9764_v50 = vcombine.high %v1420_v34, %v1424_v42  ;;  %v1463_v32 = vld [vmem:[#allocation8 + $0x430] sm:$0xff]  ;;  %v1460_v35 = vld [vmem:[#allocation8 + $0x418] sm:$0xff] }
 0x355   :  { %8511 = vmatprep.subr.bf16.mxu1 %v9724_v52  ;;  %v1427_v52 = vld [vmem:[#allocation8 + $0x310] sm:$0xff] }
 0x356   :  { %v9769_v7 = vcombine.low %v1427_v52, %v1431_v27 }
 0x357   :  { %8184 = vmatpush1.bf16.msra.mxu0 %v9721_v55  ;;  %v9763_v55 = vcombine.low %v1420_v34, %v1424_v42  ;;  %v1464_v34 = vld [vmem:[#allocation8 + $0x438] sm:$0xff] }
 0x358   :  { %8512 = vmatpush1.bf16.msra.mxu1 %v9723_v56  ;;  %8185 = vmatprep.subr.bf16.mxu0 %v9730_v59  ;;  %v9770_v56 = vcombine.high %v1427_v52, %v1431_v27  ;;  %v9772_v59 = vcombine.high %v1428_v53, %v1432_v54  ;;  %v1471_v52 = vld [vmem:[#allocation8 + $0x470] sm:$0xff] }
 0x359   :  { %8513 = vmatprep.subr.bf16.mxu1 %v9732_v63  ;;  %v1435_v63 = vld [vmem:[#allocation8 + $0x350] sm:$0xff] }
 0x35a   :  { %v9777_v21 = vcombine.low %v1435_v63, %v1439_v18 }
 0x35b   :  { %8186 = vmatpush1.bf16.msra.mxu0 %v9729_v44  ;;  %v9771_v44 = vcombine.low %v1428_v53, %v1432_v54  ;;  %v1468_v53 = vld [vmem:[#allocation8 + $0x458] sm:$0xff] }
 0x35c   :  { %8514 = vmatpush1.bf16.msra.mxu1 %v9731_v0  ;;  %8187 = vmatprep.subr.bf16.mxu0 %v9738_v11  ;;  %v9778_v0 = vcombine.high %v1435_v63, %v1439_v18  ;;  %v9780_v11 = vcombine.high %v1436_v3, %v1440_v5  ;;  %v1472_v54 = vld [vmem:[#allocation8 + $0x478] sm:$0xff] }
 0x35d   :  { %8515 = vmatprep.subr.bf16.mxu1 %v9740_v12  ;;  %v1443_v12 = vld [vmem:[#allocation8 + $0x390] sm:$0xff]  ;;  %v9812_v63 = vcombine.high %v1468_v53, %v1472_v54  ;;  %v1476_v18 = vld [vmem:[#allocation8 + $0x498] sm:$0xff] }
 0x35e   :  { %v9785_v26 = vcombine.low %v1443_v12, %v1447_v39 }
 0x35f   :  { %8188 = vmatpush1.bf16.msra.mxu0 %v9737_v37  ;;  %v9779_v37 = vcombine.low %v1436_v3, %v1440_v5  ;;  %v1480_v3 = vld [vmem:[#allocation8 + $0x4b8] sm:$0xff] }
 0x360   :  { %8516 = vmatpush1.bf16.msra.mxu1 %v9739_v36  ;;  %8189 = vmatprep.subr.bf16.mxu0 %v9746_v22  ;;  %v9786_v36 = vcombine.high %v1443_v12, %v1447_v39  ;;  %v9788_v22 = vcombine.high %v1444_v62, %v1448_v15  ;;  %v1487_v12 = vld [vmem:[#allocation8 + $0x4f0] sm:$0xff]  ;;  %v1484_v39 = vld [vmem:[#allocation8 + $0x4d8] sm:$0xff] }
 0x361   :  { %8517 = vmatprep.subr.bf16.mxu1 %v9748_v45  ;;  %v1451_v45 = vld [vmem:[#allocation8 + $0x3d0] sm:$0xff] }
 0x362   :  { %v9793_v42 = vcombine.low %v1451_v45, %v1455_v4 }
 0x363   :  { %8190 = vmatpush1.bf16.msra.mxu0 %v9745_v28  ;;  %v9787_v28 = vcombine.low %v1444_v62, %v1448_v15  ;;  %v1488_v62 = vld [vmem:[#allocation8 + $0x4f8] sm:$0xff] }
 0x364   :  { %8518 = vmatpush1.bf16.msra.mxu1 %v9747_v29  ;;  %8191 = vmatprep.subr.bf16.mxu0 %v9754_v30  ;;  %v9794_v29 = vcombine.high %v1451_v45, %v1455_v4  ;;  %v9796_v30 = vcombine.high %v1452_v25, %v1456_v13  ;;  %v1492_v45 = vld [vmem:[#allocation8 + $0x518] sm:$0xff] }
 0x365   :  { %8519 = vmatprep.subr.bf16.mxu1 %v9756_v61  ;;  %v1459_v61 = vld [vmem:[#allocation8 + $0x410] sm:$0xff]  ;;  %v1496_v4 = vld [vmem:[#allocation8 + $0x538] sm:$0xff] }
 0x366   :  { %v9801_v27 = vcombine.low %v1459_v61, %v1463_v32 }
 0x367   :  { %8192 = vmatpush1.bf16.msra.mxu0 %v9753_v43  ;;  %v9795_v43 = vcombine.low %v1452_v25, %v1456_v13  ;;  %v9827_v25 = vcombine.low %v1484_v39, %v1488_v62 }
 0x368   :  { %8520 = vmatpush1.bf16.msra.mxu1 %v9755_v10  ;;  %8193 = vmatprep.subr.bf16.mxu0 %v9762_v48  ;;  %v9802_v10 = vcombine.high %v1459_v61, %v1463_v32  ;;  %v9804_v48 = vcombine.high %v1460_v35, %v1464_v34  ;;  %v1504_v61 = vld [vmem:[#allocation8 + $0x578] sm:$0xff] }
 0x369   :  { %8521 = vmatprep.subr.bf16.mxu1 %v9764_v50  ;;  %v1467_v50 = vld [vmem:[#allocation8 + $0x450] sm:$0xff] }
 0x36a   :  { %v9809_v5 = vcombine.low %v1467_v50, %v1471_v52 }
 0x36b   :  { %8194 = vmatpush1.bf16.msra.mxu0 %v9761_v9  ;;  %v9803_v9 = vcombine.low %v1460_v35, %v1464_v34  ;;  %v9835_v35 = vcombine.low %v1492_v45, %v1496_v4 }
 0x36c   :  { %8522 = vmatpush1.bf16.msra.mxu1 %v9763_v55  ;;  %8195 = vmatprep.subr.bf16.mxu0 %v9770_v56  ;;  %v9810_v55 = vcombine.high %v1467_v50, %v1471_v52  ;;  %v1475_v56 = vld [vmem:[#allocation8 + $0x490] sm:$0xff]  ;;  %v1512_v50 = vld [vmem:[#allocation8 + $0x5b8] sm:$0xff] }
 0x36d   :  { %8523 = vmatprep.subr.bf16.mxu1 %v9772_v59  ;;  %v1479_v59 = vld [vmem:[#allocation8 + $0x4b0] sm:$0xff] }
 0x36e   :  { %v9817_v15 = vcombine.low %v1475_v56, %v1479_v59 }
 0x36f   :  { %8196 = vmatpush1.bf16.msra.mxu0 %v9769_v7  ;;  %v9811_v7 = vcombine.low %v1468_v53, %v1472_v54 }
 0x370   :  { %8524 = vmatpush1.bf16.msra.mxu1 %v9771_v44  ;;  %8197 = vmatprep.subr.bf16.mxu0 %v9778_v0  ;;  %v9818_v44 = vcombine.high %v1475_v56, %v1479_v59  ;;  %v9820_v0 = vcombine.high %v1476_v18, %v1480_v3  ;;  %v1516_v56 = vld [vmem:[#allocation8 + $0x5d8] sm:$0xff] }
 0x371   :  { %8525 = vmatprep.subr.bf16.mxu1 %v9780_v11  ;;  %v1483_v11 = vld [vmem:[#allocation8 + $0x4d0] sm:$0xff]  ;;  %v1520_v59 = vld [vmem:[#allocation8 + $0x5f8] sm:$0xff] }
 0x373   :  { %8198 = vmatpush1.bf16.msra.mxu0 %v9777_v21  ;;  %v9826_v21 = vcombine.high %v1483_v11, %v1487_v12 }
 0x374   :  { %8526 = vmatpush1.bf16.msra.mxu1 %v9779_v37  ;;  %8199 = vmatprep.subr.bf16.mxu0 %v9786_v36  ;;  %v9828_v37 = vcombine.high %v1484_v39, %v1488_v62  ;;  %v1491_v36 = vld [vmem:[#allocation8 + $0x510] sm:$0xff]  ;;  %v9859_v39 = vcombine.low %v1516_v56, %v1520_v59 }
 0x375   :  { %8527 = vmatprep.subr.bf16.mxu1 %v9788_v22  ;;  %v1495_v22 = vld [vmem:[#allocation8 + $0x530] sm:$0xff] }
 0x376   :  { %v9834_v13 = vcombine.high %v1491_v36, %v1495_v22  ;;  %v9833_v32 = vcombine.low %v1491_v36, %v1495_v22  ;;  %v1536_v36 = vld [vmem:[#allocation8 + $0x678] sm:$0xff] }
 0x377   :  { %8200 = vmatpush1.bf16.msra.mxu0 %v9785_v26  ;;  %v9836_v26 = vcombine.high %v1492_v45, %v1496_v4 }
 0x378   :  { %8528 = vmatpush1.bf16.msra.mxu1 %v9787_v28  ;;  %8201 = vmatprep.subr.bf16.mxu0 %v9794_v29  ;;  %v1499_v28 = vld [vmem:[#allocation8 + $0x550] sm:$0xff] }
 0x379   :  { %8529 = vmatprep.subr.bf16.mxu1 %v9796_v30  ;;  %v1503_v29 = vld [vmem:[#allocation8 + $0x570] sm:$0xff]  ;;  %v1500_v30 = vld [vmem:[#allocation8 + $0x558] sm:$0xff] }
 0x37a   :  { %v9842_v34 = vcombine.high %v1499_v28, %v1503_v29  ;;  %v9841_v52 = vcombine.low %v1499_v28, %v1503_v29  ;;  %v1544_v28 = vld [vmem:[#allocation8 + $0x6b8] sm:$0xff] }
 0x37b   :  { %8202 = vmatpush1.bf16.msra.mxu0 %v9793_v42  ;;  %v9844_v42 = vcombine.high %v1500_v30, %v1504_v61 }
 0x37c   :  { %8530 = vmatpush1.bf16.msra.mxu1 %v9795_v43  ;;  %8212 = vmatprep.subr.bf16.mxu0 %v9802_v10  ;;  %v1507_v43 = vld [vmem:[#allocation8 + $0x590] sm:$0xff] }
 0x37d   :  { %8540 = vmatprep.subr.bf16.mxu1 %v9804_v48  ;;  %v1511_v10 = vld [vmem:[#allocation8 + $0x5b0] sm:$0xff]  ;;  %v1508_v48 = vld [vmem:[#allocation8 + $0x598] sm:$0xff] }
 0x37e   :  { %8204 = vmatmul.mubr.bf16.vlgmr.msra.gmra.mrb[20].mxu0 %v11422_v40  ;;  %v9850_v53 = vcombine.high %v1507_v43, %v1511_v10  ;;  %v9852_v54 = vcombine.high %v1508_v48, %v1512_v50 }
 0x37f   :  { %8532 = vmatmul.mubr.bf16.vlgmr.msra.gmra.mrb[20].mxu1 %v11422_v40  ;;  %8213 = vmatpush1.bf16.msra.mxu0 %v9801_v27  ;;  %v9819_v40 = vcombine.low %v1476_v18, %v1480_v3  ;;  %v9843_v27 = vcombine.low %v1500_v30, %v1504_v61  ;;  %v9851_v18 = vcombine.low %v1508_v48, %v1512_v50 }
 0x380   :  { %8244 = vmatprep.mubr.bf16.mxu0 %v11428_v58  ;;  %8541 = vmatpush1.bf16.msra.mxu1 %v9803_v9  ;;  %v1515_v9 = vld [vmem:[#allocation8 + $0x5d0] sm:$0xff] }
 0x381   :  { %8572 = vmatprep.mubr.bf16.mxu1 %v11428_v58  ;;  %8214 = vmatprep.subr.bf16.mxu0 %v9810_v55  ;;  %v9825_v58 = vcombine.low %v1483_v11, %v1487_v12  ;;  %v1519_v55 = vld [vmem:[#allocation8 + $0x5f0] sm:$0xff]  ;;  %v1528_v11 = vld [vmem:[#allocation8 + $0x638] sm:$0xff] }
 0x382   :  { %8542 = vmatprep.subr.bf16.mxu1 %v9812_v63  ;;  %v9849_v63 = vcombine.low %v1507_v43, %v1511_v10  ;;  %v9858_v3 = vcombine.high %v1515_v9, %v1519_v55  ;;  %v9857_v12 = vcombine.low %v1515_v9, %v1519_v55  ;;  %v1552_v43 = vld [vmem:[#allocation8 + $0x6f8] sm:$0xff] }
 0x383   :  { %8215 = vmatpush1.bf16.msra.mxu0 %v9809_v5  ;;  %v9860_v5 = vcombine.high %v1516_v56, %v1520_v59  ;;  %v1560_v9 = vld [vmem:[#allocation8 + $0x738] sm:$0xff] }
 0x384   :  { %8543 = vmatpush1.bf16.msra.mxu1 %v9811_v7  ;;  %8216 = vmatprep.subr.bf16.mxu0 %v9818_v44  ;;  %v1523_v7 = vld [vmem:[#allocation8 + $0x610] sm:$0xff] }
 0x385   :  { %8544 = vmatprep.subr.bf16.mxu1 %v9820_v0  ;;  %v1527_v44 = vld [vmem:[#allocation8 + $0x630] sm:$0xff]  ;;  %v1524_v0 = vld [vmem:[#allocation8 + $0x618] sm:$0xff] }
 0x386   :  { %v9866_v62 = vcombine.high %v1523_v7, %v1527_v44  ;;  %v9865_v22 = vcombine.low %v1523_v7, %v1527_v44  ;;  %v9867_v45 = vcombine.low %v1524_v0, %v1528_v11  ;;  %v1568_v7 = vld [vmem:[#allocation8 + $0x778] sm:$0xff] }
 0x387   :  { %8217 = vmatpush1.bf16.msra.mxu0 %v9817_v15  ;;  %v9868_v15 = vcombine.high %v1524_v0, %v1528_v11 }
 0x388   :  { %8545 = vmatpush1.bf16.msra.mxu1 %v9819_v40  ;;  %8218 = vmatprep.subr.bf16.mxu0 %v9826_v21  ;;  %v1531_v40 = vld [vmem:[#allocation8 + $0x650] sm:$0xff] }
 0x389   :  { %8546 = vmatprep.subr.bf16.mxu1 %v9828_v37  ;;  %v1535_v21 = vld [vmem:[#allocation8 + $0x670] sm:$0xff]  ;;  %v1532_v37 = vld [vmem:[#allocation8 + $0x658] sm:$0xff] }
 0x38a   :  { %v9874_v4 = vcombine.high %v1531_v40, %v1535_v21  ;;  %v9873_v29 = vcombine.low %v1531_v40, %v1535_v21  ;;  %v9875_v30 = vcombine.low %v1532_v37, %v1536_v36  ;;  %v1576_v40 = vld [vmem:[#allocation8 + $0x7b8] sm:$0xff] }
 0x38b   :  { %8219 = vmatpush1.bf16.msra.mxu0 %v9825_v58  ;;  %v9876_v58 = vcombine.high %v1532_v37, %v1536_v36 }
 0x38c   :  { %8547 = vmatpush1.bf16.msra.mxu1 %v9827_v25  ;;  %8220 = vmatprep.subr.bf16.mxu0 %v9834_v13  ;;  %v1539_v25 = vld [vmem:[#allocation8 + $0x690] sm:$0xff] }
 0x38d   :  { %8548 = vmatprep.subr.bf16.mxu1 %v9836_v26  ;;  %v1543_v13 = vld [vmem:[#allocation8 + $0x6b0] sm:$0xff]  ;;  %v1540_v26 = vld [vmem:[#allocation8 + $0x698] sm:$0xff] }
 0x38e   :  { %v9882_v61 = vcombine.high %v1539_v25, %v1543_v13  ;;  %v9881_v10 = vcombine.low %v1539_v25, %v1543_v13  ;;  %v9883_v48 = vcombine.low %v1540_v26, %v1544_v28  ;;  %v1584_v25 = vld [vmem:[#allocation8 + $0x7f8] sm:$0xff] }
 0x38f   :  { %8221 = vmatpush1.bf16.msra.mxu0 %v9833_v32  ;;  %v9884_v32 = vcombine.high %v1540_v26, %v1544_v28 }
 0x390   :  { %8549 = vmatpush1.bf16.msra.mxu1 %v9835_v35  ;;  %8222 = vmatprep.subr.bf16.mxu0 %v9842_v34  ;;  %v1547_v35 = vld [vmem:[#allocation8 + $0x6d0] sm:$0xff] }
 0x391   :  { %8550 = vmatprep.subr.bf16.mxu1 %v9844_v42  ;;  %v1551_v34 = vld [vmem:[#allocation8 + $0x6f0] sm:$0xff]  ;;  %v1548_v42 = vld [vmem:[#allocation8 + $0x6d8] sm:$0xff] }
 0x392   :  { %v9890_v50 = vcombine.high %v1547_v35, %v1551_v34  ;;  %v9889_v55 = vcombine.low %v1547_v35, %v1551_v34  ;;  %v9891_v56 = vcombine.low %v1548_v42, %v1552_v43  ;;  %v1592_v35 = vld [vmem:[#allocation8 + $0x838] sm:$0xff] }
 0x393   :  { %8223 = vmatpush1.bf16.msra.mxu0 %v9841_v52  ;;  %v9892_v52 = vcombine.high %v1548_v42, %v1552_v43 }
 0x394   :  { %8551 = vmatpush1.bf16.msra.mxu1 %v9843_v27  ;;  %8224 = vmatprep.subr.bf16.mxu0 %v9850_v53  ;;  %v1555_v27 = vld [vmem:[#allocation8 + $0x710] sm:$0xff] }
 0x395   :  { %8552 = vmatprep.subr.bf16.mxu1 %v9852_v54  ;;  %v1559_v53 = vld [vmem:[#allocation8 + $0x730] sm:$0xff]  ;;  %v1556_v54 = vld [vmem:[#allocation8 + $0x718] sm:$0xff] }
 0x396   :  { %v9898_v59 = vcombine.high %v1555_v27, %v1559_v53  ;;  %v9897_v44 = vcombine.low %v1555_v27, %v1559_v53  ;;  %v9899_v0 = vcombine.low %v1556_v54, %v1560_v9  ;;  %v1596_v27 = vld [vmem:[#allocation8 + $0x858] sm:$0xff] }
 0x397   :  { %8225 = vmatpush1.bf16.msra.mxu0 %v9849_v63  ;;  %v9900_v63 = vcombine.high %v1556_v54, %v1560_v9  ;;  %v1600_v53 = vld [vmem:[#allocation8 + $0x878] sm:$0xff] }
 0x398   :  { %8553 = vmatpush1.bf16.msra.mxu1 %v9851_v18  ;;  %8226 = vmatprep.subr.bf16.mxu0 %v9858_v3  ;;  %v1563_v18 = vld [vmem:[#allocation8 + $0x750] sm:$0xff] }
 0x399   :  { %8554 = vmatprep.subr.bf16.mxu1 %v9860_v5  ;;  %v1567_v3 = vld [vmem:[#allocation8 + $0x770] sm:$0xff]  ;;  %v1564_v5 = vld [vmem:[#allocation8 + $0x758] sm:$0xff] }
 0x39a   :  { %v9906_v11 = vcombine.high %v1563_v18, %v1567_v3  ;;  %v9905_v21 = vcombine.low %v1563_v18, %v1567_v3  ;;  %v9907_v37 = vcombine.low %v1564_v5, %v1568_v7  ;;  %v1608_v18 = vld [vmem:[#allocation8 + $0x8b8] sm:$0xff] }
 0x39b   :  { %8227 = vmatpush1.bf16.msra.mxu0 %v9857_v12  ;;  %v9908_v12 = vcombine.high %v1564_v5, %v1568_v7  ;;  %v9939_v5 = vcombine.low %v1596_v27, %v1600_v53 }
 0x39c   :  { %8555 = vmatpush1.bf16.msra.mxu1 %v9859_v39  ;;  %8228 = vmatprep.subr.bf16.mxu0 %v9866_v62  ;;  %v1571_v39 = vld [vmem:[#allocation8 + $0x790] sm:$0xff] }
 0x39d   :  { %8556 = vmatprep.subr.bf16.mxu1 %v9868_v15  ;;  %v1575_v62 = vld [vmem:[#allocation8 + $0x7b0] sm:$0xff]  ;;  %v1572_v15 = vld [vmem:[#allocation8 + $0x798] sm:$0xff] }
 0x39e   :  { %v9914_v36 = vcombine.high %v1571_v39, %v1575_v62  ;;  %v9913_v13 = vcombine.low %v1571_v39, %v1575_v62  ;;  %v9915_v26 = vcombine.low %v1572_v15, %v1576_v40  ;;  %v1616_v39 = vld [vmem:[#allocation8 + $0x8f8] sm:$0xff] }
 0x39f   :  { %8229 = vmatpush1.bf16.msra.mxu0 %v9865_v22  ;;  %v9916_v22 = vcombine.high %v1572_v15, %v1576_v40 }
 0x3a0   :  { %8557 = vmatpush1.bf16.msra.mxu1 %v9867_v45  ;;  %8230 = vmatprep.subr.bf16.mxu0 %v9874_v4  ;;  %v1579_v45 = vld [vmem:[#allocation8 + $0x7d0] sm:$0xff] }
 0x3a1   :  { %8558 = vmatprep.subr.bf16.mxu1 %v9876_v58  ;;  %v1583_v4 = vld [vmem:[#allocation8 + $0x7f0] sm:$0xff]  ;;  %v1580_v58 = vld [vmem:[#allocation8 + $0x7d8] sm:$0xff] }
 0x3a2   :  { %v9922_v28 = vcombine.high %v1579_v45, %v1583_v4  ;;  %v9921_v34 = vcombine.low %v1579_v45, %v1583_v4  ;;  %v9923_v42 = vcombine.low %v1580_v58, %v1584_v25 }
 0x3a3   :  { %8231 = vmatpush1.bf16.msra.mxu0 %v9873_v29  ;;  %v9924_v29 = vcombine.high %v1580_v58, %v1584_v25  ;;  %v1627_v25 = vld [vmem:[#allocation8 + $0x950] sm:$0xff] }
 0x3a4   :  { %8559 = vmatpush1.bf16.msra.mxu1 %v9875_v30  ;;  %8232 = vmatprep.subr.bf16.mxu0 %v9882_v61  ;;  %v1587_v30 = vld [vmem:[#allocation8 + $0x810] sm:$0xff] }
 0x3a5   :  { %8560 = vmatprep.subr.bf16.mxu1 %v9884_v32  ;;  %v1591_v61 = vld [vmem:[#allocation8 + $0x830] sm:$0xff]  ;;  %v1588_v32 = vld [vmem:[#allocation8 + $0x818] sm:$0xff] }
 0x3a6   :  { %v9930_v43 = vcombine.high %v1587_v30, %v1591_v61  ;;  %v9931_v54 = vcombine.low %v1588_v32, %v1592_v35 }
 0x3a7   :  { %8233 = vmatpush1.bf16.msra.mxu0 %v9881_v10  ;;  %v9932_v10 = vcombine.high %v1588_v32, %v1592_v35  ;;  %v1635_v35 = vld [vmem:[#allocation8 + $0x990] sm:$0xff] }
 0x3a8   :  { %8561 = vmatpush1.bf16.msra.mxu1 %v9883_v48  ;;  %8234 = vmatprep.subr.bf16.mxu0 %v9890_v50  ;;  %v1595_v48 = vld [vmem:[#allocation8 + $0x850] sm:$0xff] }
 0x3a9   :  { %8562 = vmatprep.subr.bf16.mxu1 %v9892_v52  ;;  %v1599_v50 = vld [vmem:[#allocation8 + $0x870] sm:$0xff]  ;;  %v9929_v52 = vcombine.low %v1587_v30, %v1591_v61 }
 0x3aa   :  { %v9938_v9 = vcombine.high %v1595_v48, %v1599_v50  ;;  %v9937_v3 = vcombine.low %v1595_v48, %v1599_v50 }
 0x3ab   :  { %8235 = vmatpush1.bf16.msra.mxu0 %v9889_v55  ;;  %v1603_v55 = vld [vmem:[#allocation8 + $0x890] sm:$0xff] }
 0x3ac   :  { %8563 = vmatpush1.bf16.msra.mxu1 %v9891_v56  ;;  %8236 = vmatprep.subr.bf16.mxu0 %v9898_v59  ;;  %v1607_v56 = vld [vmem:[#allocation8 + $0x8b0] sm:$0xff]  ;;  %v9940_v59 = vcombine.high %v1596_v27, %v1600_v53 }
 0x3ad   :  { %8564 = vmatprep.subr.bf16.mxu1 %v9900_v63  ;;  %v1604_v63 = vld [vmem:[#allocation8 + $0x898] sm:$0xff]  ;;  %v9946_v7 = vcombine.high %v1603_v55, %v1607_v56  ;;  %v9945_v62 = vcombine.low %v1603_v55, %v1607_v56  ;;  %v1643_v27 = vld [vmem:[#allocation8 + $0x9d0] sm:$0xff] }
 0x3ae   :  { %v1647_v53 = vld [vmem:[#allocation8 + $0x9f0] sm:$0xff] }
 0x3af   :  { %8237 = vmatpush1.bf16.msra.mxu0 %v9897_v44  ;;  %v9948_v44 = vcombine.high %v1604_v63, %v1608_v18 }
 0x3b0   :  { %8565 = vmatpush1.bf16.msra.mxu1 %v9899_v0  ;;  %8238 = vmatprep.subr.bf16.mxu0 %v9906_v11  ;;  %v1611_v0 = vld [vmem:[#allocation8 + $0x8d0] sm:$0xff] }
 0x3b1   :  { %8566 = vmatprep.subr.bf16.mxu1 %v9908_v12  ;;  %v1615_v11 = vld [vmem:[#allocation8 + $0x8f0] sm:$0xff]  ;;  %v1612_v12 = vld [vmem:[#allocation8 + $0x8d8] sm:$0xff] }
 0x3b2   :  { %v9954_v15 = vcombine.high %v1611_v0, %v1615_v11  ;;  %v9956_v40 = vcombine.high %v1612_v12, %v1616_v39  ;;  %v9955_v45 = vcombine.low %v1612_v12, %v1616_v39  ;;  %v1659_v39 = vld [vmem:[#allocation8 + $0xa50] sm:$0xff] }
 0x3b3   :  { %8239 = vmatpush1.bf16.msra.mxu0 %v9905_v21  ;;  %v1619_v21 = vld [vmem:[#allocation8 + $0x910] sm:$0xff] }
 0x3b4   :  { %8567 = vmatpush1.bf16.msra.mxu1 %v9907_v37  ;;  %8240 = vmatprep.subr.bf16.mxu0 %v9914_v36  ;;  %v1623_v37 = vld [vmem:[#allocation8 + $0x930] sm:$0xff]  ;;  %v1620_v36 = vld [vmem:[#allocation8 + $0x918] sm:$0xff] }
 0x3b5   :  { %8568 = vmatprep.subr.bf16.mxu1 %v9916_v22  ;;  %v1624_v22 = vld [vmem:[#allocation8 + $0x938] sm:$0xff]  ;;  %v9962_v4 = vcombine.high %v1619_v21, %v1623_v37 }
 0x3b6   :  { %v9964_v58 = vcombine.high %v1620_v36, %v1624_v22  ;;  %v9963_v30 = vcombine.low %v1620_v36, %v1624_v22  ;;  %v1667_v22 = vld [vmem:[#allocation8 + $0xa90] sm:$0xff] }
 0x3b7   :  { %8241 = vmatpush1.bf16.msra.mxu0 %v9913_v13  ;;  %v1631_v13 = vld [vmem:[#allocation8 + $0x970] sm:$0xff] }
 0x3b8   :  { %8569 = vmatpush1.bf16.msra.mxu1 %v9915_v26  ;;  %8242 = vmatprep.subr.bf16.mxu0 %v9922_v28  ;;  %v1628_v26 = vld [vmem:[#allocation8 + $0x958] sm:$0xff]  ;;  %v9970_v61 = vcombine.high %v1627_v25, %v1631_v13 }
 0x3b9   :  { %8570 = vmatprep.subr.bf16.mxu1 %v9924_v29  ;;  %v1632_v28 = vld [vmem:[#allocation8 + $0x978] sm:$0xff]  ;;  %v9961_v29 = vcombine.low %v1619_v21, %v1623_v37 }
 0x3ba   :  { %v9972_v32 = vcombine.high %v1628_v26, %v1632_v28  ;;  %v9971_v48 = vcombine.low %v1628_v26, %v1632_v28  ;;  %v1675_v28 = vld [vmem:[#allocation8 + $0xad0] sm:$0xff] }
 0x3bb   :  { %8243 = vmatpush1.bf16.msra.mxu0 %v9921_v34  ;;  %v1639_v34 = vld [vmem:[#allocation8 + $0x9b0] sm:$0xff] }
 0x3bc   :  { %8571 = vmatpush1.bf16.msra.mxu1 %v9923_v42  ;;  %8253 = vmatprep.subr.bf16.mxu0 %v9930_v43  ;;  %v1636_v42 = vld [vmem:[#allocation8 + $0x998] sm:$0xff]  ;;  %v9978_v50 = vcombine.high %v1635_v35, %v1639_v34  ;;  %v9977_v55 = vcombine.low %v1635_v35, %v1639_v34 }
 0x3bd   :  { %8581 = vmatprep.subr.bf16.mxu1 %v9932_v10  ;;  %v1640_v43 = vld [vmem:[#allocation8 + $0x9b8] sm:$0xff]  ;;  %v9969_v10 = vcombine.low %v1627_v25, %v1631_v13 }
 0x3be   :  { %8245 = vmatmul.mubr.bf16.vlgmr.msra.gmra.mrb[20].mxu0 %v11462_v33  ;;  %v9979_v56 = vcombine.low %v1636_v42, %v1640_v43 }
 0x3bf   :  { %8573 = vmatmul.mubr.bf16.vlgmr.msra.gmra.mrb[20].mxu1 %v11462_v33  ;;  %8254 = vmatpush1.bf16.msra.mxu0 %v9929_v52  ;;  %v9947_v33 = vcombine.low %v1604_v63, %v1608_v18  ;;  %v9980_v52 = vcombine.high %v1636_v42, %v1640_v43  ;;  %v1651_v18 = vld [vmem:[#allocation8 + $0xa10] sm:$0xff] }
 0x3c0   :  { %8285 = vmatprep.mubr.bf16.mxu0 %v11466_v46  ;;  %8582 = vmatpush1.bf16.msra.mxu1 %v9931_v54  ;;  %v1644_v54 = vld [vmem:[#allocation8 + $0x9d8] sm:$0xff]  ;;  %v1683_v43 = vld [vmem:[#allocation8 + $0xb10] sm:$0xff] }
 0x3c1   :  { %8613 = vmatprep.mubr.bf16.mxu1 %v11466_v46  ;;  %8255 = vmatprep.subr.bf16.mxu0 %v9938_v9  ;;  %v9953_v46 = vcombine.low %v1611_v0, %v1615_v11  ;;  %v1648_v9 = vld [vmem:[#allocation8 + $0x9f8] sm:$0xff] }
 0x3c2   :  { %8583 = vmatprep.subr.bf16.mxu1 %v9940_v59  ;;  %v9986_v59 = vcombine.high %v1643_v27, %v1647_v53  ;;  %v9988_v63 = vcombine.high %v1644_v54, %v1648_v9  ;;  %v9987_v0 = vcombine.low %v1644_v54, %v1648_v9  ;;  %v1691_v9 = vld [vmem:[#allocation8 + $0xb50] sm:$0xff] }
 0x3c3   :  { %8256 = vmatpush1.bf16.msra.mxu0 %v9937_v3  ;;  %v1655_v3 = vld [vmem:[#allocation8 + $0xa30] sm:$0xff] }
 0x3c4   :  { %8584 = vmatpush1.bf16.msra.mxu1 %v9939_v5  ;;  %8257 = vmatprep.subr.bf16.mxu0 %v9946_v7  ;;  %v1652_v5 = vld [vmem:[#allocation8 + $0xa18] sm:$0xff]  ;;  %v9994_v11 = vcombine.high %v1651_v18, %v1655_v3 }
 0x3c5   :  { %8585 = vmatprep.subr.bf16.mxu1 %v9948_v44  ;;  %v1656_v7 = vld [vmem:[#allocation8 + $0xa38] sm:$0xff]  ;;  %v9985_v44 = vcombine.low %v1643_v27, %v1647_v53 }
 0x3c6   :  { %v9996_v12 = vcombine.high %v1652_v5, %v1656_v7  ;;  %v9995_v21 = vcombine.low %v1652_v5, %v1656_v7  ;;  %v1699_v7 = vld [vmem:[#allocation8 + $0xb90] sm:$0xff] }
 0x3c7   :  { %8258 = vmatpush1.bf16.msra.mxu0 %v9945_v62  ;;  %v1663_v62 = vld [vmem:[#allocation8 + $0xa70] sm:$0xff] }
 0x3c8   :  { %8586 = vmatpush1.bf16.msra.mxu1 %v9947_v33  ;;  %8259 = vmatprep.subr.bf16.mxu0 %v9954_v15  ;;  %v1660_v33 = vld [vmem:[#allocation8 + $0xa58] sm:$0xff]  ;;  %v10002_v37 = vcombine.high %v1659_v39, %v1663_v62 }
 0x3c9   :  { %8587 = vmatprep.subr.bf16.mxu1 %v9956_v40  ;;  %v1664_v15 = vld [vmem:[#allocation8 + $0xa78] sm:$0xff]  ;;  %v9993_v40 = vcombine.low %v1651_v18, %v1655_v3 }
 0x3ca   :  { %v10004_v36 = vcombine.high %v1660_v33, %v1664_v15  ;;  %v10003_v25 = vcombine.low %v1660_v33, %v1664_v15  ;;  %v1707_v15 = vld [vmem:[#allocation8 + $0xbd0] sm:$0xff] }
 0x3cb   :  { %8260 = vmatpush1.bf16.msra.mxu0 %v9953_v46  ;;  %v1671_v46 = vld [vmem:[#allocation8 + $0xab0] sm:$0xff] }
 0x3cc   :  { %8588 = vmatpush1.bf16.msra.mxu1 %v9955_v45  ;;  %8261 = vmatprep.subr.bf16.mxu0 %v9962_v4  ;;  %v1668_v45 = vld [vmem:[#allocation8 + $0xa98] sm:$0xff]  ;;  %v10010_v13 = vcombine.high %v1667_v22, %v1671_v46 }
 0x3cd   :  { %8589 = vmatprep.subr.bf16.mxu1 %v9964_v58  ;;  %v1672_v4 = vld [vmem:[#allocation8 + $0xab8] sm:$0xff]  ;;  %v10001_v58 = vcombine.low %v1659_v39, %v1663_v62 }
 0x3ce   :  { %v10012_v26 = vcombine.high %v1668_v45, %v1672_v4  ;;  %v10011_v35 = vcombine.low %v1668_v45, %v1672_v4  ;;  %v1715_v4 = vld [vmem:[#allocation8 + $0xc10] sm:$0xff] }
 0x3cf   :  { %8262 = vmatpush1.bf16.msra.mxu0 %v9961_v29  ;;  %v1679_v29 = vld [vmem:[#allocation8 + $0xaf0] sm:$0xff] }
 0x3d0   :  { %8590 = vmatpush1.bf16.msra.mxu1 %v9963_v30  ;;  %8263 = vmatprep.subr.bf16.mxu0 %v9970_v61  ;;  %v1676_v30 = vld [vmem:[#allocation8 + $0xad8] sm:$0xff]  ;;  %v10018_v34 = vcombine.high %v1675_v28, %v1679_v29 }
 0x3d1   :  { %8591 = vmatprep.subr.bf16.mxu1 %v9972_v32  ;;  %v1680_v61 = vld [vmem:[#allocation8 + $0xaf8] sm:$0xff]  ;;  %v10009_v32 = vcombine.low %v1667_v22, %v1671_v46 }
 0x3d2   :  { %v10020_v42 = vcombine.high %v1676_v30, %v1680_v61  ;;  %v10019_v27 = vcombine.low %v1676_v30, %v1680_v61  ;;  %v1723_v61 = vld [vmem:[#allocation8 + $0xc50] sm:$0xff] }
 0x3d3   :  { %8264 = vmatpush1.bf16.msra.mxu0 %v9969_v10  ;;  %v1687_v10 = vld [vmem:[#allocation8 + $0xb30] sm:$0xff] }
 0x3d4   :  { %8592 = vmatpush1.bf16.msra.mxu1 %v9971_v48  ;;  %8265 = vmatprep.subr.bf16.mxu0 %v9978_v50  ;;  %v1684_v48 = vld [vmem:[#allocation8 + $0xb18] sm:$0xff]  ;;  %v10026_v53 = vcombine.high %v1683_v43, %v1687_v10 }
 0x3d5   :  { %8593 = vmatprep.subr.bf16.mxu1 %v9980_v52  ;;  %v1688_v50 = vld [vmem:[#allocation8 + $0xb38] sm:$0xff]  ;;  %v10017_v52 = vcombine.low %v1675_v28, %v1679_v29 }
 0x3d6   :  { %v10028_v54 = vcombine.high %v1684_v48, %v1688_v50  ;;  %v10027_v18 = vcombine.low %v1684_v48, %v1688_v50  ;;  %v1731_v48 = vld [vmem:[#allocation8 + $0xc90] sm:$0xff] }
 0x3d7   :  { %8266 = vmatpush1.bf16.msra.mxu0 %v9977_v55  ;;  %v1695_v55 = vld [vmem:[#allocation8 + $0xb70] sm:$0xff] }
 0x3d8   :  { %8594 = vmatpush1.bf16.msra.mxu1 %v9979_v56  ;;  %8267 = vmatprep.subr.bf16.mxu0 %v9986_v59  ;;  %v1692_v56 = vld [vmem:[#allocation8 + $0xb58] sm:$0xff]  ;;  %v10034_v3 = vcombine.high %v1691_v9, %v1695_v55  ;;  %v1735_v50 = vld [vmem:[#allocation8 + $0xcb0] sm:$0xff] }
 0x3d9   :  { %8595 = vmatprep.subr.bf16.mxu1 %v9988_v63  ;;  %v1696_v59 = vld [vmem:[#allocation8 + $0xb78] sm:$0xff]  ;;  %v10025_v63 = vcombine.low %v1683_v43, %v1687_v10 }
 0x3da   :  { %v10036_v5 = vcombine.high %v1692_v56, %v1696_v59  ;;  %v10035_v39 = vcombine.low %v1692_v56, %v1696_v59  ;;  %v1739_v59 = vld [vmem:[#allocation8 + $0xcd0] sm:$0xff] }
 0x3db   :  { %8268 = vmatpush1.bf16.msra.mxu0 %v9985_v44  ;;  %v1703_v44 = vld [vmem:[#allocation8 + $0xbb0] sm:$0xff] }
 0x3dc   :  { %8596 = vmatpush1.bf16.msra.mxu1 %v9987_v0  ;;  %8269 = vmatprep.subr.bf16.mxu0 %v9994_v11  ;;  %v1700_v0 = vld [vmem:[#allocation8 + $0xb98] sm:$0xff]  ;;  %v10042_v62 = vcombine.high %v1699_v7, %v1703_v44 }
 0x3dd   :  { %8597 = vmatprep.subr.bf16.mxu1 %v9996_v12  ;;  %v1704_v11 = vld [vmem:[#allocation8 + $0xbb8] sm:$0xff]  ;;  %v10033_v12 = vcombine.low %v1691_v9, %v1695_v55  ;;  %v10074_v55 = vcombine.high %v1731_v48, %v1735_v50 }
 0x3de   :  { %v10044_v33 = vcombine.high %v1700_v0, %v1704_v11  ;;  %v10043_v22 = vcombine.low %v1700_v0, %v1704_v11  ;;  %v1747_v0 = vld [vmem:[#allocation8 + $0xd10] sm:$0xff] }
 0x3df   :  { %8270 = vmatpush1.bf16.msra.mxu0 %v9993_v40  ;;  %v1711_v40 = vld [vmem:[#allocation8 + $0xbf0] sm:$0xff] }
 0x3e0   :  { %8598 = vmatpush1.bf16.msra.mxu1 %v9995_v21  ;;  %8271 = vmatprep.subr.bf16.mxu0 %v10002_v37  ;;  %v1708_v21 = vld [vmem:[#allocation8 + $0xbd8] sm:$0xff]  ;;  %v10050_v46 = vcombine.high %v1707_v15, %v1711_v40  ;;  %v1751_v11 = vld [vmem:[#allocation8 + $0xd30] sm:$0xff] }
 0x3e1   :  { %8599 = vmatprep.subr.bf16.mxu1 %v10004_v36  ;;  %v1712_v37 = vld [vmem:[#allocation8 + $0xbf8] sm:$0xff]  ;;  %v10041_v36 = vcombine.low %v1699_v7, %v1703_v44 }
 0x3e2   :  { %v10052_v45 = vcombine.high %v1708_v21, %v1712_v37  ;;  %v10051_v28 = vcombine.low %v1708_v21, %v1712_v37  ;;  %v1759_v21 = vld [vmem:[#allocation8 + $0xd70] sm:$0xff]  ;;  %v1756_v37 = vld [vmem:[#allocation8 + $0xd58] sm:$0xff] }
 0x3e3   :  { %8272 = vmatpush1.bf16.msra.mxu0 %v10001_v58  ;;  %v1719_v58 = vld [vmem:[#allocation8 + $0xc30] sm:$0xff] }
 0x3e4   :  { %8600 = vmatpush1.bf16.msra.mxu1 %v10003_v25  ;;  %8273 = vmatprep.subr.bf16.mxu0 %v10010_v13  ;;  %v1716_v25 = vld [vmem:[#allocation8 + $0xc18] sm:$0xff]  ;;  %v10058_v29 = vcombine.high %v1715_v4, %v1719_v58 }
 0x3e5   :  { %8601 = vmatprep.subr.bf16.mxu1 %v10012_v26  ;;  %v1720_v13 = vld [vmem:[#allocation8 + $0xc38] sm:$0xff]  ;;  %v10049_v26 = vcombine.low %v1707_v15, %v1711_v40  ;;  %v1755_v40 = vld [vmem:[#allocation8 + $0xd50] sm:$0xff] }
 0x3e6   :  { %v10060_v30 = vcombine.high %v1716_v25, %v1720_v13  ;;  %v10059_v43 = vcombine.low %v1716_v25, %v1720_v13  ;;  %v1767_v25 = vld [vmem:[#allocation8 + $0xdb0] sm:$0xff]  ;;  %v1764_v13 = vld [vmem:[#allocation8 + $0xd98] sm:$0xff] }
 0x3e7   :  { %8274 = vmatpush1.bf16.msra.mxu0 %v10009_v32  ;;  %v1727_v32 = vld [vmem:[#allocation8 + $0xc70] sm:$0xff] }
 0x3e8   :  { %8602 = vmatpush1.bf16.msra.mxu1 %v10011_v35  ;;  %8275 = vmatprep.subr.bf16.mxu0 %v10018_v34  ;;  %v10057_v35 = vcombine.low %v1715_v4, %v1719_v58  ;;  %v1724_v34 = vld [vmem:[#allocation8 + $0xc58] sm:$0xff]  ;;  %v10066_v10 = vcombine.high %v1723_v61, %v1727_v32  ;;  %v1763_v58 = vld [vmem:[#allocation8 + $0xd90] sm:$0xff] }
 0x3e9   :  { %8603 = vmatprep.subr.bf16.mxu1 %v10020_v42  ;;  %v1728_v42 = vld [vmem:[#allocation8 + $0xc78] sm:$0xff] }
 0x3ea   :  { %v10067_v9 = vcombine.low %v1724_v34, %v1728_v42 }
 0x3eb   :  { %8276 = vmatpush1.bf16.msra.mxu0 %v10017_v52  ;;  %v10068_v52 = vcombine.high %v1724_v34, %v1728_v42  ;;  %v1775_v34 = vld [vmem:[#allocation8 + $0xdf0] sm:$0xff] }
 0x3ec   :  { %8604 = vmatpush1.bf16.msra.mxu1 %v10019_v27  ;;  %8277 = vmatprep.subr.bf16.mxu0 %v10026_v53  ;;  %v1732_v27 = vld [vmem:[#allocation8 + $0xc98] sm:$0xff] }
 0x3ed   :  { %8605 = vmatprep.subr.bf16.mxu1 %v10028_v54  ;;  %v1736_v53 = vld [vmem:[#allocation8 + $0xcb8] sm:$0xff]  ;;  %v10065_v54 = vcombine.low %v1723_v61, %v1727_v32 }
 0x3ee   :  { %v10076_v56 = vcombine.high %v1732_v27, %v1736_v53 }
 0x3ef   :  { %8278 = vmatpush1.bf16.msra.mxu0 %v10025_v63  ;;  %v1743_v63 = vld [vmem:[#allocation8 + $0xcf0] sm:$0xff] }
 0x3f0   :  { %8606 = vmatpush1.bf16.msra.mxu1 %v10027_v18  ;;  %8279 = vmatprep.subr.bf16.mxu0 %v10034_v3  ;;  %v1740_v18 = vld [vmem:[#allocation8 + $0xcd8] sm:$0xff]  ;;  %v10082_v7 = vcombine.high %v1739_v59, %v1743_v63 }
 0x3f1   :  { %8607 = vmatprep.subr.bf16.mxu1 %v10036_v5  ;;  %v1744_v3 = vld [vmem:[#allocation8 + $0xcf8] sm:$0xff]  ;;  %v10073_v5 = vcombine.low %v1731_v48, %v1735_v50 }
 0x3f2   :  { %v10084_v44 = vcombine.high %v1740_v18, %v1744_v3  ;;  %v1776_v48 = vld [vmem:[#allocation8 + $0xdf8] sm:$0xff] }
 0x3f3   :  { %8280 = vmatpush1.bf16.msra.mxu0 %v10033_v12  ;;  %v1748_v12 = vld [vmem:[#allocation8 + $0xd18] sm:$0xff] }
 0x3f4   :  { %8608 = vmatpush1.bf16.msra.mxu1 %v10035_v39  ;;  %8281 = vmatprep.subr.bf16.mxu0 %v10042_v62  ;;  %v1752_v39 = vld [vmem:[#allocation8 + $0xd38] sm:$0xff]  ;;  %v10083_v62 = vcombine.low %v1740_v18, %v1744_v3  ;;  %v1783_v18 = vld [vmem:[#allocation8 + $0xe30] sm:$0xff] }
 0x3f5   :  { %8609 = vmatprep.subr.bf16.mxu1 %v10044_v33  ;;  %v10090_v33 = vcombine.high %v1747_v0, %v1751_v11  ;;  %v10092_v15 = vcombine.high %v1748_v12, %v1752_v39  ;;  %v1780_v3 = vld [vmem:[#allocation8 + $0xe18] sm:$0xff] }
 0x3f7   :  { %8282 = vmatpush1.bf16.msra.mxu0 %v10041_v36  ;;  %v1760_v36 = vld [vmem:[#allocation8 + $0xd78] sm:$0xff] }
 0x3f8   :  { %8610 = vmatpush1.bf16.msra.mxu1 %v10043_v22  ;;  %8283 = vmatprep.subr.bf16.mxu0 %v10050_v46  ;;  %v10089_v22 = vcombine.low %v1747_v0, %v1751_v11  ;;  %v10091_v46 = vcombine.low %v1748_v12, %v1752_v39  ;;  %v10100_v4 = vcombine.high %v1756_v37, %v1760_v36  ;;  %v1787_v11 = vld [vmem:[#allocation8 + $0xe50] sm:$0xff]  ;;  %v1788_v39 = vld [vmem:[#allocation8 + $0xe58] sm:$0xff] }
 0x3f9   :  { %8611 = vmatprep.subr.bf16.mxu1 %v10052_v45  ;;  %v10098_v45 = vcombine.high %v1755_v40, %v1759_v21  ;;  %v1791_v12 = vld [vmem:[#allocation8 + $0xe70] sm:$0xff] }
 0x3fb   :  { %8284 = vmatpush1.bf16.msra.mxu0 %v10049_v26  ;;  %v1768_v26 = vld [vmem:[#allocation8 + $0xdb8] sm:$0xff] }
 0x3fc   :  { %8612 = vmatpush1.bf16.msra.mxu1 %v10051_v28  ;;  %8294 = vmatprep.subr.bf16.mxu0 %v10058_v29  ;;  %v10097_v28 = vcombine.low %v1755_v40, %v1759_v21  ;;  %v10099_v29 = vcombine.low %v1756_v37, %v1760_v36  ;;  %v10108_v32 = vcombine.high %v1764_v13, %v1768_v26  ;;  %v1795_v21 = vld [vmem:[#allocation8 + $0xe90] sm:$0xff]  ;;  %v1796_v36 = vld [vmem:[#allocation8 + $0xe98] sm:$0xff] }
 0x3fd   :  { %8622 = vmatprep.subr.bf16.mxu1 %v10060_v30  ;;  %v10106_v30 = vcombine.high %v1763_v58, %v1767_v25  ;;  %v1799_v37 = vld [vmem:[#allocation8 + $0xeb0] sm:$0xff] }
 0x3fe   :  { %8286 = vmatmul.mubr.bf16.vlgmr.msra.gmra.mrb[20].mxu0 %v11505_v14 }
 0x3ff   :  { %8614 = vmatmul.mubr.bf16.vlgmr.msra.gmra.mrb[20].mxu1 %v11505_v14  ;;  %8295 = vmatpush1.bf16.msra.mxu0 %v10057_v35  ;;  %v10075_v14 = vcombine.low %v1732_v27, %v1736_v53  ;;  %v1771_v35 = vld [vmem:[#allocation8 + $0xdd0] sm:$0xff]  ;;  %v10105_v27 = vcombine.low %v1763_v58, %v1767_v25 }
 0x400   :  { %8326 = vmatprep.mubr.bf16.mxu0 %v11507_v16  ;;  %8623 = vmatpush1.bf16.msra.mxu1 %v10059_v43  ;;  %v1803_v25 = vld [vmem:[#allocation8 + $0xed0] sm:$0xff] }
 0x401   :  { %8654 = vmatprep.mubr.bf16.mxu1 %v11507_v16  ;;  %8296 = vmatprep.subr.bf16.mxu0 %v10066_v10  ;;  %v10081_v16 = vcombine.low %v1739_v59, %v1743_v63  ;;  %v1772_v10 = vld [vmem:[#allocation8 + $0xdd8] sm:$0xff]  ;;  %v1779_v63 = vld [vmem:[#allocation8 + $0xe10] sm:$0xff] }
 0x402   :  { %8624 = vmatprep.subr.bf16.mxu1 %v10068_v52  ;;  %v10116_v59 = vcombine.high %v1772_v10, %v1776_v48 }
 0x403   :  { %8297 = vmatpush1.bf16.msra.mxu0 %v10065_v54 }
 0x404   :  { %8625 = vmatpush1.bf16.msra.mxu1 %v10067_v9  ;;  %8298 = vmatprep.subr.bf16.mxu0 %v10074_v55  ;;  %v10107_v9 = vcombine.low %v1764_v13, %v1768_v26  ;;  %v10114_v55 = vcombine.high %v1771_v35, %v1775_v34  ;;  %v1807_v13 = vld [vmem:[#allocation8 + $0xef0] sm:$0xff]  ;;  %v1804_v26 = vld [vmem:[#allocation8 + $0xed8] sm:$0xff] }
 0x405   :  { %8626 = vmatprep.subr.bf16.mxu1 %v10076_v56 }
 0x407   :  { %8299 = vmatpush1.bf16.msra.mxu0 %v10073_v5  ;;  %v1784_v5 = vld [vmem:[#allocation8 + $0xe38] sm:$0xff] }
 0x408   :  { %8627 = vmatpush1.bf16.msra.mxu1 %v10075_v14  ;;  %8300 = vmatprep.subr.bf16.mxu0 %v10082_v7  ;;  %v10113_v14 = vcombine.low %v1771_v35, %v1775_v34  ;;  %v10115_v7 = vcombine.low %v1772_v10, %v1776_v48  ;;  %v10124_v0 = vcombine.high %v1780_v3, %v1784_v5  ;;  %v1811_v34 = vld [vmem:[#allocation8 + $0xf10] sm:$0xff]  ;;  %v1812_v48 = vld [vmem:[#allocation8 + $0xf18] sm:$0xff] }
 0x409   :  { %8628 = vmatprep.subr.bf16.mxu1 %v10084_v44  ;;  %v10122_v44 = vcombine.high %v1779_v63, %v1783_v18  ;;  %v1815_v10 = vld [vmem:[#allocation8 + $0xf30] sm:$0xff] }
 0x40b   :  { %8301 = vmatpush1.bf16.msra.mxu0 %v10081_v16  ;;  %v1792_v16 = vld [vmem:[#allocation8 + $0xe78] sm:$0xff] }
 0x40c   :  { %8629 = vmatpush1.bf16.msra.mxu1 %v10083_v62  ;;  %8302 = vmatprep.subr.bf16.mxu0 %v10090_v33  ;;  %v10121_v62 = vcombine.low %v1779_v63, %v1783_v18  ;;  %v10123_v33 = vcombine.low %v1780_v3, %v1784_v5  ;;  %v10132_v40 = vcombine.high %v1788_v39, %v1792_v16  ;;  %v1824_v63 = vld [vmem:[#allocation8 + $0xf78] sm:$0xff] }
 0x40d   :  { %8630 = vmatprep.subr.bf16.mxu1 %v10092_v15  ;;  %v10130_v15 = vcombine.high %v1787_v11, %v1791_v12  ;;  %v10153_v18 = vcombine.low %v1811_v34, %v1815_v10 }
 0x40f   :  { %8303 = vmatpush1.bf16.msra.mxu0 %v10089_v22  ;;  %v1800_v22 = vld [vmem:[#allocation8 + $0xeb8] sm:$0xff] }
 0x410   :  { %8631 = vmatpush1.bf16.msra.mxu1 %v10091_v46  ;;  %8304 = vmatprep.subr.bf16.mxu0 %v10098_v45  ;;  %v10129_v46 = vcombine.low %v1787_v11, %v1791_v12  ;;  %v10131_v45 = vcombine.low %v1788_v39, %v1792_v16  ;;  %v10140_v58 = vcombine.high %v1796_v36, %v1800_v22  ;;  %v1832_v11 = vld [vmem:[#allocation8 + $0xfb8] sm:$0xff] }
 0x411   :  { %v11576_v61 = vpop.f32.mrb[16].mxu0  ;;  %8632 = vmatprep.subr.bf16.mxu1 %v10100_v4  ;;  %v10138_v4 = vcombine.high %v1795_v21, %v1799_v37 }
 0x412   :  { %v11578_v42 = vpop.f32.mrb[16].mxu1  ;;  %v11580_v43 = vpop.f32.mrb[17].mxu0 }
 0x413   :  { %v11582_v50 = vpop.f32.mrb[17].mxu1  ;;  %v7840_v52 = vpop.f32.mrb[18].mxu0  ;;  %8305 = vmatpush1.bf16.msra.mxu0 %v10097_v28  ;;  %v1808_v28 = vld [vmem:[#allocation8 + $0xef8] sm:$0xff] }
 0x414   :  { %v8168_v53 = vpop.f32.mrb[18].mxu1  ;;  %8633 = vmatpush1.bf16.msra.mxu1 %v10099_v29  ;;  %v7841_v54 = vpop.f32.mrb[19].mxu0  ;;  %8306 = vmatprep.subr.bf16.mxu0 %v10106_v30  ;;  %v10137_v29 = vcombine.low %v1795_v21, %v1799_v37  ;;  %v10139_v30 = vcombine.low %v1796_v36, %v1800_v22  ;;  %v10148_v35 = vcombine.high %v1804_v26, %v1808_v28  ;;  %v1816_v52 = vld [vmem:[#allocation8 + $0xf38] sm:$0xff] }
 0x415   :  { %v8169_v56 = vpop.f32.mrb[19].mxu1  ;;  %8634 = vmatprep.subr.bf16.mxu1 %v10108_v32  ;;  %v10146_v32 = vcombine.high %v1803_v25, %v1807_v13  ;;  %v10147_v53 = vcombine.low %v1804_v26, %v1808_v28  ;;  %v10154_v54 = vcombine.high %v1811_v34, %v1815_v10  ;;  %v10155_v3 = vcombine.low %v1812_v48, %v1816_v52  ;;  %v1840_v21 = vld [vmem:[#allocation8 + $0xff8] sm:$0xff] }
 0x416   :  { %v1823_v56 = vld [vmem:[#allocation8 + $0xf70] sm:$0xff]  ;;  %v1852_v34 = vld [vmem:[#allocation8 + $0x1058] sm:$0xff] }
 0x417   :  { %8307 = vmatpush1.bf16.msra.mxu0 %v10105_v27  ;;  %v10145_v27 = vcombine.low %v1803_v25, %v1807_v13  ;;  %v1848_v25 = vld [vmem:[#allocation8 + $0x1038] sm:$0xff] }
 0x418   :  { %8635 = vmatpush1.bf16.msra.mxu1 %v10107_v9  ;;  %8308 = vmatprep.subr.bf16.mxu0 %v10114_v55  ;;  %v10156_v9 = vcombine.high %v1812_v48, %v1816_v52  ;;  %v1819_v55 = vld [vmem:[#allocation8 + $0xf50] sm:$0xff]  ;;  %v1856_v10 = vld [vmem:[#allocation8 + $0x1078] sm:$0xff] }
 0x419   :  { %8636 = vmatprep.subr.bf16.mxu1 %v10116_v59  ;;  %v1820_v59 = vld [vmem:[#allocation8 + $0xf58] sm:$0xff]  ;;  %v10162_v5 = vcombine.high %v1819_v55, %v1823_v56  ;;  %v10161_v12 = vcombine.low %v1819_v55, %v1823_v56 }
 0x41a   :  { %v10163_v39 = vcombine.low %v1820_v59, %v1824_v63  ;;  %v1864_v55 = vld [vmem:[#allocation8 + $0x10b8] sm:$0xff] }
 0x41b   :  { %8309 = vmatpush1.bf16.msra.mxu0 %v10113_v14  ;;  %v10164_v14 = vcombine.high %v1820_v59, %v1824_v63  ;;  %v10195_v59 = vcombine.low %v1852_v34, %v1856_v10 }
 0x41c   :  { %8637 = vmatpush1.bf16.msra.mxu1 %v10115_v7  ;;  %8310 = vmatprep.subr.bf16.mxu0 %v10122_v44  ;;  %v1827_v7 = vld [vmem:[#allocation8 + $0xf90] sm:$0xff] }
 0x41d   :  { %8638 = vmatprep.subr.bf16.mxu1 %v10124_v0  ;;  %v1831_v44 = vld [vmem:[#allocation8 + $0xfb0] sm:$0xff]  ;;  %v1828_v0 = vld [vmem:[#allocation8 + $0xf98] sm:$0xff] }
 0x41e   :  { %v10170_v16 = vcombine.high %v1827_v7, %v1831_v44  ;;  %v10169_v37 = vcombine.low %v1827_v7, %v1831_v44  ;;  %v10171_v36 = vcombine.low %v1828_v0, %v1832_v11  ;;  %v1872_v7 = vld [vmem:[#allocation8 + $0x10f8] sm:$0xff] }
 0x41f   :  { %8311 = vmatpush1.bf16.msra.mxu0 %v10121_v62  ;;  %v10172_v62 = vcombine.high %v1828_v0, %v1832_v11 }
 0x420   :  { %8639 = vmatpush1.bf16.msra.mxu1 %v10123_v33  ;;  %8312 = vmatprep.subr.bf16.mxu0 %v10130_v15  ;;  %v1835_v33 = vld [vmem:[#allocation8 + $0xfd0] sm:$0xff] }
 0x421   :  { %8640 = vmatprep.subr.bf16.mxu1 %v10132_v40  ;;  %v1839_v15 = vld [vmem:[#allocation8 + $0xff0] sm:$0xff]  ;;  %v1836_v40 = vld [vmem:[#allocation8 + $0xfd8] sm:$0xff] }
 0x422   :  { %v10178_v22 = vcombine.high %v1835_v33, %v1839_v15  ;;  %v10177_v13 = vcombine.low %v1835_v33, %v1839_v15  ;;  %v10179_v26 = vcombine.low %v1836_v40, %v1840_v21 }
 0x423   :  { %8313 = vmatpush1.bf16.msra.mxu0 %v10129_v46  ;;  %v10180_v46 = vcombine.high %v1836_v40, %v1840_v21  ;;  %v1883_v21 = vld [vmem:[#allocation8 + $0x1150] sm:$0xff] }
 0x424   :  { %8641 = vmatpush1.bf16.msra.mxu1 %v10131_v45  ;;  %8314 = vmatprep.subr.bf16.mxu0 %v10138_v4  ;;  %v1843_v45 = vld [vmem:[#allocation8 + $0x1010] sm:$0xff] }
 0x425   :  { %8642 = vmatprep.subr.bf16.mxu1 %v10140_v58  ;;  %v1847_v4 = vld [vmem:[#allocation8 + $0x1030] sm:$0xff]  ;;  %v1844_v58 = vld [vmem:[#allocation8 + $0x1018] sm:$0xff] }
 0x426   :  { %v10186_v28 = vcombine.high %v1843_v45, %v1847_v4  ;;  %v10187_v48 = vcombine.low %v1844_v58, %v1848_v25 }
 0x427   :  { %8315 = vmatpush1.bf16.msra.mxu0 %v10137_v29  ;;  %v10188_v29 = vcombine.high %v1844_v58, %v1848_v25  ;;  %v1891_v25 = vld [vmem:[#allocation8 + $0x1190] sm:$0xff] }
 0x428   :  { %8643 = vmatpush1.bf16.msra.mxu1 %v10139_v30  ;;  %8316 = vmatprep.subr.bf16.mxu0 %v10146_v32  ;;  %v1851_v30 = vld [vmem:[#allocation8 + $0x1050] sm:$0xff] }
 0x429   :  { %8644 = vmatprep.subr.bf16.mxu1 %v10148_v35  ;;  %v1855_v32 = vld [vmem:[#allocation8 + $0x1070] sm:$0xff]  ;;  %v10185_v35 = vcombine.low %v1843_v45, %v1847_v4 }
 0x42a   :  { %v10194_v52 = vcombine.high %v1851_v30, %v1855_v32  ;;  %v10193_v56 = vcombine.low %v1851_v30, %v1855_v32 }
 0x42b   :  { %8317 = vmatpush1.bf16.msra.mxu0 %v10145_v27  ;;  %v1859_v27 = vld [vmem:[#allocation8 + $0x1090] sm:$0xff] }
 0x42c   :  { %8645 = vmatpush1.bf16.msra.mxu1 %v10147_v53  ;;  %8318 = vmatprep.subr.bf16.mxu0 %v10154_v54  ;;  %v1863_v53 = vld [vmem:[#allocation8 + $0x10b0] sm:$0xff]  ;;  %v10196_v54 = vcombine.high %v1852_v34, %v1856_v10 }
 0x42d   :  { %8646 = vmatprep.subr.bf16.mxu1 %v10156_v9  ;;  %v1860_v9 = vld [vmem:[#allocation8 + $0x1098] sm:$0xff]  ;;  %v10202_v63 = vcombine.high %v1859_v27, %v1863_v53  ;;  %v10201_v44 = vcombine.low %v1859_v27, %v1863_v53  ;;  %v1899_v34 = vld [vmem:[#allocation8 + $0x11d0] sm:$0xff] }
 0x42e   :  { %v1903_v10 = vld [vmem:[#allocation8 + $0x11f0] sm:$0xff] }
 0x42f   :  { %8319 = vmatpush1.bf16.msra.mxu0 %v10153_v18  ;;  %v10204_v18 = vcombine.high %v1860_v9, %v1864_v55 }
 0x430   :  { %8647 = vmatpush1.bf16.msra.mxu1 %v10155_v3  ;;  %8320 = vmatprep.subr.bf16.mxu0 %v10162_v5  ;;  %v1867_v3 = vld [vmem:[#allocation8 + $0x10d0] sm:$0xff] }
 0x431   :  { %8648 = vmatprep.subr.bf16.mxu1 %v10164_v14  ;;  %v1871_v5 = vld [vmem:[#allocation8 + $0x10f0] sm:$0xff]  ;;  %v1868_v14 = vld [vmem:[#allocation8 + $0x10d8] sm:$0xff] }
 0x432   :  { %v10210_v0 = vcombine.high %v1867_v3, %v1871_v5  ;;  %v10212_v11 = vcombine.high %v1868_v14, %v1872_v7  ;;  %v10211_v33 = vcombine.low %v1868_v14, %v1872_v7  ;;  %v1915_v7 = vld [vmem:[#allocation8 + $0x1250] sm:$0xff] }
 0x433   :  { %8321 = vmatpush1.bf16.msra.mxu0 %v10161_v12  ;;  %v1875_v12 = vld [vmem:[#allocation8 + $0x1110] sm:$0xff] }
 0x434   :  { %8649 = vmatpush1.bf16.msra.mxu1 %v10163_v39  ;;  %8322 = vmatprep.subr.bf16.mxu0 %v10170_v16  ;;  %v1879_v39 = vld [vmem:[#allocation8 + $0x1130] sm:$0xff]  ;;  %v1876_v16 = vld [vmem:[#allocation8 + $0x1118] sm:$0xff] }
 0x435   :  { %8650 = vmatprep.subr.bf16.mxu1 %v10172_v62  ;;  %v1880_v62 = vld [vmem:[#allocation8 + $0x1138] sm:$0xff]  ;;  %v10218_v15 = vcombine.high %v1875_v12, %v1879_v39 }
 0x436   :  { %v10220_v40 = vcombine.high %v1876_v16, %v1880_v62  ;;  %v10219_v45 = vcombine.low %v1876_v16, %v1880_v62  ;;  %v1923_v62 = vld [vmem:[#allocation8 + $0x1290] sm:$0xff] }
 0x437   :  { %8323 = vmatpush1.bf16.msra.mxu0 %v10169_v37  ;;  %v1887_v37 = vld [vmem:[#allocation8 + $0x1170] sm:$0xff] }
 0x438   :  { %8651 = vmatpush1.bf16.msra.mxu1 %v10171_v36  ;;  %8324 = vmatprep.subr.bf16.mxu0 %v10178_v22  ;;  %v1884_v36 = vld [vmem:[#allocation8 + $0x1158] sm:$0xff]  ;;  %v10226_v4 = vcombine.high %v1883_v21, %v1887_v37 }
 0x439   :  { %8652 = vmatprep.subr.bf16.mxu1 %v10180_v46  ;;  %v1888_v22 = vld [vmem:[#allocation8 + $0x1178] sm:$0xff]  ;;  %v10217_v46 = vcombine.low %v1875_v12, %v1879_v39 }
 0x43a   :  { %v10228_v58 = vcombine.high %v1884_v36, %v1888_v22  ;;  %v10227_v30 = vcombine.low %v1884_v36, %v1888_v22  ;;  %v1931_v22 = vld [vmem:[#allocation8 + $0x12d0] sm:$0xff] }
 0x43b   :  { %8325 = vmatpush1.bf16.msra.mxu0 %v10177_v13  ;;  %v1895_v13 = vld [vmem:[#allocation8 + $0x11b0] sm:$0xff] }
 0x43c   :  { %8653 = vmatpush1.bf16.msra.mxu1 %v10179_v26  ;;  %8335 = vmatprep.subr.bf16.mxu0 %v10186_v28  ;;  %v1892_v26 = vld [vmem:[#allocation8 + $0x1198] sm:$0xff]  ;;  %v10234_v32 = vcombine.high %v1891_v25, %v1895_v13  ;;  %v10233_v27 = vcombine.low %v1891_v25, %v1895_v13 }
 0x43d   :  { %8663 = vmatprep.subr.bf16.mxu1 %v10188_v29  ;;  %v1896_v28 = vld [vmem:[#allocation8 + $0x11b8] sm:$0xff]  ;;  %v10225_v29 = vcombine.low %v1883_v21, %v1887_v37 }
 0x43e   :  { %8327 = vmatmul.mubr.bf16.vlgmr.msra.gmra.mrb[20].mxu0 %v11518_v6  ;;  %v10235_v53 = vcombine.low %v1892_v26, %v1896_v28 }
 0x43f   :  { %8655 = vmatmul.mubr.bf16.vlgmr.msra.gmra.mrb[20].mxu1 %v11518_v6  ;;  %8336 = vmatpush1.bf16.msra.mxu0 %v10185_v35  ;;  %v10203_v6 = vcombine.low %v1860_v9, %v1864_v55  ;;  %v10236_v35 = vcombine.high %v1892_v26, %v1896_v28  ;;  %v1907_v55 = vld [vmem:[#allocation8 + $0x1210] sm:$0xff] }
 0x440   :  { %8367 = vmatprep.mubr.bf16.mxu0 %v11520_v51  ;;  %8664 = vmatpush1.bf16.msra.mxu1 %v10187_v48  ;;  %v1900_v48 = vld [vmem:[#allocation8 + $0x11d8] sm:$0xff]  ;;  %v1939_v28 = vld [vmem:[#allocation8 + $0x1310] sm:$0xff] }
 0x441   :  { %8695 = vmatprep.mubr.bf16.mxu1 %v11520_v51  ;;  %8337 = vmatprep.subr.bf16.mxu0 %v10194_v52  ;;  %v10209_v51 = vcombine.low %v1867_v3, %v1871_v5  ;;  %v1904_v52 = vld [vmem:[#allocation8 + $0x11f8] sm:$0xff] }
 0x442   :  { %8665 = vmatprep.subr.bf16.mxu1 %v10196_v54  ;;  %v10242_v54 = vcombine.high %v1899_v34, %v1903_v10  ;;  %v10244_v9 = vcombine.high %v1900_v48, %v1904_v52  ;;  %v10243_v3 = vcombine.low %v1900_v48, %v1904_v52  ;;  %v1947_v52 = vld [vmem:[#allocation8 + $0x1350] sm:$0xff] }
 0x443   :  { %8338 = vmatpush1.bf16.msra.mxu0 %v10193_v56  ;;  %v1911_v56 = vld [vmem:[#allocation8 + $0x1230] sm:$0xff] }
 0x444   :  { %8666 = vmatpush1.bf16.msra.mxu1 %v10195_v59  ;;  %8339 = vmatprep.subr.bf16.mxu0 %v10202_v63  ;;  %v1908_v59 = vld [vmem:[#allocation8 + $0x1218] sm:$0xff]  ;;  %v10250_v5 = vcombine.high %v1907_v55, %v1911_v56 }
 0x445   :  { %8667 = vmatprep.subr.bf16.mxu1 %v10204_v18  ;;  %v1912_v63 = vld [vmem:[#allocation8 + $0x1238] sm:$0xff]  ;;  %v10241_v18 = vcombine.low %v1899_v34, %v1903_v10 }
 0x446   :  { %v10252_v14 = vcombine.high %v1908_v59, %v1912_v63  ;;  %v10251_v12 = vcombine.low %v1908_v59, %v1912_v63  ;;  %v1955_v63 = vld [vmem:[#allocation8 + $0x1390] sm:$0xff] }
 0x447   :  { %8340 = vmatpush1.bf16.msra.mxu0 %v10201_v44  ;;  %v1919_v44 = vld [vmem:[#allocation8 + $0x1270] sm:$0xff] }
 0x448   :  { %8668 = vmatpush1.bf16.msra.mxu1 %v10203_v6  ;;  %8341 = vmatprep.subr.bf16.mxu0 %v10210_v0  ;;  %v1916_v6 = vld [vmem:[#allocation8 + $0x1258] sm:$0xff]  ;;  %v10258_v39 = vcombine.high %v1915_v7, %v1919_v44 }
 0x449   :  { %8669 = vmatprep.subr.bf16.mxu1 %v10212_v11  ;;  %v1920_v0 = vld [vmem:[#allocation8 + $0x1278] sm:$0xff]  ;;  %v10249_v11 = vcombine.low %v1907_v55, %v1911_v56 }
 0x44a   :  { %v10260_v16 = vcombine.high %v1916_v6, %v1920_v0  ;;  %v10259_v21 = vcombine.low %v1916_v6, %v1920_v0  ;;  %v1963_v0 = vld [vmem:[#allocation8 + $0x13d0] sm:$0xff] }
 0x44b   :  { %8342 = vmatpush1.bf16.msra.mxu0 %v10209_v51  ;;  %v1927_v51 = vld [vmem:[#allocation8 + $0x12b0] sm:$0xff] }
 0x44c   :  { %8670 = vmatpush1.bf16.msra.mxu1 %v10211_v33  ;;  %8343 = vmatprep.subr.bf16.mxu0 %v10218_v15  ;;  %v1924_v33 = vld [vmem:[#allocation8 + $0x1298] sm:$0xff]  ;;  %v10266_v37 = vcombine.high %v1923_v62, %v1927_v51 }
 0x44d   :  { %8671 = vmatprep.subr.bf16.mxu1 %v10220_v40  ;;  %v1928_v15 = vld [vmem:[#allocation8 + $0x12b8] sm:$0xff]  ;;  %v10257_v40 = vcombine.low %v1915_v7, %v1919_v44 }
 0x44e   :  { %v10268_v36 = vcombine.high %v1924_v33, %v1928_v15  ;;  %v10267_v25 = vcombine.low %v1924_v33, %v1928_v15  ;;  %v1971_v15 = vld [vmem:[#allocation8 + $0x1410] sm:$0xff] }
 0x44f   :  { %8344 = vmatpush1.bf16.msra.mxu0 %v10217_v46  ;;  %v1935_v46 = vld [vmem:[#allocation8 + $0x12f0] sm:$0xff] }
 0x450   :  { %8672 = vmatpush1.bf16.msra.mxu1 %v10219_v45  ;;  %8345 = vmatprep.subr.bf16.mxu0 %v10226_v4  ;;  %v1932_v45 = vld [vmem:[#allocation8 + $0x12d8] sm:$0xff]  ;;  %v10274_v13 = vcombine.high %v1931_v22, %v1935_v46 }
 0x451   :  { %8673 = vmatprep.subr.bf16.mxu1 %v10228_v58  ;;  %v1936_v4 = vld [vmem:[#allocation8 + $0x12f8] sm:$0xff]  ;;  %v10265_v58 = vcombine.low %v1923_v62, %v1927_v51 }
 0x452   :  { %v10276_v26 = vcombine.high %v1932_v45, %v1936_v4  ;;  %v10275_v34 = vcombine.low %v1932_v45, %v1936_v4  ;;  %v1979_v4 = vld [vmem:[#allocation8 + $0x1450] sm:$0xff] }
 0x453   :  { %8346 = vmatpush1.bf16.msra.mxu0 %v10225_v29  ;;  %v1943_v29 = vld [vmem:[#allocation8 + $0x1330] sm:$0xff] }
 0x454   :  { %8674 = vmatpush1.bf16.msra.mxu1 %v10227_v30  ;;  %8347 = vmatprep.subr.bf16.mxu0 %v10234_v32  ;;  %v1940_v30 = vld [vmem:[#allocation8 + $0x1318] sm:$0xff]  ;;  %v10282_v10 = vcombine.high %v1939_v28, %v1943_v29 }
 0x455   :  { %8675 = vmatprep.subr.bf16.mxu1 %v10236_v35  ;;  %v1944_v32 = vld [vmem:[#allocation8 + $0x1338] sm:$0xff]  ;;  %v10273_v35 = vcombine.low %v1931_v22, %v1935_v46 }
 0x456   :  { %v10284_v48 = vcombine.high %v1940_v30, %v1944_v32  ;;  %v10283_v55 = vcombine.low %v1940_v30, %v1944_v32  ;;  %v1987_v30 = vld [vmem:[#allocation8 + $0x1490] sm:$0xff] }
 0x457   :  { %8348 = vmatpush1.bf16.msra.mxu0 %v10233_v27  ;;  %v1951_v27 = vld [vmem:[#allocation8 + $0x1370] sm:$0xff] }
 0x458   :  { %8676 = vmatpush1.bf16.msra.mxu1 %v10235_v53  ;;  %8349 = vmatprep.subr.bf16.mxu0 %v10242_v54  ;;  %v1948_v53 = vld [vmem:[#allocation8 + $0x1358] sm:$0xff]  ;;  %v10290_v56 = vcombine.high %v1947_v52, %v1951_v27  ;;  %v1991_v32 = vld [vmem:[#allocation8 + $0x14b0] sm:$0xff] }
 0x459   :  { %8677 = vmatprep.subr.bf16.mxu1 %v10244_v9  ;;  %v1952_v54 = vld [vmem:[#allocation8 + $0x1378] sm:$0xff]  ;;  %v10281_v9 = vcombine.low %v1939_v28, %v1943_v29 }
 0x45a   :  { %v10292_v59 = vcombine.high %v1948_v53, %v1952_v54  ;;  %v10291_v7 = vcombine.low %v1948_v53, %v1952_v54  ;;  %v1995_v54 = vld [vmem:[#allocation8 + $0x14d0] sm:$0xff] }
 0x45b   :  { %8350 = vmatpush1.bf16.msra.mxu0 %v10241_v18  ;;  %v1959_v18 = vld [vmem:[#allocation8 + $0x13b0] sm:$0xff] }
 0x45c   :  { %8678 = vmatpush1.bf16.msra.mxu1 %v10243_v3  ;;  %8351 = vmatprep.subr.bf16.mxu0 %v10250_v5  ;;  %v1956_v3 = vld [vmem:[#allocation8 + $0x1398] sm:$0xff]  ;;  %v10298_v44 = vcombine.high %v1955_v63, %v1959_v18 }
 0x45d   :  { %8679 = vmatprep.subr.bf16.mxu1 %v10252_v14  ;;  %v1960_v5 = vld [vmem:[#allocation8 + $0x13b8] sm:$0xff]  ;;  %v10289_v14 = vcombine.low %v1947_v52, %v1951_v27  ;;  %v10330_v27 = vcombine.high %v1987_v30, %v1991_v32 }
 0x45e   :  { %v10300_v6 = vcombine.high %v1956_v3, %v1960_v5  ;;  %v10299_v62 = vcombine.low %v1956_v3, %v1960_v5  ;;  %v2003_v3 = vld [vmem:[#allocation8 + $0x1510] sm:$0xff] }
 0x45f   :  { %8352 = vmatpush1.bf16.msra.mxu0 %v10249_v11  ;;  %v1967_v11 = vld [vmem:[#allocation8 + $0x13f0] sm:$0xff] }
 0x460   :  { %8680 = vmatpush1.bf16.msra.mxu1 %v10251_v12  ;;  %8353 = vmatprep.subr.bf16.mxu0 %v10258_v39  ;;  %v1964_v12 = vld [vmem:[#allocation8 + $0x13d8] sm:$0xff]  ;;  %v10306_v51 = vcombine.high %v1963_v0, %v1967_v11  ;;  %v2007_v5 = vld [vmem:[#allocation8 + $0x1530] sm:$0xff] }
 0x461   :  { %8681 = vmatprep.subr.bf16.mxu1 %v10260_v16  ;;  %v1968_v39 = vld [vmem:[#allocation8 + $0x13f8] sm:$0xff]  ;;  %v10297_v16 = vcombine.low %v1955_v63, %v1959_v18 }
 0x462   :  { %v10308_v33 = vcombine.high %v1964_v12, %v1968_v39  ;;  %v10307_v22 = vcombine.low %v1964_v12, %v1968_v39  ;;  %v2015_v12 = vld [vmem:[#allocation8 + $0x1570] sm:$0xff]  ;;  %v2012_v39 = vld [vmem:[#allocation8 + $0x1558] sm:$0xff] }
 0x463   :  { %8354 = vmatpush1.bf16.msra.mxu0 %v10257_v40  ;;  %v1975_v40 = vld [vmem:[#allocation8 + $0x1430] sm:$0xff] }
 0x464   :  { %8682 = vmatpush1.bf16.msra.mxu1 %v10259_v21  ;;  %8355 = vmatprep.subr.bf16.mxu0 %v10266_v37  ;;  %v1972_v21 = vld [vmem:[#allocation8 + $0x1418] sm:$0xff]  ;;  %v10314_v46 = vcombine.high %v1971_v15, %v1975_v40 }
 0x465   :  { %8683 = vmatprep.subr.bf16.mxu1 %v10268_v36  ;;  %v1976_v37 = vld [vmem:[#allocation8 + $0x1438] sm:$0xff]  ;;  %v10305_v36 = vcombine.low %v1963_v0, %v1967_v11  ;;  %v2011_v11 = vld [vmem:[#allocation8 + $0x1550] sm:$0xff] }
 0x466   :  { %v10316_v45 = vcombine.high %v1972_v21, %v1976_v37  ;;  %v10315_v28 = vcombine.low %v1972_v21, %v1976_v37  ;;  %v2023_v21 = vld [vmem:[#allocation8 + $0x15b0] sm:$0xff]  ;;  %v2020_v37 = vld [vmem:[#allocation8 + $0x1598] sm:$0xff] }
 0x467   :  { %8356 = vmatpush1.bf16.msra.mxu0 %v10265_v58  ;;  %v1983_v58 = vld [vmem:[#allocation8 + $0x1470] sm:$0xff] }
 0x468   :  { %8684 = vmatpush1.bf16.msra.mxu1 %v10267_v25  ;;  %8357 = vmatprep.subr.bf16.mxu0 %v10274_v13  ;;  %v10313_v25 = vcombine.low %v1971_v15, %v1975_v40  ;;  %v1980_v13 = vld [vmem:[#allocation8 + $0x1458] sm:$0xff]  ;;  %v10322_v29 = vcombine.high %v1979_v4, %v1983_v58  ;;  %v2019_v40 = vld [vmem:[#allocation8 + $0x1590] sm:$0xff] }
 0x469   :  { %8685 = vmatprep.subr.bf16.mxu1 %v10276_v26  ;;  %v1984_v26 = vld [vmem:[#allocation8 + $0x1478] sm:$0xff] }
 0x46a   :  { %v10323_v52 = vcombine.low %v1980_v13, %v1984_v26 }
 0x46b   :  { %8358 = vmatpush1.bf16.msra.mxu0 %v10273_v35  ;;  %v10324_v35 = vcombine.high %v1980_v13, %v1984_v26  ;;  %v2028_v13 = vld [vmem:[#allocation8 + $0x15d8] sm:$0xff] }
 0x46c   :  { %8686 = vmatpush1.bf16.msra.mxu1 %v10275_v34  ;;  %8359 = vmatprep.subr.bf16.mxu0 %v10282_v10  ;;  %v1988_v34 = vld [vmem:[#allocation8 + $0x1498] sm:$0xff] }
 0x46d   :  { %8687 = vmatprep.subr.bf16.mxu1 %v10284_v48  ;;  %v1992_v10 = vld [vmem:[#allocation8 + $0x14b8] sm:$0xff]  ;;  %v10321_v48 = vcombine.low %v1979_v4, %v1983_v58  ;;  %v2027_v58 = vld [vmem:[#allocation8 + $0x15d0] sm:$0xff] }
 0x46e   :  { %v10332_v53 = vcombine.high %v1988_v34, %v1992_v10  ;;  %v2032_v26 = vld [vmem:[#allocation8 + $0x15f8] sm:$0xff] }
 0x46f   :  { %8360 = vmatpush1.bf16.msra.mxu0 %v10281_v9  ;;  %v1999_v9 = vld [vmem:[#allocation8 + $0x14f0] sm:$0xff] }
 0x470   :  { %8688 = vmatpush1.bf16.msra.mxu1 %v10283_v55  ;;  %8361 = vmatprep.subr.bf16.mxu0 %v10290_v56  ;;  %v1996_v55 = vld [vmem:[#allocation8 + $0x14d8] sm:$0xff]  ;;  %v10338_v63 = vcombine.high %v1995_v54, %v1999_v9 }
 0x471   :  { %8689 = vmatprep.subr.bf16.mxu1 %v10292_v59  ;;  %v2000_v56 = vld [vmem:[#allocation8 + $0x14f8] sm:$0xff]  ;;  %v10329_v59 = vcombine.low %v1987_v30, %v1991_v32  ;;  %v10372_v32 = vcombine.high %v2028_v13, %v2032_v26 }
 0x472   :  { %v10340_v18 = vcombine.high %v1996_v55, %v2000_v56 }
 0x473   :  { %8362 = vmatpush1.bf16.msra.mxu0 %v10289_v14  ;;  %v2004_v14 = vld [vmem:[#allocation8 + $0x1518] sm:$0xff] }
 0x474   :  { %8690 = vmatpush1.bf16.msra.mxu1 %v10291_v7  ;;  %8363 = vmatprep.subr.bf16.mxu0 %v10298_v44  ;;  %v2008_v7 = vld [vmem:[#allocation8 + $0x1538] sm:$0xff]  ;;  %v10339_v44 = vcombine.low %v1996_v55, %v2000_v56  ;;  %v2047_v55 = vld [vmem:[#allocation8 + $0x1670] sm:$0xff] }
 0x475   :  { %8691 = vmatprep.subr.bf16.mxu1 %v10300_v6  ;;  %v10346_v6 = vcombine.high %v2003_v3, %v2007_v5  ;;  %v10348_v0 = vcombine.high %v2004_v14, %v2008_v7  ;;  %v2044_v56 = vld [vmem:[#allocation8 + $0x1658] sm:$0xff] }
 0x477   :  { %8364 = vmatpush1.bf16.msra.mxu0 %v10297_v16  ;;  %v2016_v16 = vld [vmem:[#allocation8 + $0x1578] sm:$0xff] }
 0x478   :  { %8692 = vmatpush1.bf16.msra.mxu1 %v10299_v62  ;;  %8365 = vmatprep.subr.bf16.mxu0 %v10306_v51  ;;  %v10345_v62 = vcombine.low %v2003_v3, %v2007_v5  ;;  %v10347_v51 = vcombine.low %v2004_v14, %v2008_v7  ;;  %v10356_v15 = vcombine.high %v2012_v39, %v2016_v16  ;;  %v2051_v5 = vld [vmem:[#allocation8 + $0x1690] sm:$0xff]  ;;  %v2052_v7 = vld [vmem:[#allocation8 + $0x1698] sm:$0xff] }
 0x479   :  { %8693 = vmatprep.subr.bf16.mxu1 %v10308_v33  ;;  %v10354_v33 = vcombine.high %v2011_v11, %v2015_v12  ;;  %v2055_v14 = vld [vmem:[#allocation8 + $0x16b0] sm:$0xff] }
 0x47b   :  { %8366 = vmatpush1.bf16.msra.mxu0 %v10305_v36  ;;  %v2024_v36 = vld [vmem:[#allocation8 + $0x15b8] sm:$0xff] }
 0x47c   :  { %8694 = vmatpush1.bf16.msra.mxu1 %v10307_v22  ;;  %8376 = vmatprep.subr.bf16.mxu0 %v10314_v46  ;;  %v10353_v22 = vcombine.low %v2011_v11, %v2015_v12  ;;  %v10355_v46 = vcombine.low %v2012_v39, %v2016_v16  ;;  %v10364_v4 = vcombine.high %v2020_v37, %v2024_v36  ;;  %v2059_v12 = vld [vmem:[#allocation8 + $0x16d0] sm:$0xff]  ;;  %v2060_v16 = vld [vmem:[#allocation8 + $0x16d8] sm:$0xff] }
 0x47d   :  { %8704 = vmatprep.subr.bf16.mxu1 %v10316_v45  ;;  %v10362_v45 = vcombine.high %v2019_v40, %v2023_v21  ;;  %v2063_v39 = vld [vmem:[#allocation8 + $0x16f0] sm:$0xff] }
 0x47e   :  { %8368 = vmatmul.mubr.bf16.vlgmr.msra.gmra.mrb[20].mxu0 %v11529_v2 }
 0x47f   :  { %8696 = vmatmul.mubr.bf16.vlgmr.msra.gmra.mrb[20].mxu1 %v11529_v2  ;;  %8377 = vmatpush1.bf16.msra.mxu0 %v10313_v25  ;;  %v10331_v2 = vcombine.low %v1988_v34, %v1992_v10  ;;  %v2031_v25 = vld [vmem:[#allocation8 + $0x15f0] sm:$0xff]  ;;  %v2036_v10 = vld [vmem:[#allocation8 + $0x1618] sm:$0xff] }
 0x480   :  { %8408 = vmatprep.mubr.bf16.mxu0 %v11531_v8  ;;  %8705 = vmatpush1.bf16.msra.mxu1 %v10315_v28  ;;  %v10361_v28 = vcombine.low %v2019_v40, %v2023_v21  ;;  %v10370_v30 = vcombine.high %v2027_v58, %v2031_v25  ;;  %v2039_v34 = vld [vmem:[#allocation8 + $0x1630] sm:$0xff] }
 0x481   :  { %8736 = vmatprep.mubr.bf16.mxu1 %v11531_v8  ;;  %8378 = vmatprep.subr.bf16.mxu0 %v10322_v29  ;;  %v10337_v8 = vcombine.low %v1995_v54, %v1999_v9  ;;  %v10363_v29 = vcombine.low %v2020_v37, %v2024_v36  ;;  %v2043_v9 = vld [vmem:[#allocation8 + $0x1650] sm:$0xff]  ;;  %v2068_v36 = vld [vmem:[#allocation8 + $0x1718] sm:$0xff] }
 0x482   :  { %8706 = vmatprep.subr.bf16.mxu1 %v10324_v35  ;;  %v2035_v35 = vld [vmem:[#allocation8 + $0x1610] sm:$0xff] }
 0x483   :  { %8379 = vmatpush1.bf16.msra.mxu0 %v10321_v48  ;;  %v2040_v48 = vld [vmem:[#allocation8 + $0x1638] sm:$0xff]  ;;  %v2067_v21 = vld [vmem:[#allocation8 + $0x1710] sm:$0xff] }
 0x484   :  { %8707 = vmatpush1.bf16.msra.mxu1 %v10323_v52  ;;  %8380 = vmatprep.subr.bf16.mxu0 %v10330_v27  ;;  %v10369_v52 = vcombine.low %v2027_v58, %v2031_v25  ;;  %v10371_v27 = vcombine.low %v2028_v13, %v2032_v26  ;;  %v10380_v54 = vcombine.high %v2036_v10, %v2040_v48  ;;  %v2071_v37 = vld [vmem:[#allocation8 + $0x1730] sm:$0xff]  ;;  %v2076_v26 = vld [vmem:[#allocation8 + $0x1758] sm:$0xff] }
 0x485   :  { %8708 = vmatprep.subr.bf16.mxu1 %v10332_v53  ;;  %v10378_v53 = vcombine.high %v2035_v35, %v2039_v34  ;;  %v2075_v25 = vld [vmem:[#allocation8 + $0x1750] sm:$0xff] }
 0x486   :  { %v2079_v13 = vld [vmem:[#allocation8 + $0x1770] sm:$0xff] }
 0x487   :  { %8381 = vmatpush1.bf16.msra.mxu0 %v10329_v59  ;;  %v2048_v59 = vld [vmem:[#allocation8 + $0x1678] sm:$0xff] }
 0x488   :  { %8709 = vmatpush1.bf16.msra.mxu1 %v10331_v2  ;;  %8382 = vmatprep.subr.bf16.mxu0 %v10338_v63  ;;  %v10377_v2 = vcombine.low %v2035_v35, %v2039_v34  ;;  %v10379_v63 = vcombine.low %v2036_v10, %v2040_v48  ;;  %v10388_v3 = vcombine.high %v2044_v56, %v2048_v59  ;;  %v2083_v34 = vld [vmem:[#allocation8 + $0x1790] sm:$0xff]  ;;  %v2084_v48 = vld [vmem:[#allocation8 + $0x1798] sm:$0xff] }
 0x489   :  { %8710 = vmatprep.subr.bf16.mxu1 %v10340_v18  ;;  %v10386_v18 = vcombine.high %v2043_v9, %v2047_v55  ;;  %v2087_v10 = vld [vmem:[#allocation8 + $0x17b0] sm:$0xff] }
 0x48b   :  { %8383 = vmatpush1.bf16.msra.mxu0 %v10337_v8  ;;  %v2056_v8 = vld [vmem:[#allocation8 + $0x16b8] sm:$0xff] }
 0x48c   :  { %8711 = vmatpush1.bf16.msra.mxu1 %v10339_v44  ;;  %8384 = vmatprep.subr.bf16.mxu0 %v10346_v6  ;;  %v10385_v44 = vcombine.low %v2043_v9, %v2047_v55  ;;  %v10387_v6 = vcombine.low %v2044_v56, %v2048_v59  ;;  %v10396_v11 = vcombine.high %v2052_v7, %v2056_v8  ;;  %v2091_v55 = vld [vmem:[#allocation8 + $0x17d0] sm:$0xff]  ;;  %v2092_v59 = vld [vmem:[#allocation8 + $0x17d8] sm:$0xff] }
 0x48d   :  { %8712 = vmatprep.subr.bf16.mxu1 %v10348_v0  ;;  %v10394_v0 = vcombine.high %v2051_v5, %v2055_v14  ;;  %v2095_v56 = vld [vmem:[#allocation8 + $0x17f0] sm:$0xff] }
 0x48f   :  { %8385 = vmatpush1.bf16.msra.mxu0 %v10345_v62  ;;  %v2064_v62 = vld [vmem:[#allocation8 + $0x16f8] sm:$0xff] }
 0x490   :  { %8713 = vmatpush1.bf16.msra.mxu1 %v10347_v51  ;;  %8386 = vmatprep.subr.bf16.mxu0 %v10354_v33  ;;  %v10393_v51 = vcombine.low %v2051_v5, %v2055_v14  ;;  %v10395_v33 = vcombine.low %v2052_v7, %v2056_v8  ;;  %v10404_v40 = vcombine.high %v2060_v16, %v2064_v62  ;;  %v2099_v14 = vld [vmem:[#allocation8 + $0x1810] sm:$0xff]  ;;  %v2100_v8 = vld [vmem:[#allocation8 + $0x1818] sm:$0xff] }
 0x491   :  { %8714 = vmatprep.subr.bf16.mxu1 %v10356_v15  ;;  %v10402_v15 = vcombine.high %v2059_v12, %v2063_v39  ;;  %v2103_v7 = vld [vmem:[#allocation8 + $0x1830] sm:$0xff] }
 0x493   :  { %8387 = vmatpush1.bf16.msra.mxu0 %v10353_v22  ;;  %v2072_v22 = vld [vmem:[#allocation8 + $0x1738] sm:$0xff] }
 0x494   :  { %8715 = vmatpush1.bf16.msra.mxu1 %v10355_v46  ;;  %8388 = vmatprep.subr.bf16.mxu0 %v10362_v45  ;;  %v10401_v46 = vcombine.low %v2059_v12, %v2063_v39  ;;  %v10403_v45 = vcombine.low %v2060_v16, %v2064_v62  ;;  %v10412_v58 = vcombine.high %v2068_v36, %v2072_v22  ;;  %v2107_v39 = vld [vmem:[#allocation8 + $0x1850] sm:$0xff] }
 0x495   :  { %8716 = vmatprep.subr.bf16.mxu1 %v10364_v4  ;;  %v10410_v4 = vcombine.high %v2067_v21, %v2071_v37  ;;  %v2111_v16 = vld [vmem:[#allocation8 + $0x1870] sm:$0xff]  ;;  %v10441_v62 = vcombine.low %v2099_v14, %v2103_v7 }
 0x497   :  { %8389 = vmatpush1.bf16.msra.mxu0 %v10361_v28  ;;  %v2080_v28 = vld [vmem:[#allocation8 + $0x1778] sm:$0xff] }
 0x498   :  { %8717 = vmatpush1.bf16.msra.mxu1 %v10363_v29  ;;  %8390 = vmatprep.subr.bf16.mxu0 %v10370_v30  ;;  %v10409_v29 = vcombine.low %v2067_v21, %v2071_v37  ;;  %v10411_v30 = vcombine.low %v2068_v36, %v2072_v22  ;;  %v10420_v35 = vcombine.high %v2076_v26, %v2080_v28  ;;  %v2115_v21 = vld [vmem:[#allocation8 + $0x1890] sm:$0xff]  ;;  %v2116_v22 = vld [vmem:[#allocation8 + $0x1898] sm:$0xff] }
 0x499   :  { %8718 = vmatprep.subr.bf16.mxu1 %v10372_v32  ;;  %v10418_v32 = vcombine.high %v2075_v25, %v2079_v13  ;;  %v2119_v37 = vld [vmem:[#allocation8 + $0x18b0] sm:$0xff] }
 0x49b   :  { %8391 = vmatpush1.bf16.msra.mxu0 %v10369_v52  ;;  %v2088_v52 = vld [vmem:[#allocation8 + $0x17b8] sm:$0xff] }
 0x49c   :  { %8719 = vmatpush1.bf16.msra.mxu1 %v10371_v27  ;;  %8392 = vmatprep.subr.bf16.mxu0 %v10378_v53  ;;  %v10417_v27 = vcombine.low %v2075_v25, %v2079_v13  ;;  %v10419_v53 = vcombine.low %v2076_v26, %v2080_v28  ;;  %v10428_v9 = vcombine.high %v2084_v48, %v2088_v52  ;;  %v2123_v13 = vld [vmem:[#allocation8 + $0x18d0] sm:$0xff]  ;;  %v2124_v28 = vld [vmem:[#allocation8 + $0x18d8] sm:$0xff] }
 0x49d   :  { %8720 = vmatprep.subr.bf16.mxu1 %v10380_v54  ;;  %v10426_v54 = vcombine.high %v2083_v34, %v2087_v10  ;;  %v2127_v26 = vld [vmem:[#allocation8 + $0x18f0] sm:$0xff] }
 0x49f   :  { %8393 = vmatpush1.bf16.msra.mxu0 %v10377_v2  ;;  %v2096_v2 = vld [vmem:[#allocation8 + $0x17f8] sm:$0xff] }
 0x4a0   :  { %8721 = vmatpush1.bf16.msra.mxu1 %v10379_v63  ;;  %8394 = vmatprep.subr.bf16.mxu0 %v10386_v18  ;;  %v10425_v63 = vcombine.low %v2083_v34, %v2087_v10  ;;  %v10427_v18 = vcombine.low %v2084_v48, %v2088_v52  ;;  %v10436_v5 = vcombine.high %v2092_v59, %v2096_v2  ;;  %v2131_v34 = vld [vmem:[#allocation8 + $0x1910] sm:$0xff]  ;;  %v2132_v48 = vld [vmem:[#allocation8 + $0x1918] sm:$0xff] }
 0x4a1   :  { %8722 = vmatprep.subr.bf16.mxu1 %v10388_v3  ;;  %v10434_v3 = vcombine.high %v2091_v55, %v2095_v56  ;;  %v2135_v10 = vld [vmem:[#allocation8 + $0x1930] sm:$0xff]  ;;  %v2136_v52 = vld [vmem:[#allocation8 + $0x1938] sm:$0xff] }
 0x4a3   :  { %8395 = vmatpush1.bf16.msra.mxu0 %v10385_v44  ;;  %v2104_v44 = vld [vmem:[#allocation8 + $0x1838] sm:$0xff] }
 0x4a4   :  { %8723 = vmatpush1.bf16.msra.mxu1 %v10387_v6  ;;  %8396 = vmatprep.subr.bf16.mxu0 %v10394_v0  ;;  %v10433_v6 = vcombine.low %v2091_v55, %v2095_v56  ;;  %v10435_v0 = vcombine.low %v2092_v59, %v2096_v2  ;;  %v10444_v12 = vcombine.high %v2100_v8, %v2104_v44  ;;  %v2143_v55 = vld [vmem:[#allocation8 + $0x1970] sm:$0xff]  ;;  %v2140_v56 = vld [vmem:[#allocation8 + $0x1958] sm:$0xff] }
 0x4a5   :  { %8724 = vmatprep.subr.bf16.mxu1 %v10396_v11  ;;  %v10442_v11 = vcombine.high %v2099_v14, %v2103_v7  ;;  %v2144_v59 = vld [vmem:[#allocation8 + $0x1978] sm:$0xff]  ;;  %v10473_v2 = vcombine.low %v2131_v34, %v2135_v10  ;;  %v2151_v14 = vld [vmem:[#allocation8 + $0x19b0] sm:$0xff] }
 0x4a6   :  { %v2148_v7 = vld [vmem:[#allocation8 + $0x1998] sm:$0xff] }
 0x4a7   :  { %8397 = vmatpush1.bf16.msra.mxu0 %v10393_v51  ;;  %v2108_v51 = vld [vmem:[#allocation8 + $0x1858] sm:$0xff] }
 0x4a8   :  { %8725 = vmatpush1.bf16.msra.mxu1 %v10395_v33  ;;  %8398 = vmatprep.subr.bf16.mxu0 %v10402_v15  ;;  %v2112_v33 = vld [vmem:[#allocation8 + $0x1878] sm:$0xff]  ;;  %v10443_v15 = vcombine.low %v2100_v8, %v2104_v44 }
 0x4a9   :  { %8726 = vmatprep.subr.bf16.mxu1 %v10404_v40  ;;  %v10450_v40 = vcombine.high %v2107_v39, %v2111_v16  ;;  %v10452_v36 = vcombine.high %v2108_v51, %v2112_v33  ;;  %v2152_v8 = vld [vmem:[#allocation8 + $0x19b8] sm:$0xff] }
 0x4ab   :  { %8399 = vmatpush1.bf16.msra.mxu0 %v10401_v46  ;;  %v2120_v46 = vld [vmem:[#allocation8 + $0x18b8] sm:$0xff] }
 0x4ac   :  { %8727 = vmatpush1.bf16.msra.mxu1 %v10403_v45  ;;  %8400 = vmatprep.subr.bf16.mxu0 %v10410_v4  ;;  %v10449_v45 = vcombine.low %v2107_v39, %v2111_v16  ;;  %v10451_v4 = vcombine.low %v2108_v51, %v2112_v33  ;;  %v10460_v25 = vcombine.high %v2116_v22, %v2120_v46  ;;  %v2159_v39 = vld [vmem:[#allocation8 + $0x19f0] sm:$0xff]  ;;  %v2156_v16 = vld [vmem:[#allocation8 + $0x19d8] sm:$0xff] }
 0x4ad   :  { %8728 = vmatprep.subr.bf16.mxu1 %v10412_v58  ;;  %v10458_v58 = vcombine.high %v2115_v21, %v2119_v37  ;;  %v10491_v33 = vcombine.low %v2148_v7, %v2152_v8 }
 0x4af   :  { %8401 = vmatpush1.bf16.msra.mxu0 %v10409_v29  ;;  %v2128_v29 = vld [vmem:[#allocation8 + $0x18f8] sm:$0xff] }
 0x4b0   :  { %8729 = vmatpush1.bf16.msra.mxu1 %v10411_v30  ;;  %8402 = vmatprep.subr.bf16.mxu0 %v10418_v32  ;;  %v10457_v30 = vcombine.low %v2115_v21, %v2119_v37  ;;  %v10466_v32 = vcombine.high %v2123_v13, %v2127_v26  ;;  %v2163_v21 = vld [vmem:[#allocation8 + $0x1a10] sm:$0xff] }
 0x4b1   :  { %8730 = vmatprep.subr.bf16.mxu1 %v10420_v35  ;;  %v10468_v35 = vcombine.high %v2124_v28, %v2128_v29  ;;  %v2167_v37 = vld [vmem:[#allocation8 + $0x1a30] sm:$0xff] }
 0x4b3   :  { %8403 = vmatpush1.bf16.msra.mxu0 %v10417_v27  ;;  %v10467_v27 = vcombine.low %v2124_v28, %v2128_v29  ;;  %v2176_v28 = vld [vmem:[#allocation8 + $0x1a78] sm:$0xff]  ;;  %v10505_v29 = vcombine.low %v2163_v21, %v2167_v37 }
 0x4b4   :  { %8731 = vmatpush1.bf16.msra.mxu1 %v10419_v53  ;;  %8404 = vmatprep.subr.bf16.mxu0 %v10426_v54  ;;  %v10474_v53 = vcombine.high %v2131_v34, %v2135_v10  ;;  %v10476_v54 = vcombine.high %v2132_v48, %v2136_v52  ;;  %v2183_v34 = vld [vmem:[#allocation8 + $0x1ab0] sm:$0xff]  ;;  %v2180_v10 = vld [vmem:[#allocation8 + $0x1a98] sm:$0xff] }
 0x4b5   :  { %8732 = vmatprep.subr.bf16.mxu1 %v10428_v9  ;;  %v2139_v9 = vld [vmem:[#allocation8 + $0x1950] sm:$0xff] }
 0x4b6   :  { %v10481_v44 = vcombine.low %v2139_v9, %v2143_v55 }
 0x4b7   :  { %8405 = vmatpush1.bf16.msra.mxu0 %v10425_v63  ;;  %v10475_v63 = vcombine.low %v2132_v48, %v2136_v52  ;;  %v2184_v48 = vld [vmem:[#allocation8 + $0x1ab8] sm:$0xff] }
 0x4b8   :  { %8733 = vmatpush1.bf16.msra.mxu1 %v10427_v18  ;;  %8406 = vmatprep.subr.bf16.mxu0 %v10434_v3  ;;  %v10482_v18 = vcombine.high %v2139_v9, %v2143_v55  ;;  %v10484_v3 = vcombine.high %v2140_v56, %v2144_v59  ;;  %v2191_v9 = vld [vmem:[#allocation8 + $0x1af0] sm:$0xff]  ;;  %v2188_v55 = vld [vmem:[#allocation8 + $0x1ad8] sm:$0xff] }
 0x4b9   :  { %8734 = vmatprep.subr.bf16.mxu1 %v10436_v5  ;;  %v2147_v5 = vld [vmem:[#allocation8 + $0x1990] sm:$0xff] }
 0x4ba   :  { %v10489_v51 = vcombine.low %v2147_v5, %v2151_v14 }
 0x4bb   :  { %8407 = vmatpush1.bf16.msra.mxu0 %v10433_v6  ;;  %v10483_v6 = vcombine.low %v2140_v56, %v2144_v59  ;;  %v2192_v56 = vld [vmem:[#allocation8 + $0x1af8] sm:$0xff] }
 0x4bc   :  { %8735 = vmatpush1.bf16.msra.mxu1 %v10435_v0  ;;  %8417 = vmatprep.subr.bf16.mxu0 %v10442_v11  ;;  %v10490_v0 = vcombine.high %v2147_v5, %v2151_v14  ;;  %v10492_v11 = vcombine.high %v2148_v7, %v2152_v8  ;;  %v2199_v5 = vld [vmem:[#allocation8 + $0x1b30] sm:$0xff]  ;;  %v2196_v14 = vld [vmem:[#allocation8 + $0x1b18] sm:$0xff] }
 0x4bd   :  { %8745 = vmatprep.subr.bf16.mxu1 %v10444_v12  ;;  %v2155_v12 = vld [vmem:[#allocation8 + $0x19d0] sm:$0xff]  ;;  %v2200_v7 = vld [vmem:[#allocation8 + $0x1b38] sm:$0xff] }
 0x4be   :  { %8409 = vmatmul.mubr.bf16.vlgmr.msra.gmra.mrb[20].mxu0 %v11539_v20 }
 0x4bf   :  { %8737 = vmatmul.mubr.bf16.vlgmr.msra.gmra.mrb[20].mxu1 %v11539_v20  ;;  %8418 = vmatpush1.bf16.msra.mxu0 %v10441_v62  ;;  %v10459_v20 = vcombine.low %v2116_v22, %v2120_v46  ;;  %v2160_v62 = vld [vmem:[#allocation8 + $0x19f8] sm:$0xff]  ;;  %v10497_v46 = vcombine.low %v2155_v12, %v2159_v39 }
 0x4c0   :  { %8449 = vmatprep.mubr.bf16.mxu0 %v11541_v24  ;;  %8746 = vmatpush1.bf16.msra.mxu1 %v10443_v15  ;;  %v10498_v15 = vcombine.high %v2155_v12, %v2159_v39  ;;  %v2168_v22 = vld [vmem:[#allocation8 + $0x1a38] sm:$0xff]  ;;  %v2207_v12 = vld [vmem:[#allocation8 + $0x1b70] sm:$0xff] }
 0x4c1   :  { %8777 = vmatprep.mubr.bf16.mxu1 %v11541_v24  ;;  %8419 = vmatprep.subr.bf16.mxu0 %v10450_v40  ;;  %v10465_v24 = vcombine.low %v2123_v13, %v2127_v26  ;;  %v10500_v40 = vcombine.high %v2156_v16, %v2160_v62  ;;  %v2175_v13 = vld [vmem:[#allocation8 + $0x1a70] sm:$0xff]  ;;  %v2172_v26 = vld [vmem:[#allocation8 + $0x1a58] sm:$0xff] }
 0x4c2   :  { %8747 = vmatprep.subr.bf16.mxu1 %v10452_v36  ;;  %v2164_v36 = vld [vmem:[#allocation8 + $0x1a18] sm:$0xff] }
 0x4c3   :  { %8420 = vmatpush1.bf16.msra.mxu0 %v10449_v45  ;;  %v10499_v45 = vcombine.low %v2156_v16, %v2160_v62  ;;  %v2204_v39 = vld [vmem:[#allocation8 + $0x1b58] sm:$0xff] }
 0x4c4   :  { %8748 = vmatpush1.bf16.msra.mxu1 %v10451_v4  ;;  %8421 = vmatprep.subr.bf16.mxu0 %v10458_v58  ;;  %v10506_v4 = vcombine.high %v2163_v21, %v2167_v37  ;;  %v10508_v58 = vcombine.high %v2164_v36, %v2168_v22  ;;  %v2208_v16 = vld [vmem:[#allocation8 + $0x1b78] sm:$0xff]  ;;  %v2215_v21 = vld [vmem:[#allocation8 + $0x1bb0] sm:$0xff] }
 0x4c5   :  { %8749 = vmatprep.subr.bf16.mxu1 %v10460_v25  ;;  %v2171_v25 = vld [vmem:[#allocation8 + $0x1a50] sm:$0xff]  ;;  %v2212_v37 = vld [vmem:[#allocation8 + $0x1b98] sm:$0xff] }
 0x4c6   :  { %v10513_v52 = vcombine.low %v2171_v25, %v2175_v13 }
 0x4c7   :  { %8422 = vmatpush1.bf16.msra.mxu0 %v10457_v30  ;;  %v10507_v30 = vcombine.low %v2164_v36, %v2168_v22  ;;  %v2216_v36 = vld [vmem:[#allocation8 + $0x1bb8] sm:$0xff] }
 0x4c8   :  { %8750 = vmatpush1.bf16.msra.mxu1 %v10459_v20  ;;  %8423 = vmatprep.subr.bf16.mxu0 %v10466_v32  ;;  %v10514_v20 = vcombine.high %v2171_v25, %v2175_v13  ;;  %v10516_v32 = vcombine.high %v2172_v26, %v2176_v28  ;;  %v2223_v25 = vld [vmem:[#allocation8 + $0x1bf0] sm:$0xff]  ;;  %v2220_v13 = vld [vmem:[#allocation8 + $0x1bd8] sm:$0xff] }
 0x4c9   :  { %8751 = vmatprep.subr.bf16.mxu1 %v10468_v35  ;;  %v2179_v35 = vld [vmem:[#allocation8 + $0x1a90] sm:$0xff] }
 0x4ca   :  { %v10521_v59 = vcombine.low %v2179_v35, %v2183_v34 }
 0x4cb   :  { %8424 = vmatpush1.bf16.msra.mxu0 %v10465_v24  ;;  %v10515_v24 = vcombine.low %v2172_v26, %v2176_v28  ;;  %v2224_v26 = vld [vmem:[#allocation8 + $0x1bf8] sm:$0xff] }
 0x4cc   :  { %8752 = vmatpush1.bf16.msra.mxu1 %v10467_v27  ;;  %8425 = vmatprep.subr.bf16.mxu0 %v10474_v53  ;;  %v10522_v27 = vcombine.high %v2179_v35, %v2183_v34  ;;  %v10524_v53 = vcombine.high %v2180_v10, %v2184_v48  ;;  %v2231_v35 = vld [vmem:[#allocation8 + $0x1c30] sm:$0xff]  ;;  %v2228_v34 = vld [vmem:[#allocation8 + $0x1c18] sm:$0xff] }
 0x4cd   :  { %8753 = vmatprep.subr.bf16.mxu1 %v10476_v54  ;;  %v2187_v54 = vld [vmem:[#allocation8 + $0x1ad0] sm:$0xff] }
 0x4ce   :  { %v10529_v8 = vcombine.low %v2187_v54, %v2191_v9 }
 0x4cf   :  { %8426 = vmatpush1.bf16.msra.mxu0 %v10473_v2  ;;  %v10523_v2 = vcombine.low %v2180_v10, %v2184_v48  ;;  %v2232_v10 = vld [vmem:[#allocation8 + $0x1c38] sm:$0xff] }
 0x4d0   :  { %8754 = vmatpush1.bf16.msra.mxu1 %v10475_v63  ;;  %8427 = vmatprep.subr.bf16.mxu0 %v10482_v18  ;;  %v10530_v63 = vcombine.high %v2187_v54, %v2191_v9  ;;  %v10532_v18 = vcombine.high %v2188_v55, %v2192_v56  ;;  %v2239_v54 = vld [vmem:[#allocation8 + $0x1c70] sm:$0xff] }
 0x4d1   :  { %8755 = vmatprep.subr.bf16.mxu1 %v10484_v3  ;;  %v2195_v3 = vld [vmem:[#allocation8 + $0x1b10] sm:$0xff] }
 0x4d2   :  { %v10537_v62 = vcombine.low %v2195_v3, %v2199_v5 }
 0x4d3   :  { %8428 = vmatpush1.bf16.msra.mxu0 %v10481_v44  ;;  %v10531_v44 = vcombine.low %v2188_v55, %v2192_v56  ;;  %v2236_v55 = vld [vmem:[#allocation8 + $0x1c58] sm:$0xff] }
 0x4d4   :  { %8756 = vmatpush1.bf16.msra.mxu1 %v10483_v6  ;;  %8429 = vmatprep.subr.bf16.mxu0 %v10490_v0  ;;  %v10538_v6 = vcombine.high %v2195_v3, %v2199_v5  ;;  %v10540_v0 = vcombine.high %v2196_v14, %v2200_v7  ;;  %v2240_v56 = vld [vmem:[#allocation8 + $0x1c78] sm:$0xff] }
 0x4d5   :  { %8757 = vmatprep.subr.bf16.mxu1 %v10492_v11  ;;  %v2203_v11 = vld [vmem:[#allocation8 + $0x1b50] sm:$0xff]  ;;  %v10580_v3 = vcombine.high %v2236_v55, %v2240_v56  ;;  %v2244_v5 = vld [vmem:[#allocation8 + $0x1c98] sm:$0xff] }
 0x4d6   :  { %v10545_v22 = vcombine.low %v2203_v11, %v2207_v12 }
 0x4d7   :  { %8430 = vmatpush1.bf16.msra.mxu0 %v10489_v51  ;;  %v10539_v51 = vcombine.low %v2196_v14, %v2200_v7  ;;  %v2248_v14 = vld [vmem:[#allocation8 + $0x1cb8] sm:$0xff] }
 0x4d8   :  { %8758 = vmatpush1.bf16.msra.mxu1 %v10491_v33  ;;  %8431 = vmatprep.subr.bf16.mxu0 %v10498_v15  ;;  %v10546_v33 = vcombine.high %v2203_v11, %v2207_v12  ;;  %v10548_v15 = vcombine.high %v2204_v39, %v2208_v16  ;;  %v2255_v11 = vld [vmem:[#allocation8 + $0x1cf0] sm:$0xff]  ;;  %v2252_v12 = vld [vmem:[#allocation8 + $0x1cd8] sm:$0xff] }
 0x4d9   :  { %8759 = vmatprep.subr.bf16.mxu1 %v10500_v40  ;;  %v2211_v40 = vld [vmem:[#allocation8 + $0x1b90] sm:$0xff] }
 0x4da   :  { %v10553_v28 = vcombine.low %v2211_v40, %v2215_v21 }
 0x4db   :  { %8432 = vmatpush1.bf16.msra.mxu0 %v10497_v46  ;;  %v10547_v46 = vcombine.low %v2204_v39, %v2208_v16  ;;  %v2256_v39 = vld [vmem:[#allocation8 + $0x1cf8] sm:$0xff] }
 0x4dc   :  { %8760 = vmatpush1.bf16.msra.mxu1 %v10499_v45  ;;  %8433 = vmatprep.subr.bf16.mxu0 %v10506_v4  ;;  %v10554_v45 = vcombine.high %v2211_v40, %v2215_v21  ;;  %v10556_v4 = vcombine.high %v2212_v37, %v2216_v36  ;;  %v2260_v40 = vld [vmem:[#allocation8 + $0x1d18] sm:$0xff] }
 0x4dd   :  { %8761 = vmatprep.subr.bf16.mxu1 %v10508_v58  ;;  %v2219_v58 = vld [vmem:[#allocation8 + $0x1bd0] sm:$0xff]  ;;  %v2264_v21 = vld [vmem:[#allocation8 + $0x1d38] sm:$0xff] }
 0x4de   :  { %v10561_v48 = vcombine.low %v2219_v58, %v2223_v25 }
 0x4df   :  { %8434 = vmatpush1.bf16.msra.mxu0 %v10505_v29  ;;  %v10555_v29 = vcombine.low %v2212_v37, %v2216_v36  ;;  %v10595_v37 = vcombine.low %v2252_v12, %v2256_v39 }
 0x4e0   :  { %8762 = vmatpush1.bf16.msra.mxu1 %v10507_v30  ;;  %8435 = vmatprep.subr.bf16.mxu0 %v10514_v20  ;;  %v10562_v30 = vcombine.high %v2219_v58, %v2223_v25  ;;  %v10564_v20 = vcombine.high %v2220_v13, %v2224_v26  ;;  %v2272_v58 = vld [vmem:[#allocation8 + $0x1d78] sm:$0xff] }
 0x4e1   :  { %8763 = vmatprep.subr.bf16.mxu1 %v10516_v32  ;;  %v2227_v32 = vld [vmem:[#allocation8 + $0x1c10] sm:$0xff] }
 0x4e2   :  { %v10569_v9 = vcombine.low %v2227_v32, %v2231_v35 }
 0x4e3   :  { %8436 = vmatpush1.bf16.msra.mxu0 %v10513_v52  ;;  %v10563_v52 = vcombine.low %v2220_v13, %v2224_v26  ;;  %v10603_v13 = vcombine.low %v2260_v40, %v2264_v21 }
 0x4e4   :  { %8764 = vmatpush1.bf16.msra.mxu1 %v10515_v24  ;;  %8437 = vmatprep.subr.bf16.mxu0 %v10522_v27  ;;  %v10570_v24 = vcombine.high %v2227_v32, %v2231_v35  ;;  %v10572_v27 = vcombine.high %v2228_v34, %v2232_v10  ;;  %v2280_v32 = vld [vmem:[#allocation8 + $0x1db8] sm:$0xff] }
 0x4e5   :  { %8765 = vmatprep.subr.bf16.mxu1 %v10524_v53  ;;  %v2235_v53 = vld [vmem:[#allocation8 + $0x1c50] sm:$0xff] }
 0x4e6   :  { %v10577_v7 = vcombine.low %v2235_v53, %v2239_v54 }
 0x4e7   :  { %8438 = vmatpush1.bf16.msra.mxu0 %v10521_v59  ;;  %v10571_v59 = vcombine.low %v2228_v34, %v2232_v10 }
 0x4e8   :  { %8766 = vmatpush1.bf16.msra.mxu1 %v10523_v2  ;;  %8439 = vmatprep.subr.bf16.mxu0 %v10530_v63  ;;  %v10578_v2 = vcombine.high %v2235_v53, %v2239_v54  ;;  %v2243_v63 = vld [vmem:[#allocation8 + $0x1c90] sm:$0xff]  ;;  %v2288_v53 = vld [vmem:[#allocation8 + $0x1df8] sm:$0xff] }
 0x4e9   :  { %8767 = vmatprep.subr.bf16.mxu1 %v10532_v18  ;;  %v2247_v18 = vld [vmem:[#allocation8 + $0x1cb0] sm:$0xff] }
 0x4ea   :  { %v10585_v16 = vcombine.low %v2243_v63, %v2247_v18 }
 0x4eb   :  { %8440 = vmatpush1.bf16.msra.mxu0 %v10529_v8  ;;  %v10579_v8 = vcombine.low %v2236_v55, %v2240_v56 }
 0x4ec   :  { %8768 = vmatpush1.bf16.msra.mxu1 %v10531_v44  ;;  %8441 = vmatprep.subr.bf16.mxu0 %v10538_v6  ;;  %v10586_v44 = vcombine.high %v2243_v63, %v2247_v18  ;;  %v10588_v6 = vcombine.high %v2244_v5, %v2248_v14  ;;  %v2292_v63 = vld [vmem:[#allocation8 + $0x1e18] sm:$0xff] }
 0x4ed   :  { %8769 = vmatprep.subr.bf16.mxu1 %v10540_v0  ;;  %v2251_v0 = vld [vmem:[#allocation8 + $0x1cd0] sm:$0xff]  ;;  %v2296_v18 = vld [vmem:[#allocation8 + $0x1e38] sm:$0xff] }
 0x4ef   :  { %8442 = vmatpush1.bf16.msra.mxu0 %v10537_v62  ;;  %v10594_v62 = vcombine.high %v2251_v0, %v2255_v11 }
 0x4f0   :  { %8770 = vmatpush1.bf16.msra.mxu1 %v10539_v51  ;;  %8443 = vmatprep.subr.bf16.mxu0 %v10546_v33  ;;  %v10596_v51 = vcombine.high %v2252_v12, %v2256_v39  ;;  %v2259_v33 = vld [vmem:[#allocation8 + $0x1d10] sm:$0xff]  ;;  %v10635_v12 = vcombine.low %v2292_v63, %v2296_v18 }
 0x4f1   :  { %8771 = vmatprep.subr.bf16.mxu1 %v10548_v15  ;;  %v2263_v15 = vld [vmem:[#allocation8 + $0x1d30] sm:$0xff] }
 0x4f2   :  { %v10602_v36 = vcombine.high %v2259_v33, %v2263_v15  ;;  %v10601_v25 = vcombine.low %v2259_v33, %v2263_v15  ;;  %v2312_v33 = vld [vmem:[#allocation8 + $0x1eb8] sm:$0xff] }
 0x4f3   :  { %8444 = vmatpush1.bf16.msra.mxu0 %v10545_v22  ;;  %v10604_v22 = vcombine.high %v2260_v40, %v2264_v21 }
 0x4f4   :  { %8772 = vmatpush1.bf16.msra.mxu1 %v10547_v46  ;;  %8445 = vmatprep.subr.bf16.mxu0 %v10554_v45  ;;  %v2267_v46 = vld [vmem:[#allocation8 + $0x1d50] sm:$0xff] }
 0x4f5   :  { %8773 = vmatprep.subr.bf16.mxu1 %v10556_v4  ;;  %v2271_v45 = vld [vmem:[#allocation8 + $0x1d70] sm:$0xff]  ;;  %v2268_v4 = vld [vmem:[#allocation8 + $0x1d58] sm:$0xff] }
 0x4f6   :  { %v10610_v26 = vcombine.high %v2267_v46, %v2271_v45  ;;  %v10609_v35 = vcombine.low %v2267_v46, %v2271_v45  ;;  %v10611_v34 = vcombine.low %v2268_v4, %v2272_v58  ;;  %v2320_v46 = vld [vmem:[#allocation8 + $0x1ef8] sm:$0xff] }
 0x4f7   :  { %8446 = vmatpush1.bf16.msra.mxu0 %v10553_v28  ;;  %v10612_v28 = vcombine.high %v2268_v4, %v2272_v58 }
 0x4f8   :  { %8774 = vmatpush1.bf16.msra.mxu1 %v10555_v29  ;;  %8447 = vmatprep.subr.bf16.mxu0 %v10562_v30  ;;  %v2275_v29 = vld [vmem:[#allocation8 + $0x1d90] sm:$0xff] }
 0x4f9   :  { %8775 = vmatprep.subr.bf16.mxu1 %v10564_v20  ;;  %v2279_v30 = vld [vmem:[#allocation8 + $0x1db0] sm:$0xff]  ;;  %v2276_v20 = vld [vmem:[#allocation8 + $0x1d98] sm:$0xff] }
 0x4fa   :  { %v10618_v10 = vcombine.high %v2275_v29, %v2279_v30  ;;  %v10617_v54 = vcombine.low %v2275_v29, %v2279_v30  ;;  %v2328_v29 = vld [vmem:[#allocation8 + $0x1f38] sm:$0xff] }
 0x4fb   :  { %8448 = vmatpush1.bf16.msra.mxu0 %v10561_v48  ;;  %v10620_v48 = vcombine.high %v2276_v20, %v2280_v32 }
 0x4fc   :  { %8776 = vmatpush1.bf16.msra.mxu1 %v10563_v52  ;;  %8458 = vmatprep.subr.bf16.mxu0 %v10570_v24  ;;  %v2283_v52 = vld [vmem:[#allocation8 + $0x1dd0] sm:$0xff] }
 0x4fd   :  { %8786 = vmatprep.subr.bf16.mxu1 %v10572_v27  ;;  %v2287_v24 = vld [vmem:[#allocation8 + $0x1df0] sm:$0xff]  ;;  %v2284_v27 = vld [vmem:[#allocation8 + $0x1dd8] sm:$0xff] }
 0x4fe   :  { %8450 = vmatmul.mubr.bf16.vlgmr.msra.gmra.mrb[20].mxu0 %v11549_v57  ;;  %v10626_v55 = vcombine.high %v2283_v52, %v2287_v24  ;;  %v10628_v56 = vcombine.high %v2284_v27, %v2288_v53 }
 0x4ff   :  { %8778 = vmatmul.mubr.bf16.vlgmr.msra.gmra.mrb[20].mxu1 %v11549_v57  ;;  %8459 = vmatpush1.bf16.msra.mxu0 %v10569_v9  ;;  %v10587_v57 = vcombine.low %v2244_v5, %v2248_v14  ;;  %v10619_v9 = vcombine.low %v2276_v20, %v2280_v32  ;;  %v10627_v5 = vcombine.low %v2284_v27, %v2288_v53 }
 0x500   :  { %8490 = vmatprep.mubr.bf16.mxu0 %v11551_v41  ;;  %8787 = vmatpush1.bf16.msra.mxu1 %v10571_v59  ;;  %v2291_v59 = vld [vmem:[#allocation8 + $0x1e10] sm:$0xff] }
 0x501   :  { %8818 = vmatprep.mubr.bf16.mxu1 %v11551_v41  ;;  %8460 = vmatprep.subr.bf16.mxu0 %v10578_v2  ;;  %v10593_v41 = vcombine.low %v2251_v0, %v2255_v11  ;;  %v2295_v2 = vld [vmem:[#allocation8 + $0x1e30] sm:$0xff]  ;;  %v2304_v0 = vld [vmem:[#allocation8 + $0x1e78] sm:$0xff] }
 0x502   :  { %8788 = vmatprep.subr.bf16.mxu1 %v10580_v3  ;;  %v10625_v3 = vcombine.low %v2283_v52, %v2287_v24  ;;  %v10634_v14 = vcombine.high %v2291_v59, %v2295_v2  ;;  %v10633_v11 = vcombine.low %v2291_v59, %v2295_v2  ;;  %v2336_v52 = vld [vmem:[#allocation8 + $0x1f78] sm:$0xff]  ;;  %v11600_v2 = vld [vmem:[#allocation10] sm:$0xff] }
 0x503   :  { %8461 = vmatpush1.bf16.msra.mxu0 %v10577_v7  ;;  %v10636_v7 = vcombine.high %v2292_v63, %v2296_v18  ;;  %v2344_v59 = vld [vmem:[#allocation8 + $0x1fb8] sm:$0xff] }
 0x504   :  { %8789 = vmatpush1.bf16.msra.mxu1 %v10579_v8  ;;  %8462 = vmatprep.subr.bf16.mxu0 %v10586_v44  ;;  %v2299_v8 = vld [vmem:[#allocation8 + $0x1e50] sm:$0xff] }
 0x505   :  { %8790 = vmatprep.subr.bf16.mxu1 %v10588_v6  ;;  %v2303_v44 = vld [vmem:[#allocation8 + $0x1e70] sm:$0xff]  ;;  %v2300_v6 = vld [vmem:[#allocation8 + $0x1e58] sm:$0xff] }
 0x506   :  { %v10642_v39 = vcombine.high %v2299_v8, %v2303_v44  ;;  %v10641_v15 = vcombine.low %v2299_v8, %v2303_v44  ;;  %v10643_v40 = vcombine.low %v2300_v6, %v2304_v0  ;;  %v2362_v8 = vrot.slane %v11600_v2, %v11405_v19  ;;  %v2348_v44 = vld [vmem:[#allocation8 + $0x1fd8] sm:$0xff] }
 0x507   :  { %8463 = vmatpush1.bf16.msra.mxu0 %v10585_v16  ;;  %v10644_v16 = vcombine.high %v2300_v6, %v2304_v0  ;;  %v2352_v6 = vld [vmem:[#allocation8 + $0x1ff8] sm:$0xff]  ;;  %v2370_v0 = vrot.slane %v11600_v2, %v11412_v23  ;;  %v10981_v23 = vld [vmem:[#allocation11 + $0xc0] sm:$0xff]  }
 0x508   :  { %8791 = vmatpush1.bf16.msra.mxu1 %v10587_v57  ;;  %8464 = vmatprep.subr.bf16.mxu0 %v10594_v62  ;;  %v2307_v57 = vld [vmem:[#allocation8 + $0x1e90] sm:$0xff]  ;;  %v10691_v19 = vcombine.low %v2348_v44, %v2352_v6 }
 0x509   :  { %8792 = vmatprep.subr.bf16.mxu1 %v10596_v51  ;;  %v2311_v62 = vld [vmem:[#allocation8 + $0x1eb0] sm:$0xff]  ;;  %v2308_v51 = vld [vmem:[#allocation8 + $0x1e98] sm:$0xff] }
 0x50a   :  { %v10650_v21 = vcombine.high %v2307_v57, %v2311_v62  ;;  %v10649_v45 = vcombine.low %v2307_v57, %v2311_v62  ;;  %v10651_v4 = vcombine.low %v2308_v51, %v2312_v33  ;;  %v10847_v57 = vadd.f32 %v11580_v43, %v2362_v8  ;;  %v11015_v8 = vld [vmem:[#allocation11 + $0x180] sm:$0xff]  }
 0x50b   :  { %8465 = vmatpush1.bf16.msra.mxu0 %v10593_v41  ;;  %v10652_v41 = vcombine.high %v2308_v51, %v2312_v33  ;;  %v10849_v62 = vadd.f32 %v11582_v50, %v2370_v0  ;;  %v10980_v33 = vld [vmem:[#allocation11 + $0x40] sm:$0xff]   ;;  %v10985_v50 = vld [vmem:[#allocation11 + $0xc8] sm:$0xff]  }
 0x50c   :  { %8793 = vmatpush1.bf16.msra.mxu1 %v10595_v37  ;;  %8466 = vmatprep.subr.bf16.mxu0 %v10602_v36  ;;  %v2315_v37 = vld [vmem:[#allocation8 + $0x1ed0] sm:$0xff] }
 0x50d   :  { %8794 = vmatprep.subr.bf16.mxu1 %v10604_v22  ;;  %v2319_v36 = vld [vmem:[#allocation8 + $0x1ef0] sm:$0xff]  ;;  %v2316_v22 = vld [vmem:[#allocation8 + $0x1ed8] sm:$0xff] }
 0x50e   :  { %v10658_v58 = vcombine.high %v2315_v37, %v2319_v36  ;;  %v10657_v30 = vcombine.low %v2315_v37, %v2319_v36  ;;  %v10659_v20 = vcombine.low %v2316_v22, %v2320_v46  ;;  %v10984_v37 = vld [vmem:[#allocation11 + $0x48] sm:$0xff]  }
 0x50f   :  { %8467 = vmatpush1.bf16.msra.mxu0 %v10601_v25  ;;  %v10660_v25 = vcombine.high %v2316_v22, %v2320_v46  ;;  %v10986_v22 = vld [vmem:[#allocation11 + $0x8] sm:$0xff]  }
 0x510   :  { %8795 = vmatpush1.bf16.msra.mxu1 %v10603_v13  ;;  %8468 = vmatprep.subr.bf16.mxu0 %v10610_v26  ;;  %v2323_v13 = vld [vmem:[#allocation8 + $0x1f10] sm:$0xff] }
 0x511   :  { %8796 = vmatprep.subr.bf16.mxu1 %v10612_v28  ;;  %v2327_v26 = vld [vmem:[#allocation8 + $0x1f30] sm:$0xff]  ;;  %v2324_v28 = vld [vmem:[#allocation8 + $0x1f18] sm:$0xff] }
 0x512   :  { %v10666_v32 = vcombine.high %v2323_v13, %v2327_v26  ;;  %v10665_v24 = vcombine.low %v2323_v13, %v2327_v26  ;;  %v10667_v27 = vcombine.low %v2324_v28, %v2328_v29  ;;  %v10987_v46 = vld [vmem:[#allocation11 + $0x88] sm:$0xff]   ;;  %v10992_v13 = vld [vmem:[#allocation11 + $0x58] sm:$0xff]  }
 0x513   :  { %8469 = vmatpush1.bf16.msra.mxu0 %v10609_v35  ;;  %v10668_v35 = vcombine.high %v2324_v28, %v2328_v29  ;;  %v10993_v26 = vld [vmem:[#allocation11 + $0xd8] sm:$0xff]   ;;  %v10996_v29 = vld [vmem:[#allocation11 + $0x60] sm:$0xff]   ;;  %v11018_v0 = vld [vmem:[#allocation11 + $0x108] sm:$0xff]  }
 0x514   :  { %8797 = vmatpush1.bf16.msra.mxu1 %v10611_v34  ;;  %8470 = vmatprep.subr.bf16.mxu0 %v10618_v10  ;;  %v2331_v34 = vld [vmem:[#allocation8 + $0x1f50] sm:$0xff]  ;;  %v10995_v28 = vld [vmem:[#allocation11 + $0x98] sm:$0xff]  }
 0x515   :  { %8798 = vmatprep.subr.bf16.mxu1 %v10620_v48  ;;  %v2335_v10 = vld [vmem:[#allocation8 + $0x1f70] sm:$0xff]  ;;  %v2332_v48 = vld [vmem:[#allocation8 + $0x1f58] sm:$0xff] }
 0x516   :  { %v10674_v53 = vcombine.high %v2331_v34, %v2335_v10  ;;  %v10673_v63 = vcombine.low %v2331_v34, %v2335_v10  ;;  %v10675_v18 = vcombine.low %v2332_v48, %v2336_v52  ;;  %v11001_v34 = vld [vmem:[#allocation11 + $0xe8] sm:$0xff]  }
 0x517   :  { %8471 = vmatpush1.bf16.msra.mxu0 %v10617_v54  ;;  %v10676_v54 = vcombine.high %v2332_v48, %v2336_v52  ;;  %v11002_v10 = vld [vmem:[#allocation11 + $0x28] sm:$0xff]   ;;  %v2358_v48 = vrot.slane %v11600_v2, %v11400_v17  ;;  %v11009_v17 = vld [vmem:[#allocation11 + $0xf8] sm:$0xff]  }
 0x518   :  { %8799 = vmatpush1.bf16.msra.mxu1 %v10619_v9  ;;  %8472 = vmatprep.subr.bf16.mxu0 %v10626_v55  ;;  %v2339_v9 = vld [vmem:[#allocation8 + $0x1f90] sm:$0xff] }
 0x519   :  { %8800 = vmatprep.subr.bf16.mxu1 %v10628_v56  ;;  %v2343_v55 = vld [vmem:[#allocation8 + $0x1fb0] sm:$0xff]  ;;  %v2340_v56 = vld [vmem:[#allocation8 + $0x1f98] sm:$0xff] }
 0x51a   :  { %v11003_v52 = vld [vmem:[#allocation11 + $0xa8] sm:$0xff]  }
 0x51b   :  { %8473 = vmatpush1.bf16.msra.mxu0 %v10625_v3  ;;  %v10682_v3 = vcombine.high %v2339_v9, %v2343_v55 }
 0x51c   :  { %8801 = vmatpush1.bf16.msra.mxu1 %v10627_v5  ;;  %8474 = vmatprep.subr.bf16.mxu0 %v10634_v14  ;;  %v10684_v5 = vcombine.high %v2340_v56, %v2344_v59  ;;  %v2347_v14 = vld [vmem:[#allocation8 + $0x1fd0] sm:$0xff] }
 0x51d   :  { %8802 = vmatprep.subr.bf16.mxu1 %v10636_v7  ;;  %v2351_v7 = vld [vmem:[#allocation8 + $0x1ff0] sm:$0xff] }
 0x51e   :  { %v10689_v51 = vcombine.low %v2347_v14, %v2351_v7 }
 0x51f   :  { %8475 = vmatpush1.bf16.msra.mxu0 %v10633_v11  ;;  %v10681_v11 = vcombine.low %v2339_v9, %v2343_v55  ;;  %v10846_v9 = vadd.f32 %v11576_v61, %v2358_v48  ;;  %v11007_v55 = vld [vmem:[#allocation11 + $0xb0] sm:$0xff]   ;;  %v11014_v61 = vld [vmem:[#allocation11 + $0x100] sm:$0xff]  }
 0x520   :  { %8803 = vmatpush1.bf16.msra.mxu1 %v10635_v12  ;;  %8476 = vmatprep.subr.bf16.mxu0 %v10642_v39  ;;  %v10683_v12 = vcombine.low %v2340_v56, %v2344_v59  ;;  %v10690_v39 = vcombine.high %v2347_v14, %v2351_v7  ;;  %v11008_v56 = vld [vmem:[#allocation11 + $0x78] sm:$0xff]   ;;  %v11013_v14 = vld [vmem:[#allocation11 + $0x1c0] sm:$0xff]  }
 0x521   :  { %8804 = vmatprep.subr.bf16.mxu1 %v10644_v16  ;;  %v10692_v16 = vcombine.high %v2348_v44, %v2352_v6  ;;  %v11016_v44 = vld [vmem:[#allocation11 + $0x148] sm:$0xff]  }
 0x522   :  { %v11017_v6 = vld [vmem:[#allocation11 + $0x1c8] sm:$0xff]  }
 0x523   :  { %8477 = vmatpush1.bf16.msra.mxu0 %v10641_v15  ;;  %v8828_v15 = vmax.f32 %v10847_v57, 0.0  ;;  %v11023_v57 = vld [vmem:[#allocation11 + $0x190] sm:$0xff]  }
 0x524   :  { %8805 = vmatpush1.bf16.msra.mxu1 %v10643_v40  ;;  %8478 = vmatprep.subr.bf16.mxu0 %v10650_v21  ;;  %v8830_v40 = vmax.f32 %v10849_v62, 0.0  ;;  %v10982_v21 = vld [vmem:[#allocation11] sm:$0xff]   ;;  %v11024_v62 = vld [vmem:[#allocation11 + $0x158] sm:$0xff]  }
 0x525   :  { %8806 = vmatprep.subr.bf16.mxu1 %v10652_v41  ;;  %v10983_v41 = vld [vmem:[#allocation11 + $0x80] sm:$0xff]   ;;  %v8836_v43 = vpack.c.bf16 %v8828_v15, %v8828_v15 }
 0x526   :  { %v8838_v36 = vpack.c.bf16 %v8830_v40, %v8830_v40  ;;  %v11029_v15 = vld [vmem:[#allocation11 + $0x1e0] sm:$0xff]  }
 0x527   :  { %8479 = vmatpush1.bf16.msra.mxu0 %v10649_v45  ;;  %v10988_v45 = vld [vmem:[#allocation11 + $0x50] sm:$0xff]   ;;  %v11030_v40 = vld [vmem:[#allocation11 + $0x120] sm:$0xff]  }
 0x528   :  { %8807 = vmatpush1.bf16.msra.mxu1 %v10651_v4  ;;  %8480 = vmatprep.subr.bf16.mxu0 %v10658_v58  ;;  %v10989_v4 = vld [vmem:[#allocation11 + $0xd0] sm:$0xff]  }
 0x529   :  { %8808 = vmatprep.subr.bf16.mxu1 %v10660_v25  ;;  %v10990_v58 = vld [vmem:[#allocation11 + $0x10] sm:$0xff]  }
 0x52a   :  { %v10991_v25 = vld [vmem:[#allocation11 + $0x90] sm:$0xff]  }
 0x52b   :  { %8481 = vmatpush1.bf16.msra.mxu0 %v10657_v30  ;;  %v10997_v30 = vld [vmem:[#allocation11 + $0xe0] sm:$0xff]  }
 0x52c   :  { %8809 = vmatpush1.bf16.msra.mxu1 %v10659_v20  ;;  %8482 = vmatprep.subr.bf16.mxu0 %v10666_v32  ;;  %v10998_v20 = vld [vmem:[#allocation11 + $0x20] sm:$0xff]  }
 0x52d   :  { %8810 = vmatprep.subr.bf16.mxu1 %v10668_v35  ;;  %v10999_v32 = vld [vmem:[#allocation11 + $0xa0] sm:$0xff]   ;;  %v11000_v35 = vld [vmem:[#allocation11 + $0x68] sm:$0xff]  }
 0x52f   :  { %8483 = vmatpush1.bf16.msra.mxu0 %v10665_v24  ;;  %v11004_v24 = vld [vmem:[#allocation11 + $0x70] sm:$0xff]  }
 0x530   :  { %8811 = vmatpush1.bf16.msra.mxu1 %v10667_v27  ;;  %8484 = vmatprep.subr.bf16.mxu0 %v10674_v53  ;;  %v2366_v27 = vrot.slane %v11600_v2, %v11441_v38  ;;  %v11005_v53 = vld [vmem:[#allocation11 + $0xf0] sm:$0xff]   ;;  %v11011_v38 = vld [vmem:[#allocation11 + $0xb8] sm:$0xff]  }
 0x531   :  { %8812 = vmatprep.subr.bf16.mxu1 %v10676_v54  ;;  %v11006_v54 = vld [vmem:[#allocation11 + $0x30] sm:$0xff]  }
 0x532   :  { %v10848_v59 = vadd.f32 %v11578_v42, %v2366_v27 }
 0x533   :  { %8485 = vmatpush1.bf16.msra.mxu0 %v10673_v63  ;;  %v11010_v63 = vld [vmem:[#allocation11 + $0x38] sm:$0xff]  }
 0x534   :  { %8813 = vmatpush1.bf16.msra.mxu1 %v10675_v18  ;;  %8486 = vmatprep.subr.bf16.mxu0 %v10682_v3  ;;  %v8827_v18 = vmax.f32 %v10846_v9, 0.0  ;;  %v11012_v3 = vld [vmem:[#allocation11 + $0x140] sm:$0xff]  }
 0x535   :  { %8814 = vmatprep.subr.bf16.mxu1 %v10684_v5  ;;  %v8829_v5 = vmax.f32 %v10848_v59, 0.0 }
 0x536   :  { %v8835_v7 = vpack.c.bf16 %v8827_v18, %v8827_v18 }
 0x537   :  { %8487 = vmatpush1.bf16.msra.mxu0 %v10681_v11  ;;  %v8837_v42 = vpack.c.bf16 %v8829_v5, %v8829_v5  ;;  %v11019_v11 = vld [vmem:[#allocation11 + $0x188] sm:$0xff]  }
 0x538   :  { %8815 = vmatpush1.bf16.msra.mxu1 %v10683_v12  ;;  %8488 = vmatprep.subr.bf16.mxu0 %v10690_v39  ;;  %v11020_v12 = vld [vmem:[#allocation11 + $0x150] sm:$0xff]  }
 0x539   :  { %8816 = vmatprep.subr.bf16.mxu1 %v10692_v16  ;;  %v11021_v39 = vld [vmem:[#allocation11 + $0x1d0] sm:$0xff]  }
 0x53a   :  { %v11022_v16 = vld [vmem:[#allocation11 + $0x110] sm:$0xff]  }
 0x53b   :  { %8489 = vmatpush1.bf16.msra.mxu0 %v10689_v51  ;;  %v11025_v51 = vld [vmem:[#allocation11 + $0x1d8] sm:$0xff]  }
 0x53c   :  { %8817 = vmatpush1.bf16.msra.mxu1 %v10691_v19  ;;  %10758 = vmatprep.subr.bf16.mxu0 %v10980_v33  ;;  %v11026_v19 = vld [vmem:[#allocation11 + $0x118] sm:$0xff]  }
 0x53d   :  { %10780 = vmatprep.subr.bf16.mxu1 %v10981_v23  ;;  %v11027_v33 = vld [vmem:[#allocation11 + $0x198] sm:$0xff]   ;;  %v11028_v23 = vld [vmem:[#allocation11 + $0x160] sm:$0xff]  }
 0x53e   :  { %8491 = vmatmul.mubr.bf16.vlgmr.msra.gmra.mrb[20].mxu0 %v11558_v49 }
 0x53f   :  { %8819 = vmatmul.mubr.bf16.vlgmr.msra.gmra.mrb[20].mxu1 %v11558_v49  ;;  %10759 = vmatpush3.bf16.msra.mxu0 %v10982_v21  ;;  %v10994_v49 = vld [vmem:[#allocation11 + $0x18] sm:$0xff]   ;;  %v11031_v21 = vld [vmem:[#allocation11 + $0x1a0] sm:$0xff]  }
 0x540   :  { %9394 = vmatprep.mubr.bf16.mxu0 %v8836_v43  ;;  %10781 = vmatpush3.bf16.msra.mxu1 %v10983_v41  ;;  %v11032_v41 = vld [vmem:[#allocation11 + $0x168] sm:$0xff]  }
 0x541   :  { %9434 = vmatprep.mubr.bf16.mxu1 %v8838_v36  ;;  %10760 = vmatprep.subr.bf16.mxu0 %v10984_v37  ;;  %v11033_v37 = vld [vmem:[#allocation11 + $0x1e8] sm:$0xff]   ;;  %v11036_v36 = vld [vmem:[#allocation11 + $0x170] sm:$0xff]  }
 0x542   :  { %10782 = vmatprep.subr.bf16.mxu1 %v10985_v50  ;;  %v11034_v43 = vld [vmem:[#allocation11 + $0x128] sm:$0xff]  }
 0x543   :  { %10761 = vmatpush3.bf16.msra.mxu0 %v10986_v22  ;;  %v11035_v50 = vld [vmem:[#allocation11 + $0x1a8] sm:$0xff]   ;;  %v11037_v22 = vld [vmem:[#allocation11 + $0x1f0] sm:$0xff]  }
 0x544   :  { %10783 = vmatpush3.bf16.msra.mxu1 %v10987_v46  ;;  %10762 = vmatprep.subr.bf16.mxu0 %v10988_v45  ;;  %v11038_v46 = vld [vmem:[#allocation11 + $0x130] sm:$0xff]  }
 0x545   :  { %10784 = vmatprep.subr.bf16.mxu1 %v10989_v4  ;;  %v11039_v45 = vld [vmem:[#allocation11 + $0x1b0] sm:$0xff]   ;;  %v11040_v4 = vld [vmem:[#allocation11 + $0x178] sm:$0xff]  }
 0x547   :  { %10763 = vmatpush3.bf16.msra.mxu0 %v10990_v58  ;;  %v11041_v58 = vld [vmem:[#allocation11 + $0x1f8] sm:$0xff]  }
 0x548   :  { %10785 = vmatpush3.bf16.msra.mxu1 %v10991_v25  ;;  %10764 = vmatprep.subr.bf16.mxu0 %v10992_v13  ;;  %v11042_v25 = vld [vmem:[#allocation11 + $0x138] sm:$0xff]  }
 0x549   :  { %10786 = vmatprep.subr.bf16.mxu1 %v10993_v26  ;;  %v11043_v13 = vld [vmem:[#allocation11 + $0x1b8] sm:$0xff]   ;;  %v2374_v26 = vrot.slane %v11600_v2, %v11475_v31 }
 0x54b   :  { %10765 = vmatpush3.bf16.msra.mxu0 %v10994_v49  ;;  %v2382_v49 = vrot.slane %v11600_v2, %v11482_v60 }
 0x54c   :  { %10787 = vmatpush3.bf16.msra.mxu1 %v10995_v28  ;;  %10766 = vmatprep.subr.bf16.mxu0 %v10996_v29  ;;  %v2378_v28 = vrot.slane %v11600_v2, %v11444_v47  ;;  %v2386_v29 = vrot.slane %v11600_v2, %v11487_v1 }
 0x54d   :  { %10788 = vmatprep.subr.bf16.mxu1 %v10997_v30 }
 0x54f   :  { %10767 = vmatpush3.bf16.msra.mxu0 %v10998_v20 }
 0x550   :  { %10789 = vmatpush3.bf16.msra.mxu1 %v10999_v32  ;;  %10768 = vmatprep.subr.bf16.mxu0 %v11000_v35 }
 0x551   :  { %10790 = vmatprep.subr.bf16.mxu1 %v11001_v34 }
 0x553   :  { %10769 = vmatpush3.bf16.msra.mxu0 %v11002_v10 }
 0x554   :  { %10791 = vmatpush3.bf16.msra.mxu1 %v11003_v52  ;;  %10770 = vmatprep.subr.bf16.mxu0 %v11004_v24 }
 0x555   :  { %10792 = vmatprep.subr.bf16.mxu1 %v11005_v53 }
 0x557   :  { %10771 = vmatpush3.bf16.msra.mxu0 %v11006_v54 }
 0x558   :  { %10793 = vmatpush3.bf16.msra.mxu1 %v11007_v55  ;;  %10772 = vmatprep.subr.bf16.mxu0 %v11008_v56 }
 0x559   :  { %10794 = vmatprep.subr.bf16.mxu1 %v11009_v17 }
 0x55b   :  { %10773 = vmatpush3.bf16.msra.mxu0 %v11010_v63  ;;  %v10693_v63 = vld [vmem:[#allocation13] ss:$0 sm:$0xff] }
 0x55c   :  { %10795 = vmatpush3.bf16.msra.mxu1 %v11011_v38  ;;  %10802 = vmatprep.subr.bf16.mxu0 %v11012_v3 }
 0x55d   :  { %10824 = vmatprep.subr.bf16.mxu1 %v11013_v14 }
 0x55e   :  { %9395 = vmatmul.mubr.bf16.vlgmr.msra.gmra.mrb[24].mxu0 %v8835_v7 }
 0x55f   :  { %9435 = vmatmul.mubr.bf16.vlgmr.msra.gmra.mrb[24].mxu1 %v8837_v42  ;;  %10803 = vmatpush3.bf16.msra.mxu0 %v11014_v61 }
 0x560   :  { %10825 = vmatpush3.bf16.msra.mxu1 %v11015_v8  ;;  %10804 = vmatprep.subr.bf16.mxu0 %v11016_v44 }
 0x561   :  { %10826 = vmatprep.subr.bf16.mxu1 %v11017_v6 }
 0x563   :  { %10805 = vmatpush3.bf16.msra.mxu0 %v11018_v0 }
 0x564   :  { %10827 = vmatpush3.bf16.msra.mxu1 %v11019_v11  ;;  %10806 = vmatprep.subr.bf16.mxu0 %v11020_v12 }
 0x565   :  { %10828 = vmatprep.subr.bf16.mxu1 %v11021_v39 }
 0x567   :  { %10807 = vmatpush3.bf16.msra.mxu0 %v11022_v16 }
 0x568   :  { %10829 = vmatpush3.bf16.msra.mxu1 %v11023_v57  ;;  %10808 = vmatprep.subr.bf16.mxu0 %v11024_v62 }
 0x569   :  { %10830 = vmatprep.subr.bf16.mxu1 %v11025_v51 }
 0x56b   :  { %10809 = vmatpush3.bf16.msra.mxu0 %v11026_v19 }
 0x56c   :  { %10831 = vmatpush3.bf16.msra.mxu1 %v11027_v33  ;;  %10810 = vmatprep.subr.bf16.mxu0 %v11028_v23 }
 0x56d   :  { %10832 = vmatprep.subr.bf16.mxu1 %v11029_v15 }
 0x56f   :  { %10811 = vmatpush3.bf16.msra.mxu0 %v11030_v40 }
 0x570   :  { %10833 = vmatpush3.bf16.msra.mxu1 %v11031_v21  ;;  %10812 = vmatprep.subr.bf16.mxu0 %v11032_v41 }
 0x571   :  { %10834 = vmatprep.subr.bf16.mxu1 %v11033_v37 }
 0x573   :  { %10813 = vmatpush3.bf16.msra.mxu0 %v11034_v43 }
 0x574   :  { %10835 = vmatpush3.bf16.msra.mxu1 %v11035_v50  ;;  %10814 = vmatprep.subr.bf16.mxu0 %v11036_v36 }
 0x575   :  { %10836 = vmatprep.subr.bf16.mxu1 %v11037_v22 }
 0x577   :  { %10815 = vmatpush3.bf16.msra.mxu0 %v11038_v46 }
 0x578   :  { %10837 = vmatpush3.bf16.msra.mxu1 %v11039_v45  ;;  %10816 = vmatprep.subr.bf16.mxu0 %v11040_v4 }
 0x579   :  { %10838 = vmatprep.subr.bf16.mxu1 %v11041_v58 }
 0x57b   :  { %10817 = vmatpush3.bf16.msra.mxu0 %v11042_v25 }
 0x57c   :  { %10839 = vmatpush3.bf16.msra.mxu1 %v11043_v13 }
 0x611   :  { %v8492_v30 = vpop.f32.mrb[20].mxu0 }
 0x612   :  { %v10850_v20 = vadd.f32 %v8492_v30, %v2374_v26  ;;  %v8820_v32 = vpop.f32.mrb[20].mxu1  ;;  %v8494_v35 = vpop.f32.mrb[21].mxu0 }
 0x613   :  { %v10852_v34 = vadd.f32 %v8820_v32, %v2382_v49  ;;  %v10851_v10 = vadd.f32 %v8494_v35, %v2378_v28  ;;  %v8822_v48 = vpop.f32.mrb[21].mxu1  ;;  %v8496_v52 = vpop.f32.mrb[22].mxu0 }
 0x614   :  { %v8831_v24 = vmax.f32 %v10850_v20, 0.0  ;;  %v10853_v27 = vadd.f32 %v8822_v48, %v2386_v29  ;;  %v8824_v31 = vpop.f32.mrb[22].mxu1  ;;  %v8497_v53 = vpop.f32.mrb[23].mxu0 }
 0x615   :  { %v8833_v54 = vmax.f32 %v10852_v34, 0.0  ;;  %v8832_v60 = vmax.f32 %v10851_v10, 0.0  ;;  %v8825_v9 = vpop.f32.mrb[23].mxu1 }
 0x616   :  { %v8834_v55 = vmax.f32 %v10853_v27, 0.0  ;;  %v8839_v56 = vpack.c.bf16 %v8831_v24, %v8831_v24 }
 0x617   :  { %v8840_v47 = vpack.c.bf16 %v8832_v60, %v8832_v60  ;;  %v8841_v1 = vpack.c.bf16 %v8833_v54, %v8833_v54 }
 0x618   :  { %v8842_v59 = vpack.c.bf16 %v8834_v55, %v8834_v55 }
 0x619   :  { %9474 = vmatprep.mubr.bf16.mxu0 %v8840_v47 }
 0x61a   :  { %9514 = vmatprep.mubr.bf16.mxu1 %v8842_v59  ;;  %9475 = vmatmul.mubr.bf16.vlgmr.msra.gmra.mrb[28].mxu0 %v8839_v56 }
 0x61b   :  { %9515 = vmatmul.mubr.bf16.vlgmr.msra.gmra.mrb[28].mxu1 %v8841_v1 }
 0x631   :  { %v10774_v2 = vpop.f32.mrb[24].mxu0 }
 0x632   :  { %v10796_v17 = vpop.f32.mrb[24].mxu1  ;;  %v10775_v18 = vpop.f32.mrb[25].mxu0 }
 0x633   :  { %v10776_v38 = vadd.f32 %v10775_v18, %v10774_v2  ;;  %v10797_v3 = vpop.f32.mrb[25].mxu1  ;;  %v10777_v5 = vpop.f32.mrb[26].mxu0 }
 0x634   :  { %v10798_v14 = vadd.f32 %v10797_v3, %v10796_v17  ;;  %v10799_v61 = vpop.f32.mrb[26].mxu1  ;;  %v10778_v7 = vpop.f32.mrb[27].mxu0 }
 0x635   :  { %v9397_v8 = vadd.f32 %v10776_v38, %v10693_v63  ;;  %v10800_v44 = vpop.f32.mrb[27].mxu1 }
 0x637   :  { %v9437_v42 = vadd.f32 %v10798_v14, %v9397_v8 }
 0x6ed   :  { %v10818_v6 = vpop.f32.mrb[28].mxu0 }
 0x6ee   :  { %v10840_v0 = vpop.f32.mrb[28].mxu1  ;;  %v10819_v11 = vpop.f32.mrb[29].mxu0 }
 0x6ef   :  { %v10820_v12 = vadd.f32 %v10819_v11, %v10818_v6  ;;  %v10841_v39 = vpop.f32.mrb[29].mxu1  ;;  %v10821_v16 = vpop.f32.mrb[30].mxu0 }
 0x6f0   :  { %v10842_v57 = vadd.f32 %v10841_v39, %v10840_v0  ;;  %v10843_v62 = vpop.f32.mrb[30].mxu1  ;;  %v10822_v51 = vpop.f32.mrb[31].mxu0 }
 0x6f1   :  { %v9477_v19 = vadd.f32 %v10820_v12, %v9437_v42  ;;  %v10844_v33 = vpop.f32.mrb[31].mxu1 }
 0x6f3   :  { %v9517_v23 = vadd.f32 %v10842_v57, %v9477_v19 }
 0x6f5   :  { %9522 = vst [vmem:[#allocation14] sm:$0xff] %v9517_v23 }
 0x6f6   :  { %11211 = shalt.err (!%p11208_p4)
}
 0x6f7   :  { %s11212_s8 = scalar_lea.hbm %s11643_s7, 128 }
 0x6f8   :  { %p11213_p5 = scmp.ne.s32.totalorder %s11643_s7, %s11212_s8  ;;  %p11216_p6 = scmp.lt.u32.totalorder %s11212_s8, %s11643_s7 }
 0x6fa   :  { %p11218_p7 = pnand %p11216_p6, %p11213_p5 }
 0x6fc   :  { %11221 = shalt.err (!%p11218_p7)
}
 0x6fd   :  { %9532 = dma.vmem_to_hbm [thread:$0]  %s9530_s14, 128, %s11643_s7, [#allocation4]  }
 0x6fe   :  { %11230 = dma.done.wait [#allocation4], 128  }
 0x6ff   :  { %11231 = vsyncadd [#allocation4], 4294967168 }
 0x700   :  { %9536 = vsyncpa [#allocation3], 1 }
 0x701   :  { %9537 = vsyncpa [#allocation6], 1 }
 0x702   :  { %9538 = vsyncpa [#allocation9], 1 }
 0x703   :  { %9539 = vsyncpa [#allocation12], 1 }
 0x704   :  { %9540 = vsyncpa [#allocation4], 1 }

</bundles_post_ra>
